<compile_context>
chip_gen: v5e
topology: v5e:2x2
jax: 0.10.0
libtpu: 0.0.40
codegen_flags: <defaults>
</compile_context>

<pallas_src>
import functools

import jax
import jax.numpy as jnp
from jax import lax
from jax.experimental import pallas as pl
from jax.experimental.pallas import tpu as pltpu


# ---------------- fused CBAM kernel (one batch element per grid step) ----------------
def cbam_kernel(x_ref, w1_ref, b1_ref, w2_ref, b2_ref, wsp_ref, bn_ref,
                out_ref, cpe_ref, *, H, W):
    K, P = 7, 3
    S = H * W
    PADF = P * W + P              # flat halo width: row over/underflow lands in zeros

    x = x_ref[0]                  # (C, S), lane-dense (S on lanes)
    C = x.shape[0]

    # ---------- channel gate: single MLP pass over stacked [avg, max] ----------
    avg_p = jnp.mean(x, axis=1, keepdims=True)           # (C, 1) == avg_pool2d(x,(H,W))
    max_p = jnp.max(x, axis=1, keepdims=True)            # (C, 1) == max_pool2d(x,(H,W))
    col2 = lax.broadcasted_iota(jnp.int32, (C, 2), 1)
    p2 = jnp.where(col2 == 0, avg_p, max_p)              # (C, 2) = [avg | max]

    h = jnp.dot(w1_ref[...], p2, preferred_element_type=jnp.float32) + b1_ref[...]
    h = jnp.maximum(h, 0.0)                               # ReLU, (Cr, 2)
    att2 = jnp.dot(w2_ref[...], h, preferred_element_type=jnp.float32) + b2_ref[...]
    att = jnp.sum(att2, axis=1, keepdims=True)            # (C, 1) = mlp(avg)+mlp(max)
    cscale = 1.0 / (1.0 + jnp.exp(-att))                  # sigmoid
    y = x * cscale                                        # (C, S) channel-gated

    # ---------- channel pool: (2, S) = [max over C ; mean over C] ----------
    cp_max = jnp.max(y, axis=0, keepdims=True)            # (1, S)
    cp_mean = jnp.mean(y, axis=0, keepdims=True)          # (1, S)
    row2 = lax.broadcasted_iota(jnp.int32, (2, S), 0)
    cp = jnp.where(row2 == 0, cp_max, cp_mean)            # (2, S), single store below

    # halo-padded flat copy in scratch (zero halos every step: scratch persists
    # across grid steps and may live per-core, so no pl.when(pid==0) hoist)
    cpe_ref[:, 0:PADF] = jnp.zeros((2, PADF), jnp.float32)
    cpe_ref[:, PADF + S:PADF + S + PADF] = jnp.zeros((2, PADF), jnp.float32)
    cpe_ref[:, PADF:PADF + S] = cp

    # ---------- 7x7 conv (pad 3, 2->1 channels) on the flattened map ----------
    # tap (c, dy, dx): out[s] += w[c,dy,dx] * cp[c, s + (dy-3)*W + (dx-3)]
    # rows out of range hit the zero halo; column wrap is masked per dx.
    col = lax.broadcasted_iota(jnp.int32, (1, S), 1) % W
    conv = jnp.zeros((1, S), jnp.float32)
    for dx in range(K):
        dxp = dx - P
        part = jnp.zeros((1, S), jnp.float32)             # independent per-dx accumulator
        for dy in range(K):
            start = PADF + (dy - P) * W + dxp
            sh = cpe_ref[:, start:start + S]               # (2, S), lane-shifted slice
            w0 = wsp_ref[dy * K + dx]                      # scalar taps from SMEM
            w1t = wsp_ref[K * K + dy * K + dx]
            part = part + w0 * sh[0:1, :] + w1t * sh[1:2, :]
        if dxp != 0:
            cm = (col + dxp >= 0) & (col + dxp < W)
            part = jnp.where(cm, part, 0.0)
        conv = conv + part

    # folded eval-mode BatchNorm + sigmoid spatial gate
    smap = conv * bn_ref[0] + bn_ref[1]                    # (1, S)
    sscale = 1.0 / (1.0 + jnp.exp(-smap))                  # sigmoid
    out_ref[0] = y * sscale                                # lane-dense (C, S) store


# ---------------- wrapper ----------------
def cbam_forward(x, params):
    N, C, H, W = x.shape
    S = H * W
    Cr = params["w1"].shape[0]
    PADF = 3 * W + 3

    x2 = x.reshape(N, C, S)
    kernel = functools.partial(cbam_kernel, H=H, W=W)

    out2 = pl.pallas_call(
        kernel,
        out_shape=jax.ShapeDtypeStruct((N, C, S), jnp.float32),
        grid=(N,),
        in_specs=[
            pl.BlockSpec((1, C, S), lambda n: (n, 0, 0)),       # x (flattened)
            pl.BlockSpec((Cr, C), lambda n: (0, 0)),            # mlp w1
            pl.BlockSpec((Cr, 1), lambda n: (0, 0)),            # mlp b1
            pl.BlockSpec((C, Cr), lambda n: (0, 0)),            # mlp w2
            pl.BlockSpec((C, 1), lambda n: (0, 0)),             # mlp b2
            pl.BlockSpec(memory_space=pltpu.MemorySpace.SMEM),  # 7x7 conv taps (98,)
            pl.BlockSpec(memory_space=pltpu.MemorySpace.SMEM),  # folded BN scale/shift
        ],
        out_specs=pl.BlockSpec((1, C, S), lambda n: (n, 0, 0)),
        scratch_shapes=[pltpu.VMEM((2, S + 2 * PADF), jnp.float32)],
        compiler_params=pltpu.CompilerParams(
            dimension_semantics=("parallel",)),                 # batch axis -> megacore
    )(x2, params["w1"], params["b1"], params["w2"], params["b2"],
      params["wsp_flat"], params["bn"])

    return out2.reshape(N, C, H, W)


# ---------------- pure-JAX reference (for validation only) ----------------
def cbam_reference(x, params):
    avg = jnp.mean(x, axis=(2, 3))
    mx = jnp.max(x, axis=(2, 3))
    w1, b1 = params["w1"], params["b1"][:, 0]
    w2, b2 = params["w2"], params["b2"][:, 0]

    def mlp(p):
        h = jnp.maximum(p @ w1.T + b1, 0.0)
        return h @ w2.T + b2

    cscale = jax.nn.sigmoid(mlp(avg) + mlp(mx))[:, :, None, None]
    y = x * cscale

    cp = jnp.concatenate([jnp.max(y, axis=1, keepdims=True),
                          jnp.mean(y, axis=1, keepdims=True)], axis=1)
    wsp = params["wsp_flat"].reshape(1, 2, 7, 7)
    conv = jax.lax.conv_general_dilated(
        cp, wsp, window_strides=(1, 1), padding=((3, 3), (3, 3)),
        dimension_numbers=("NCHW", "OIHW", "NCHW"))
    smap = conv * params["bn"][0] + params["bn"][1]
    return y * jax.nn.sigmoid(smap)


if __name__ == "__main__":
    # small shapes consistent with the module: gate_channels=32, reduction_ratio=16
    N, C, H, W = 2, 32, 16, 16
    Cr = C // 16

    key = jax.random.PRNGKey(0)
    kx, k1, k2, k3, k4, k5 = jax.random.split(key, 6)

    x = jax.random.normal(kx, (N, C, H, W), jnp.float32)

    eps = 1e-5
    params = {
        "w1": jax.random.normal(k1, (Cr, C), jnp.float32) * 0.1,   # Conv2d(C, C//r, 1).weight
        "b1": jax.random.normal(k2, (Cr, 1), jnp.float32) * 0.1,   # its bias
        "w2": jax.random.normal(k3, (C, Cr), jnp.float32) * 0.1,   # Conv2d(C//r, C, 1).weight
        "b2": jax.random.normal(k4, (C, 1), jnp.float32) * 0.1,    # its bias
        "wsp_flat": (jax.random.normal(k5, (2, 7, 7), jnp.float32) * 0.1).reshape(-1),
        # folded BatchNorm2d(1) eval stats: gamma=1, beta=0, mean=0, var=1
        "bn": jnp.array([1.0 / (1.0 + eps) ** 0.5, 0.0], jnp.float32),
    }

    out = cbam_forward(x, params)
    out = jax.block_until_ready(out)

    ref = cbam_reference(x, params)
    assert out.shape == (N, C, H, W)
    assert bool(jnp.allclose(out, ref, rtol=5e-4, atol=1e-4)), "mismatch vs reference"

    print("KERNEL_OK")
</pallas_src>

<mosaic_0001>
module attributes {stable_mosaic.version = 11 : i64} {
  func.func @cbam_kernel(%arg0: i32, %arg1: memref<1x32x256xf32, #tpu.memory_space<vmem>>, %arg2: memref<2x32xf32, #tpu.memory_space<vmem>>, %arg3: memref<2x1xf32, #tpu.memory_space<vmem>>, %arg4: memref<32x2xf32, #tpu.memory_space<vmem>>, %arg5: memref<32x1xf32, #tpu.memory_space<vmem>>, %arg6: memref<98xf32, #tpu.memory_space<smem>>, %arg7: memref<2xf32, #tpu.memory_space<smem>>, %arg8: memref<1x32x256xf32, #tpu.memory_space<vmem>>, %arg9: memref<2x358xf32, #tpu.memory_space<vmem>>) attributes {dimension_semantics = [#tpu.dimension_semantics<parallel>], iteration_bounds = array<i64: 2>, scalar_prefetch = 0 : i64, scratch_operands = 1 : i64, tpu.core_type = #tpu.core_type<tc>, window_params = [{transform_indices = @transform_0, window_bounds = array<i64: 1, 32, 256>}, {pipeline_mode = #tpu.pipeline_mode<synchronous>, transform_indices = @transform_1, window_bounds = array<i64: 2, 32>}, {pipeline_mode = #tpu.pipeline_mode<synchronous>, transform_indices = @transform_2, window_bounds = array<i64: 2, 1>}, {pipeline_mode = #tpu.pipeline_mode<synchronous>, transform_indices = @transform_3, window_bounds = array<i64: 32, 2>}, {pipeline_mode = #tpu.pipeline_mode<synchronous>, transform_indices = @transform_4, window_bounds = array<i64: 32, 1>}, {transform_indices = @transform_5, window_bounds = array<i64: 98>}, {transform_indices = @transform_6, window_bounds = array<i64: 2>}, {transform_indices = @transform_7, window_bounds = array<i64: 1, 32, 256>}]} {
    %c0 = arith.constant 0 : index
    %c0_0 = arith.constant 0 : index
    %c0_1 = arith.constant 0 : index
    %0 = vector.load %arg1[%c0, %c0_0, %c0_1] : memref<1x32x256xf32, #tpu.memory_space<vmem>>, vector<1x32x256xf32>
    %1 = vector.shape_cast %0 : vector<1x32x256xf32> to vector<32x256xf32>
    %cst = arith.constant dense<0.000000e+00> : vector<32xf32>
    %2 = vector.multi_reduction <add>, %1, %cst [1] : vector<32x256xf32> to vector<32xf32>
    %3 = vector.shape_cast %2 : vector<32xf32> to vector<32x1xf32>
    %cst_2 = arith.constant 2.560000e+02 : f32
    %4 = vector.broadcast %cst_2 : f32 to vector<32x1xf32>
    %5 = arith.divf %3, %4 : vector<32x1xf32>
    %cst_3 = arith.constant dense<0xFF800000> : vector<32xf32>
    %6 = vector.multi_reduction <maximumf>, %1, %cst_3 [1] : vector<32x256xf32> to vector<32xf32>
    %7 = vector.shape_cast %6 : vector<32xf32> to vector<32x1xf32>
    %8 = tpu.iota {dimensions = array<i32: 1>} : vector<32x2xi32>
    %c0_i32 = arith.constant 0 : i32
    %9 = vector.broadcast %c0_i32 : i32 to vector<32x2xi32>
    %10 = arith.cmpi eq, %8, %9 : vector<32x2xi32>
    %11 = vector.shape_cast %5 : vector<32x1xf32> to vector<32x1xf32>
    %12 = vector.broadcast %11 : vector<32x1xf32> to vector<32x2xf32>
    %13 = vector.shape_cast %7 : vector<32x1xf32> to vector<32x1xf32>
    %14 = vector.broadcast %13 : vector<32x1xf32> to vector<32x2xf32>
    %15 = arith.select %10, %12, %14 : vector<32x2xi1>, vector<32x2xf32>
    %c0_4 = arith.constant 0 : index
    %c0_5 = arith.constant 0 : index
    %16 = vector.load %arg2[%c0_4, %c0_5] : memref<2x32xf32, #tpu.memory_space<vmem>>, vector<2x32xf32>
    %cst_6 = arith.constant dense<0.000000e+00> : vector<2x2xf32>
    %17 = tpu.matmul %16, %15, %cst_6 {dimension_numbers = #tpu.dot_dimension_numbers<[1], [0], [0], [1], [0, 0, 1, 1], [], []>} : vector<2x32xf32>, vector<32x2xf32>, vector<2x2xf32> -> vector<2x2xf32>
    %c0_7 = arith.constant 0 : index
    %c0_8 = arith.constant 0 : index
    %18 = vector.load %arg3[%c0_7, %c0_8] : memref<2x1xf32, #tpu.memory_space<vmem>>, vector<2x1xf32>
    %19 = vector.broadcast %18 : vector<2x1xf32> to vector<2x2xf32>
    %20 = arith.addf %17, %19 : vector<2x2xf32>
    %cst_9 = arith.constant 0.000000e+00 : f32
    %21 = vector.broadcast %cst_9 : f32 to vector<2x2xf32>
    %22 = arith.maximumf %20, %21 : vector<2x2xf32>
    %c0_10 = arith.constant 0 : index
    %c0_11 = arith.constant 0 : index
    %23 = vector.load %arg4[%c0_10, %c0_11] : memref<32x2xf32, #tpu.memory_space<vmem>>, vector<32x2xf32>
    %cst_12 = arith.constant dense<0.000000e+00> : vector<32x2xf32>
    %24 = tpu.matmul %23, %22, %cst_12 {dimension_numbers = #tpu.dot_dimension_numbers<[1], [0], [0], [1], [0, 0, 1, 1], [], []>} : vector<32x2xf32>, vector<2x2xf32>, vector<32x2xf32> -> vector<32x2xf32>
    %c0_13 = arith.constant 0 : index
    %c0_14 = arith.constant 0 : index
    %25 = vector.load %arg5[%c0_13, %c0_14] : memref<32x1xf32, #tpu.memory_space<vmem>>, vector<32x1xf32>
    %26 = vector.broadcast %25 : vector<32x1xf32> to vector<32x2xf32>
    %27 = arith.addf %24, %26 : vector<32x2xf32>
    %cst_15 = arith.constant dense<0.000000e+00> : vector<32xf32>
    %28 = vector.multi_reduction <add>, %27, %cst_15 [1] : vector<32x2xf32> to vector<32xf32>
    %29 = vector.shape_cast %28 : vector<32xf32> to vector<32x1xf32>
    %cst_16 = arith.constant 0.000000e+00 : f32
    %30 = vector.broadcast %cst_16 : f32 to vector<32x1xf32>
    %31 = arith.subf %30, %29 : vector<32x1xf32>
    %32 = math.exp %31 : vector<32x1xf32>
    %cst_17 = arith.constant 1.000000e+00 : f32
    %33 = vector.broadcast %cst_17 : f32 to vector<32x1xf32>
    %34 = arith.addf %33, %32 : vector<32x1xf32>
    %cst_18 = arith.constant 1.000000e+00 : f32
    %35 = vector.broadcast %cst_18 : f32 to vector<32x1xf32>
    %36 = arith.divf %35, %34 : vector<32x1xf32>
    %37 = vector.broadcast %36 : vector<32x1xf32> to vector<32x256xf32>
    %38 = arith.mulf %1, %37 : vector<32x256xf32>
    %cst_19 = arith.constant dense<0xFF800000> : vector<256xf32>
    %39 = vector.multi_reduction <maximumf>, %38, %cst_19 [0] : vector<32x256xf32> to vector<256xf32>
    %40 = vector.shape_cast %39 : vector<256xf32> to vector<1x256xf32>
    %cst_20 = arith.constant dense<0.000000e+00> : vector<256xf32>
    %41 = vector.multi_reduction <add>, %38, %cst_20 [0] : vector<32x256xf32> to vector<256xf32>
    %42 = vector.shape_cast %41 : vector<256xf32> to vector<1x256xf32>
    %cst_21 = arith.constant 3.200000e+01 : f32
    %43 = vector.broadcast %cst_21 : f32 to vector<1x256xf32>
    %44 = arith.divf %42, %43 : vector<1x256xf32>
    %45 = tpu.iota {dimensions = array<i32: 0>} : vector<2x256xi32>
    %c0_i32_22 = arith.constant 0 : i32
    %46 = vector.broadcast %c0_i32_22 : i32 to vector<2x256xi32>
    %47 = arith.cmpi eq, %45, %46 : vector<2x256xi32>
    %48 = vector.shape_cast %40 : vector<1x256xf32> to vector<1x256xf32>
    %49 = vector.broadcast %48 : vector<1x256xf32> to vector<2x256xf32>
    %50 = vector.shape_cast %44 : vector<1x256xf32> to vector<1x256xf32>
    %51 = vector.broadcast %50 : vector<1x256xf32> to vector<2x256xf32>
    %52 = arith.select %47, %49, %51 : vector<2x256xi1>, vector<2x256xf32>
    %cst_23 = arith.constant 0.000000e+00 : f32
    %53 = vector.broadcast %cst_23 : f32 to vector<2x51xf32>
    %c0_24 = arith.constant 0 : index
    %c0_25 = arith.constant 0 : index
    %54 = vector.load %arg9[%c0_24, %c0_25] : memref<2x358xf32, #tpu.memory_space<vmem>>, vector<2x51xf32>
    tpu.vector_store %arg9[%c0_24, %c0_25], %53 {strides = array<i32>} : memref<2x358xf32, #tpu.memory_space<vmem>>, vector<2x51xf32>,
    %cst_26 = arith.constant 0.000000e+00 : f32
    %55 = vector.broadcast %cst_26 : f32 to vector<2x51xf32>
    %c0_27 = arith.constant 0 : index
    %c307 = arith.constant 307 : index
    %56 = vector.load %arg9[%c0_27, %c307] : memref<2x358xf32, #tpu.memory_space<vmem>>, vector<2x51xf32>
    tpu.vector_store %arg9[%c0_27, %c307], %55 {strides = array<i32>} : memref<2x358xf32, #tpu.memory_space<vmem>>, vector<2x51xf32>,
    %c0_28 = arith.constant 0 : index
    %c51 = arith.constant 51 : index
    %57 = vector.load %arg9[%c0_28, %c51] : memref<2x358xf32, #tpu.memory_space<vmem>>, vector<2x256xf32>
    tpu.vector_store %arg9[%c0_28, %c51], %52 {strides = array<i32>} : memref<2x358xf32, #tpu.memory_space<vmem>>, vector<2x256xf32>,
    %58 = tpu.iota {dimensions = array<i32: 1>} : vector<1x256xi32>
    %c16_i32 = arith.constant 16 : i32
    %c0_i32_29 = arith.constant 0 : i32
    %59 = arith.cmpi eq, %c16_i32, %c0_i32_29 : i32
    %c1_i32 = arith.constant 1 : i32
    %60 = arith.select %59, %c1_i32, %c16_i32 : i32
    %61 = vector.broadcast %60 : i32 to vector<1x256xi32>
    %62 = arith.remsi %58, %61 : vector<1x256xi32>
    %c0_i32_30 = arith.constant 0 : i32
    %63 = vector.broadcast %c0_i32_30 : i32 to vector<1x256xi32>
    %64 = arith.cmpi ne, %62, %63 : vector<1x256xi32>
    %c0_i32_31 = arith.constant 0 : i32
    %65 = vector.broadcast %c0_i32_31 : i32 to vector<1x256xi32>
    %66 = arith.cmpi slt, %62, %65 : vector<1x256xi32>
    %c0_i32_32 = arith.constant 0 : i32
    %67 = arith.cmpi slt, %60, %c0_i32_32 : i32
    %68 = vector.broadcast %67 : i1 to vector<1x256xi1>
    %69 = vector.broadcast %68 : vector<1x256xi1> to vector<1x256xi1>
    %70 = arith.xori %66, %69 : vector<1x256xi1>
    %71 = arith.andi %70, %64 : vector<1x256xi1>
    %72 = vector.broadcast %60 : i32 to vector<1x256xi32>
    %73 = arith.addi %62, %72 : vector<1x256xi32>
    %74 = arith.select %71, %73, %62 : vector<1x256xi1>, vector<1x256xi32>
    %cst_33 = arith.constant 0.000000e+00 : f32
    %75 = vector.broadcast %cst_33 : f32 to vector<1x256xf32>
    %cst_34 = arith.constant 0.000000e+00 : f32
    %76 = vector.broadcast %cst_34 : f32 to vector<1x256xf32>
    %c0_35 = arith.constant 0 : index
    %c0_36 = arith.constant 0 : index
    %77 = vector.load %arg9[%c0_35, %c0_36] : memref<2x358xf32, #tpu.memory_space<vmem>>, vector<2x256xf32>
    %c0_37 = arith.constant 0 : index
    %78 = memref.load %arg6[%c0_37] : memref<98xf32, #tpu.memory_space<smem>>
    %c49 = arith.constant 49 : index
    %79 = memref.load %arg6[%c49] : memref<98xf32, #tpu.memory_space<smem>>
    %80 = vector.extract_strided_slice %77 {offsets = [0, 0], sizes = [1, 256], strides = [1, 1]} : vector<2x256xf32> to vector<1x256xf32>
    %81 = vector.broadcast %78 : f32 to vector<1x256xf32>
    %82 = arith.mulf %81, %80 : vector<1x256xf32>
    %83 = arith.addf %76, %82 : vector<1x256xf32>
    %84 = vector.extract_strided_slice %77 {offsets = [1, 0], sizes = [1, 256], strides = [1, 1]} : vector<2x256xf32> to vector<1x256xf32>
    %85 = vector.broadcast %79 : f32 to vector<1x256xf32>
    %86 = arith.mulf %85, %84 : vector<1x256xf32>
    %87 = arith.addf %83, %86 : vector<1x256xf32>
    %c0_38 = arith.constant 0 : index
    %c16 = arith.constant 16 : index
    %88 = vector.load %arg9[%c0_38, %c16] : memref<2x358xf32, #tpu.memory_space<vmem>>, vector<2x256xf32>
    %c7 = arith.constant 7 : index
    %89 = memref.load %arg6[%c7] : memref<98xf32, #tpu.memory_space<smem>>
    %c56 = arith.constant 56 : index
    %90 = memref.load %arg6[%c56] : memref<98xf32, #tpu.memory_space<smem>>
    %91 = vector.extract_strided_slice %88 {offsets = [0, 0], sizes = [1, 256], strides = [1, 1]} : vector<2x256xf32> to vector<1x256xf32>
    %92 = vector.broadcast %89 : f32 to vector<1x256xf32>
    %93 = arith.mulf %92, %91 : vector<1x256xf32>
    %94 = arith.addf %87, %93 : vector<1x256xf32>
    %95 = vector.extract_strided_slice %88 {offsets = [1, 0], sizes = [1, 256], strides = [1, 1]} : vector<2x256xf32> to vector<1x256xf32>
    %96 = vector.broadcast %90 : f32 to vector<1x256xf32>
    %97 = arith.mulf %96, %95 : vector<1x256xf32>
    %98 = arith.addf %94, %97 : vector<1x256xf32>
    %c0_39 = arith.constant 0 : index
    %c32 = arith.constant 32 : index
    %99 = vector.load %arg9[%c0_39, %c32] : memref<2x358xf32, #tpu.memory_space<vmem>>, vector<2x256xf32>
    %c14 = arith.constant 14 : index
    %100 = memref.load %arg6[%c14] : memref<98xf32, #tpu.memory_space<smem>>
    %c63 = arith.constant 63 : index
    %101 = memref.load %arg6[%c63] : memref<98xf32, #tpu.memory_space<smem>>
    %102 = vector.extract_strided_slice %99 {offsets = [0, 0], sizes = [1, 256], strides = [1, 1]} : vector<2x256xf32> to vector<1x256xf32>
    %103 = vector.broadcast %100 : f32 to vector<1x256xf32>
    %104 = arith.mulf %103, %102 : vector<1x256xf32>
    %105 = arith.addf %98, %104 : vector<1x256xf32>
    %106 = vector.extract_strided_slice %99 {offsets = [1, 0], sizes = [1, 256], strides = [1, 1]} : vector<2x256xf32> to vector<1x256xf32>
    %107 = vector.broadcast %101 : f32 to vector<1x256xf32>
    %108 = arith.mulf %107, %106 : vector<1x256xf32>
    %109 = arith.addf %105, %108 : vector<1x256xf32>
    %c0_40 = arith.constant 0 : index
    %c48 = arith.constant 48 : index
    %110 = vector.load %arg9[%c0_40, %c48] : memref<2x358xf32, #tpu.memory_space<vmem>>, vector<2x256xf32>
    %c21 = arith.constant 21 : index
    %111 = memref.load %arg6[%c21] : memref<98xf32, #tpu.memory_space<smem>>
    %c70 = arith.constant 70 : index
    %112 = memref.load %arg6[%c70] : memref<98xf32, #tpu.memory_space<smem>>
    %113 = vector.extract_strided_slice %110 {offsets = [0, 0], sizes = [1, 256], strides = [1, 1]} : vector<2x256xf32> to vector<1x256xf32>
    %114 = vector.broadcast %111 : f32 to vector<1x256xf32>
    %115 = arith.mulf %114, %113 : vector<1x256xf32>
    %116 = arith.addf %109, %115 : vector<1x256xf32>
    %117 = vector.extract_strided_slice %110 {offsets = [1, 0], sizes = [1, 256], strides = [1, 1]} : vector<2x256xf32> to vector<1x256xf32>
    %118 = vector.broadcast %112 : f32 to vector<1x256xf32>
    %119 = arith.mulf %118, %117 : vector<1x256xf32>
    %120 = arith.addf %116, %119 : vector<1x256xf32>
    %c0_41 = arith.constant 0 : index
    %c64 = arith.constant 64 : index
    %121 = vector.load %arg9[%c0_41, %c64] : memref<2x358xf32, #tpu.memory_space<vmem>>, vector<2x256xf32>
    %c28 = arith.constant 28 : index
    %122 = memref.load %arg6[%c28] : memref<98xf32, #tpu.memory_space<smem>>
    %c77 = arith.constant 77 : index
    %123 = memref.load %arg6[%c77] : memref<98xf32, #tpu.memory_space<smem>>
    %124 = vector.extract_strided_slice %121 {offsets = [0, 0], sizes = [1, 256], strides = [1, 1]} : vector<2x256xf32> to vector<1x256xf32>
    %125 = vector.broadcast %122 : f32 to vector<1x256xf32>
    %126 = arith.mulf %125, %124 : vector<1x256xf32>
    %127 = arith.addf %120, %126 : vector<1x256xf32>
    %128 = vector.extract_strided_slice %121 {offsets = [1, 0], sizes = [1, 256], strides = [1, 1]} : vector<2x256xf32> to vector<1x256xf32>
    %129 = vector.broadcast %123 : f32 to vector<1x256xf32>
    %130 = arith.mulf %129, %128 : vector<1x256xf32>
    %131 = arith.addf %127, %130 : vector<1x256xf32>
    %c0_42 = arith.constant 0 : index
    %c80 = arith.constant 80 : index
    %132 = vector.load %arg9[%c0_42, %c80] : memref<2x358xf32, #tpu.memory_space<vmem>>, vector<2x256xf32>
    %c35 = arith.constant 35 : index
    %133 = memref.load %arg6[%c35] : memref<98xf32, #tpu.memory_space<smem>>
    %c84 = arith.constant 84 : index
    %134 = memref.load %arg6[%c84] : memref<98xf32, #tpu.memory_space<smem>>
    %135 = vector.extract_strided_slice %132 {offsets = [0, 0], sizes = [1, 256], strides = [1, 1]} : vector<2x256xf32> to vector<1x256xf32>
    %136 = vector.broadcast %133 : f32 to vector<1x256xf32>
    %137 = arith.mulf %136, %135 : vector<1x256xf32>
    %138 = arith.addf %131, %137 : vector<1x256xf32>
    %139 = vector.extract_strided_slice %132 {offsets = [1, 0], sizes = [1, 256], strides = [1, 1]} : vector<2x256xf32> to vector<1x256xf32>
    %140 = vector.broadcast %134 : f32 to vector<1x256xf32>
    %141 = arith.mulf %140, %139 : vector<1x256xf32>
    %142 = arith.addf %138, %141 : vector<1x256xf32>
    %c0_43 = arith.constant 0 : index
    %c96 = arith.constant 96 : index
    %143 = vector.load %arg9[%c0_43, %c96] : memref<2x358xf32, #tpu.memory_space<vmem>>, vector<2x256xf32>
    %c42 = arith.constant 42 : index
    %144 = memref.load %arg6[%c42] : memref<98xf32, #tpu.memory_space<smem>>
    %c91 = arith.constant 91 : index
    %145 = memref.load %arg6[%c91] : memref<98xf32, #tpu.memory_space<smem>>
    %146 = vector.extract_strided_slice %143 {offsets = [0, 0], sizes = [1, 256], strides = [1, 1]} : vector<2x256xf32> to vector<1x256xf32>
    %147 = vector.broadcast %144 : f32 to vector<1x256xf32>
    %148 = arith.mulf %147, %146 : vector<1x256xf32>
    %149 = arith.addf %142, %148 : vector<1x256xf32>
    %150 = vector.extract_strided_slice %143 {offsets = [1, 0], sizes = [1, 256], strides = [1, 1]} : vector<2x256xf32> to vector<1x256xf32>
    %151 = vector.broadcast %145 : f32 to vector<1x256xf32>
    %152 = arith.mulf %151, %150 : vector<1x256xf32>
    %153 = arith.addf %149, %152 : vector<1x256xf32>
    %c-3_i32 = arith.constant -3 : i32
    %154 = vector.broadcast %c-3_i32 : i32 to vector<1x256xi32>
    %155 = arith.addi %74, %154 : vector<1x256xi32>
    %c0_i32_44 = arith.constant 0 : i32
    %156 = vector.broadcast %c0_i32_44 : i32 to vector<1x256xi32>
    %157 = arith.cmpi sge, %155, %156 : vector<1x256xi32>
    %c-3_i32_45 = arith.constant -3 : i32
    %158 = vector.broadcast %c-3_i32_45 : i32 to vector<1x256xi32>
    %159 = arith.addi %74, %158 : vector<1x256xi32>
    %c16_i32_46 = arith.constant 16 : i32
    %160 = vector.broadcast %c16_i32_46 : i32 to vector<1x256xi32>
    %161 = arith.cmpi slt, %159, %160 : vector<1x256xi32>
    %162 = arith.andi %157, %161 : vector<1x256xi1>
    %cst_47 = arith.constant 0.000000e+00 : f32
    %163 = vector.broadcast %cst_47 : f32 to vector<1x256xf32>
    %164 = arith.select %162, %153, %163 : vector<1x256xi1>, vector<1x256xf32>
    %165 = arith.addf %75, %164 : vector<1x256xf32>
    %cst_48 = arith.constant 0.000000e+00 : f32
    %166 = vector.broadcast %cst_48 : f32 to vector<1x256xf32>
    %c0_49 = arith.constant 0 : index
    %c1 = arith.constant 1 : index
    %167 = vector.load %arg9[%c0_49, %c1] : memref<2x358xf32, #tpu.memory_space<vmem>>, vector<2x256xf32>
    %c1_50 = arith.constant 1 : index
    %168 = memref.load %arg6[%c1_50] : memref<98xf32, #tpu.memory_space<smem>>
    %c50 = arith.constant 50 : index
    %169 = memref.load %arg6[%c50] : memref<98xf32, #tpu.memory_space<smem>>
    %170 = vector.extract_strided_slice %167 {offsets = [0, 0], sizes = [1, 256], strides = [1, 1]} : vector<2x256xf32> to vector<1x256xf32>
    %171 = vector.broadcast %168 : f32 to vector<1x256xf32>
    %172 = arith.mulf %171, %170 : vector<1x256xf32>
    %173 = arith.addf %166, %172 : vector<1x256xf32>
    %174 = vector.extract_strided_slice %167 {offsets = [1, 0], sizes = [1, 256], strides = [1, 1]} : vector<2x256xf32> to vector<1x256xf32>
    %175 = vector.broadcast %169 : f32 to vector<1x256xf32>
    %176 = arith.mulf %175, %174 : vector<1x256xf32>
    %177 = arith.addf %173, %176 : vector<1x256xf32>
    %c0_51 = arith.constant 0 : index
    %c17 = arith.constant 17 : index
    %178 = vector.load %arg9[%c0_51, %c17] : memref<2x358xf32, #tpu.memory_space<vmem>>, vector<2x256xf32>
    %c8 = arith.constant 8 : index
    %179 = memref.load %arg6[%c8] : memref<98xf32, #tpu.memory_space<smem>>
    %c57 = arith.constant 57 : index
    %180 = memref.load %arg6[%c57] : memref<98xf32, #tpu.memory_space<smem>>
    %181 = vector.extract_strided_slice %178 {offsets = [0, 0], sizes = [1, 256], strides = [1, 1]} : vector<2x256xf32> to vector<1x256xf32>
    %182 = vector.broadcast %179 : f32 to vector<1x256xf32>
    %183 = arith.mulf %182, %181 : vector<1x256xf32>
    %184 = arith.addf %177, %183 : vector<1x256xf32>
    %185 = vector.extract_strided_slice %178 {offsets = [1, 0], sizes = [1, 256], strides = [1, 1]} : vector<2x256xf32> to vector<1x256xf32>
    %186 = vector.broadcast %180 : f32 to vector<1x256xf32>
    %187 = arith.mulf %186, %185 : vector<1x256xf32>
    %188 = arith.addf %184, %187 : vector<1x256xf32>
    %c0_52 = arith.constant 0 : index
    %c33 = arith.constant 33 : index
    %189 = vector.load %arg9[%c0_52, %c33] : memref<2x358xf32, #tpu.memory_space<vmem>>, vector<2x256xf32>
    %c15 = arith.constant 15 : index
    %190 = memref.load %arg6[%c15] : memref<98xf32, #tpu.memory_space<smem>>
    %c64_53 = arith.constant 64 : index
    %191 = memref.load %arg6[%c64_53] : memref<98xf32, #tpu.memory_space<smem>>
    %192 = vector.extract_strided_slice %189 {offsets = [0, 0], sizes = [1, 256], strides = [1, 1]} : vector<2x256xf32> to vector<1x256xf32>
    %193 = vector.broadcast %190 : f32 to vector<1x256xf32>
    %194 = arith.mulf %193, %192 : vector<1x256xf32>
    %195 = arith.addf %188, %194 : vector<1x256xf32>
    %196 = vector.extract_strided_slice %189 {offsets = [1, 0], sizes = [1, 256], strides = [1, 1]} : vector<2x256xf32> to vector<1x256xf32>
    %197 = vector.broadcast %191 : f32 to vector<1x256xf32>
    %198 = arith.mulf %197, %196 : vector<1x256xf32>
    %199 = arith.addf %195, %198 : vector<1x256xf32>
    %c0_54 = arith.constant 0 : index
    %c49_55 = arith.constant 49 : index
    %200 = vector.load %arg9[%c0_54, %c49_55] : memref<2x358xf32, #tpu.memory_space<vmem>>, vector<2x256xf32>
    %c22 = arith.constant 22 : index
    %201 = memref.load %arg6[%c22] : memref<98xf32, #tpu.memory_space<smem>>
    %c71 = arith.constant 71 : index
    %202 = memref.load %arg6[%c71] : memref<98xf32, #tpu.memory_space<smem>>
    %203 = vector.extract_strided_slice %200 {offsets = [0, 0], sizes = [1, 256], strides = [1, 1]} : vector<2x256xf32> to vector<1x256xf32>
    %204 = vector.broadcast %201 : f32 to vector<1x256xf32>
    %205 = arith.mulf %204, %203 : vector<1x256xf32>
    %206 = arith.addf %199, %205 : vector<1x256xf32>
    %207 = vector.extract_strided_slice %200 {offsets = [1, 0], sizes = [1, 256], strides = [1, 1]} : vector<2x256xf32> to vector<1x256xf32>
    %208 = vector.broadcast %202 : f32 to vector<1x256xf32>
    %209 = arith.mulf %208, %207 : vector<1x256xf32>
    %210 = arith.addf %206, %209 : vector<1x256xf32>
    %c0_56 = arith.constant 0 : index
    %c65 = arith.constant 65 : index
    %211 = vector.load %arg9[%c0_56, %c65] : memref<2x358xf32, #tpu.memory_space<vmem>>, vector<2x256xf32>
    %c29 = arith.constant 29 : index
    %212 = memref.load %arg6[%c29] : memref<98xf32, #tpu.memory_space<smem>>
    %c78 = arith.constant 78 : index
    %213 = memref.load %arg6[%c78] : memref<98xf32, #tpu.memory_space<smem>>
    %214 = vector.extract_strided_slice %211 {offsets = [0, 0], sizes = [1, 256], strides = [1, 1]} : vector<2x256xf32> to vector<1x256xf32>
    %215 = vector.broadcast %212 : f32 to vector<1x256xf32>
    %216 = arith.mulf %215, %214 : vector<1x256xf32>
    %217 = arith.addf %210, %216 : vector<1x256xf32>
    %218 = vector.extract_strided_slice %211 {offsets = [1, 0], sizes = [1, 256], strides = [1, 1]} : vector<2x256xf32> to vector<1x256xf32>
    %219 = vector.broadcast %213 : f32 to vector<1x256xf32>
    %220 = arith.mulf %219, %218 : vector<1x256xf32>
    %221 = arith.addf %217, %220 : vector<1x256xf32>
    %c0_57 = arith.constant 0 : index
    %c81 = arith.constant 81 : index
    %222 = vector.load %arg9[%c0_57, %c81] : memref<2x358xf32, #tpu.memory_space<vmem>>, vector<2x256xf32>
    %c36 = arith.constant 36 : index
    %223 = memref.load %arg6[%c36] : memref<98xf32, #tpu.memory_space<smem>>
    %c85 = arith.constant 85 : index
    %224 = memref.load %arg6[%c85] : memref<98xf32, #tpu.memory_space<smem>>
    %225 = vector.extract_strided_slice %222 {offsets = [0, 0], sizes = [1, 256], strides = [1, 1]} : vector<2x256xf32> to vector<1x256xf32>
    %226 = vector.broadcast %223 : f32 to vector<1x256xf32>
    %227 = arith.mulf %226, %225 : vector<1x256xf32>
    %228 = arith.addf %221, %227 : vector<1x256xf32>
    %229 = vector.extract_strided_slice %222 {offsets = [1, 0], sizes = [1, 256], strides = [1, 1]} : vector<2x256xf32> to vector<1x256xf32>
    %230 = vector.broadcast %224 : f32 to vector<1x256xf32>
    %231 = arith.mulf %230, %229 : vector<1x256xf32>
    %232 = arith.addf %228, %231 : vector<1x256xf32>
    %c0_58 = arith.constant 0 : index
    %c97 = arith.constant 97 : index
    %233 = vector.load %arg9[%c0_58, %c97] : memref<2x358xf32, #tpu.memory_space<vmem>>, vector<2x256xf32>
    %c43 = arith.constant 43 : index
    %234 = memref.load %arg6[%c43] : memref<98xf32, #tpu.memory_space<smem>>
    %c92 = arith.constant 92 : index
    %235 = memref.load %arg6[%c92] : memref<98xf32, #tpu.memory_space<smem>>
    %236 = vector.extract_strided_slice %233 {offsets = [0, 0], sizes = [1, 256], strides = [1, 1]} : vector<2x256xf32> to vector<1x256xf32>
    %237 = vector.broadcast %234 : f32 to vector<1x256xf32>
    %238 = arith.mulf %237, %236 : vector<1x256xf32>
    %239 = arith.addf %232, %238 : vector<1x256xf32>
    %240 = vector.extract_strided_slice %233 {offsets = [1, 0], sizes = [1, 256], strides = [1, 1]} : vector<2x256xf32> to vector<1x256xf32>
    %241 = vector.broadcast %235 : f32 to vector<1x256xf32>
    %242 = arith.mulf %241, %240 : vector<1x256xf32>
    %243 = arith.addf %239, %242 : vector<1x256xf32>
    %c-2_i32 = arith.constant -2 : i32
    %244 = vector.broadcast %c-2_i32 : i32 to vector<1x256xi32>
    %245 = arith.addi %74, %244 : vector<1x256xi32>
    %c0_i32_59 = arith.constant 0 : i32
    %246 = vector.broadcast %c0_i32_59 : i32 to vector<1x256xi32>
    %247 = arith.cmpi sge, %245, %246 : vector<1x256xi32>
    %c-2_i32_60 = arith.constant -2 : i32
    %248 = vector.broadcast %c-2_i32_60 : i32 to vector<1x256xi32>
    %249 = arith.addi %74, %248 : vector<1x256xi32>
    %c16_i32_61 = arith.constant 16 : i32
    %250 = vector.broadcast %c16_i32_61 : i32 to vector<1x256xi32>
    %251 = arith.cmpi slt, %249, %250 : vector<1x256xi32>
    %252 = arith.andi %247, %251 : vector<1x256xi1>
    %cst_62 = arith.constant 0.000000e+00 : f32
    %253 = vector.broadcast %cst_62 : f32 to vector<1x256xf32>
    %254 = arith.select %252, %243, %253 : vector<1x256xi1>, vector<1x256xf32>
    %255 = arith.addf %165, %254 : vector<1x256xf32>
    %cst_63 = arith.constant 0.000000e+00 : f32
    %256 = vector.broadcast %cst_63 : f32 to vector<1x256xf32>
    %c0_64 = arith.constant 0 : index
    %c2 = arith.constant 2 : index
    %257 = vector.load %arg9[%c0_64, %c2] : memref<2x358xf32, #tpu.memory_space<vmem>>, vector<2x256xf32>
    %c2_65 = arith.constant 2 : index
    %258 = memref.load %arg6[%c2_65] : memref<98xf32, #tpu.memory_space<smem>>
    %c51_66 = arith.constant 51 : index
    %259 = memref.load %arg6[%c51_66] : memref<98xf32, #tpu.memory_space<smem>>
    %260 = vector.extract_strided_slice %257 {offsets = [0, 0], sizes = [1, 256], strides = [1, 1]} : vector<2x256xf32> to vector<1x256xf32>
    %261 = vector.broadcast %258 : f32 to vector<1x256xf32>
    %262 = arith.mulf %261, %260 : vector<1x256xf32>
    %263 = arith.addf %256, %262 : vector<1x256xf32>
    %264 = vector.extract_strided_slice %257 {offsets = [1, 0], sizes = [1, 256], strides = [1, 1]} : vector<2x256xf32> to vector<1x256xf32>
    %265 = vector.broadcast %259 : f32 to vector<1x256xf32>
    %266 = arith.mulf %265, %264 : vector<1x256xf32>
    %267 = arith.addf %263, %266 : vector<1x256xf32>
    %c0_67 = arith.constant 0 : index
    %c18 = arith.constant 18 : index
    %268 = vector.load %arg9[%c0_67, %c18] : memref<2x358xf32, #tpu.memory_space<vmem>>, vector<2x256xf32>
    %c9 = arith.constant 9 : index
    %269 = memref.load %arg6[%c9] : memref<98xf32, #tpu.memory_space<smem>>
    %c58 = arith.constant 58 : index
    %270 = memref.load %arg6[%c58] : memref<98xf32, #tpu.memory_space<smem>>
    %271 = vector.extract_strided_slice %268 {offsets = [0, 0], sizes = [1, 256], strides = [1, 1]} : vector<2x256xf32> to vector<1x256xf32>
    %272 = vector.broadcast %269 : f32 to vector<1x256xf32>
    %273 = arith.mulf %272, %271 : vector<1x256xf32>
    %274 = arith.addf %267, %273 : vector<1x256xf32>
    %275 = vector.extract_strided_slice %268 {offsets = [1, 0], sizes = [1, 256], strides = [1, 1]} : vector<2x256xf32> to vector<1x256xf32>
    %276 = vector.broadcast %270 : f32 to vector<1x256xf32>
    %277 = arith.mulf %276, %275 : vector<1x256xf32>
    %278 = arith.addf %274, %277 : vector<1x256xf32>
    %c0_68 = arith.constant 0 : index
    %c34 = arith.constant 34 : index
    %279 = vector.load %arg9[%c0_68, %c34] : memref<2x358xf32, #tpu.memory_space<vmem>>, vector<2x256xf32>
    %c16_69 = arith.constant 16 : index
    %280 = memref.load %arg6[%c16_69] : memref<98xf32, #tpu.memory_space<smem>>
    %c65_70 = arith.constant 65 : index
    %281 = memref.load %arg6[%c65_70] : memref<98xf32, #tpu.memory_space<smem>>
    %282 = vector.extract_strided_slice %279 {offsets = [0, 0], sizes = [1, 256], strides = [1, 1]} : vector<2x256xf32> to vector<1x256xf32>
    %283 = vector.broadcast %280 : f32 to vector<1x256xf32>
    %284 = arith.mulf %283, %282 : vector<1x256xf32>
    %285 = arith.addf %278, %284 : vector<1x256xf32>
    %286 = vector.extract_strided_slice %279 {offsets = [1, 0], sizes = [1, 256], strides = [1, 1]} : vector<2x256xf32> to vector<1x256xf32>
    %287 = vector.broadcast %281 : f32 to vector<1x256xf32>
    %288 = arith.mulf %287, %286 : vector<1x256xf32>
    %289 = arith.addf %285, %288 : vector<1x256xf32>
    %c0_71 = arith.constant 0 : index
    %c50_72 = arith.constant 50 : index
    %290 = vector.load %arg9[%c0_71, %c50_72] : memref<2x358xf32, #tpu.memory_space<vmem>>, vector<2x256xf32>
    %c23 = arith.constant 23 : index
    %291 = memref.load %arg6[%c23] : memref<98xf32, #tpu.memory_space<smem>>
    %c72 = arith.constant 72 : index
    %292 = memref.load %arg6[%c72] : memref<98xf32, #tpu.memory_space<smem>>
    %293 = vector.extract_strided_slice %290 {offsets = [0, 0], sizes = [1, 256], strides = [1, 1]} : vector<2x256xf32> to vector<1x256xf32>
    %294 = vector.broadcast %291 : f32 to vector<1x256xf32>
    %295 = arith.mulf %294, %293 : vector<1x256xf32>
    %296 = arith.addf %289, %295 : vector<1x256xf32>
    %297 = vector.extract_strided_slice %290 {offsets = [1, 0], sizes = [1, 256], strides = [1, 1]} : vector<2x256xf32> to vector<1x256xf32>
    %298 = vector.broadcast %292 : f32 to vector<1x256xf32>
    %299 = arith.mulf %298, %297 : vector<1x256xf32>
    %300 = arith.addf %296, %299 : vector<1x256xf32>
    %c0_73 = arith.constant 0 : index
    %c66 = arith.constant 66 : index
    %301 = vector.load %arg9[%c0_73, %c66] : memref<2x358xf32, #tpu.memory_space<vmem>>, vector<2x256xf32>
    %c30 = arith.constant 30 : index
    %302 = memref.load %arg6[%c30] : memref<98xf32, #tpu.memory_space<smem>>
    %c79 = arith.constant 79 : index
    %303 = memref.load %arg6[%c79] : memref<98xf32, #tpu.memory_space<smem>>
    %304 = vector.extract_strided_slice %301 {offsets = [0, 0], sizes = [1, 256], strides = [1, 1]} : vector<2x256xf32> to vector<1x256xf32>
    %305 = vector.broadcast %302 : f32 to vector<1x256xf32>
    %306 = arith.mulf %305, %304 : vector<1x256xf32>
    %307 = arith.addf %300, %306 : vector<1x256xf32>
    %308 = vector.extract_strided_slice %301 {offsets = [1, 0], sizes = [1, 256], strides = [1, 1]} : vector<2x256xf32> to vector<1x256xf32>
    %309 = vector.broadcast %303 : f32 to vector<1x256xf32>
    %310 = arith.mulf %309, %308 : vector<1x256xf32>
    %311 = arith.addf %307, %310 : vector<1x256xf32>
    %c0_74 = arith.constant 0 : index
    %c82 = arith.constant 82 : index
    %312 = vector.load %arg9[%c0_74, %c82] : memref<2x358xf32, #tpu.memory_space<vmem>>, vector<2x256xf32>
    %c37 = arith.constant 37 : index
    %313 = memref.load %arg6[%c37] : memref<98xf32, #tpu.memory_space<smem>>
    %c86 = arith.constant 86 : index
    %314 = memref.load %arg6[%c86] : memref<98xf32, #tpu.memory_space<smem>>
    %315 = vector.extract_strided_slice %312 {offsets = [0, 0], sizes = [1, 256], strides = [1, 1]} : vector<2x256xf32> to vector<1x256xf32>
    %316 = vector.broadcast %313 : f32 to vector<1x256xf32>
    %317 = arith.mulf %316, %315 : vector<1x256xf32>
    %318 = arith.addf %311, %317 : vector<1x256xf32>
    %319 = vector.extract_strided_slice %312 {offsets = [1, 0], sizes = [1, 256], strides = [1, 1]} : vector<2x256xf32> to vector<1x256xf32>
    %320 = vector.broadcast %314 : f32 to vector<1x256xf32>
    %321 = arith.mulf %320, %319 : vector<1x256xf32>
    %322 = arith.addf %318, %321 : vector<1x256xf32>
    %c0_75 = arith.constant 0 : index
    %c98 = arith.constant 98 : index
    %323 = vector.load %arg9[%c0_75, %c98] : memref<2x358xf32, #tpu.memory_space<vmem>>, vector<2x256xf32>
    %c44 = arith.constant 44 : index
    %324 = memref.load %arg6[%c44] : memref<98xf32, #tpu.memory_space<smem>>
    %c93 = arith.constant 93 : index
    %325 = memref.load %arg6[%c93] : memref<98xf32, #tpu.memory_space<smem>>
    %326 = vector.extract_strided_slice %323 {offsets = [0, 0], sizes = [1, 256], strides = [1, 1]} : vector<2x256xf32> to vector<1x256xf32>
    %327 = vector.broadcast %324 : f32 to vector<1x256xf32>
    %328 = arith.mulf %327, %326 : vector<1x256xf32>
    %329 = arith.addf %322, %328 : vector<1x256xf32>
    %330 = vector.extract_strided_slice %323 {offsets = [1, 0], sizes = [1, 256], strides = [1, 1]} : vector<2x256xf32> to vector<1x256xf32>
    %331 = vector.broadcast %325 : f32 to vector<1x256xf32>
    %332 = arith.mulf %331, %330 : vector<1x256xf32>
    %333 = arith.addf %329, %332 : vector<1x256xf32>
    %c-1_i32 = arith.constant -1 : i32
    %334 = vector.broadcast %c-1_i32 : i32 to vector<1x256xi32>
    %335 = arith.addi %74, %334 : vector<1x256xi32>
    %c0_i32_76 = arith.constant 0 : i32
    %336 = vector.broadcast %c0_i32_76 : i32 to vector<1x256xi32>
    %337 = arith.cmpi sge, %335, %336 : vector<1x256xi32>
    %c-1_i32_77 = arith.constant -1 : i32
    %338 = vector.broadcast %c-1_i32_77 : i32 to vector<1x256xi32>
    %339 = arith.addi %74, %338 : vector<1x256xi32>
    %c16_i32_78 = arith.constant 16 : i32
    %340 = vector.broadcast %c16_i32_78 : i32 to vector<1x256xi32>
    %341 = arith.cmpi slt, %339, %340 : vector<1x256xi32>
    %342 = arith.andi %337, %341 : vector<1x256xi1>
    %cst_79 = arith.constant 0.000000e+00 : f32
    %343 = vector.broadcast %cst_79 : f32 to vector<1x256xf32>
    %344 = arith.select %342, %333, %343 : vector<1x256xi1>, vector<1x256xf32>
    %345 = arith.addf %255, %344 : vector<1x256xf32>
    %cst_80 = arith.constant 0.000000e+00 : f32
    %346 = vector.broadcast %cst_80 : f32 to vector<1x256xf32>
    %c0_81 = arith.constant 0 : index
    %c3 = arith.constant 3 : index
    %347 = vector.load %arg9[%c0_81, %c3] : memref<2x358xf32, #tpu.memory_space<vmem>>, vector<2x256xf32>
    %c3_82 = arith.constant 3 : index
    %348 = memref.load %arg6[%c3_82] : memref<98xf32, #tpu.memory_space<smem>>
    %c52 = arith.constant 52 : index
    %349 = memref.load %arg6[%c52] : memref<98xf32, #tpu.memory_space<smem>>
    %350 = vector.extract_strided_slice %347 {offsets = [0, 0], sizes = [1, 256], strides = [1, 1]} : vector<2x256xf32> to vector<1x256xf32>
    %351 = vector.broadcast %348 : f32 to vector<1x256xf32>
    %352 = arith.mulf %351, %350 : vector<1x256xf32>
    %353 = arith.addf %346, %352 : vector<1x256xf32>
    %354 = vector.extract_strided_slice %347 {offsets = [1, 0], sizes = [1, 256], strides = [1, 1]} : vector<2x256xf32> to vector<1x256xf32>
    %355 = vector.broadcast %349 : f32 to vector<1x256xf32>
    %356 = arith.mulf %355, %354 : vector<1x256xf32>
    %357 = arith.addf %353, %356 : vector<1x256xf32>
    %c0_83 = arith.constant 0 : index
    %c19 = arith.constant 19 : index
    %358 = vector.load %arg9[%c0_83, %c19] : memref<2x358xf32, #tpu.memory_space<vmem>>, vector<2x256xf32>
    %c10 = arith.constant 10 : index
    %359 = memref.load %arg6[%c10] : memref<98xf32, #tpu.memory_space<smem>>
    %c59 = arith.constant 59 : index
    %360 = memref.load %arg6[%c59] : memref<98xf32, #tpu.memory_space<smem>>
    %361 = vector.extract_strided_slice %358 {offsets = [0, 0], sizes = [1, 256], strides = [1, 1]} : vector<2x256xf32> to vector<1x256xf32>
    %362 = vector.broadcast %359 : f32 to vector<1x256xf32>
    %363 = arith.mulf %362, %361 : vector<1x256xf32>
    %364 = arith.addf %357, %363 : vector<1x256xf32>
    %365 = vector.extract_strided_slice %358 {offsets = [1, 0], sizes = [1, 256], strides = [1, 1]} : vector<2x256xf32> to vector<1x256xf32>
    %366 = vector.broadcast %360 : f32 to vector<1x256xf32>
    %367 = arith.mulf %366, %365 : vector<1x256xf32>
    %368 = arith.addf %364, %367 : vector<1x256xf32>
    %c0_84 = arith.constant 0 : index
    %c35_85 = arith.constant 35 : index
    %369 = vector.load %arg9[%c0_84, %c35_85] : memref<2x358xf32, #tpu.memory_space<vmem>>, vector<2x256xf32>
    %c17_86 = arith.constant 17 : index
    %370 = memref.load %arg6[%c17_86] : memref<98xf32, #tpu.memory_space<smem>>
    %c66_87 = arith.constant 66 : index
    %371 = memref.load %arg6[%c66_87] : memref<98xf32, #tpu.memory_space<smem>>
    %372 = vector.extract_strided_slice %369 {offsets = [0, 0], sizes = [1, 256], strides = [1, 1]} : vector<2x256xf32> to vector<1x256xf32>
    %373 = vector.broadcast %370 : f32 to vector<1x256xf32>
    %374 = arith.mulf %373, %372 : vector<1x256xf32>
    %375 = arith.addf %368, %374 : vector<1x256xf32>
    %376 = vector.extract_strided_slice %369 {offsets = [1, 0], sizes = [1, 256], strides = [1, 1]} : vector<2x256xf32> to vector<1x256xf32>
    %377 = vector.broadcast %371 : f32 to vector<1x256xf32>
    %378 = arith.mulf %377, %376 : vector<1x256xf32>
    %379 = arith.addf %375, %378 : vector<1x256xf32>
    %c0_88 = arith.constant 0 : index
    %c51_89 = arith.constant 51 : index
    %380 = vector.load %arg9[%c0_88, %c51_89] : memref<2x358xf32, #tpu.memory_space<vmem>>, vector<2x256xf32>
    %c24 = arith.constant 24 : index
    %381 = memref.load %arg6[%c24] : memref<98xf32, #tpu.memory_space<smem>>
    %c73 = arith.constant 73 : index
    %382 = memref.load %arg6[%c73] : memref<98xf32, #tpu.memory_space<smem>>
    %383 = vector.extract_strided_slice %380 {offsets = [0, 0], sizes = [1, 256], strides = [1, 1]} : vector<2x256xf32> to vector<1x256xf32>
    %384 = vector.broadcast %381 : f32 to vector<1x256xf32>
    %385 = arith.mulf %384, %383 : vector<1x256xf32>
    %386 = arith.addf %379, %385 : vector<1x256xf32>
    %387 = vector.extract_strided_slice %380 {offsets = [1, 0], sizes = [1, 256], strides = [1, 1]} : vector<2x256xf32> to vector<1x256xf32>
    %388 = vector.broadcast %382 : f32 to vector<1x256xf32>
    %389 = arith.mulf %388, %387 : vector<1x256xf32>
    %390 = arith.addf %386, %389 : vector<1x256xf32>
    %c0_90 = arith.constant 0 : index
    %c67 = arith.constant 67 : index
    %391 = vector.load %arg9[%c0_90, %c67] : memref<2x358xf32, #tpu.memory_space<vmem>>, vector<2x256xf32>
    %c31 = arith.constant 31 : index
    %392 = memref.load %arg6[%c31] : memref<98xf32, #tpu.memory_space<smem>>
    %c80_91 = arith.constant 80 : index
    %393 = memref.load %arg6[%c80_91] : memref<98xf32, #tpu.memory_space<smem>>
    %394 = vector.extract_strided_slice %391 {offsets = [0, 0], sizes = [1, 256], strides = [1, 1]} : vector<2x256xf32> to vector<1x256xf32>
    %395 = vector.broadcast %392 : f32 to vector<1x256xf32>
    %396 = arith.mulf %395, %394 : vector<1x256xf32>
    %397 = arith.addf %390, %396 : vector<1x256xf32>
    %398 = vector.extract_strided_slice %391 {offsets = [1, 0], sizes = [1, 256], strides = [1, 1]} : vector<2x256xf32> to vector<1x256xf32>
    %399 = vector.broadcast %393 : f32 to vector<1x256xf32>
    %400 = arith.mulf %399, %398 : vector<1x256xf32>
    %401 = arith.addf %397, %400 : vector<1x256xf32>
    %c0_92 = arith.constant 0 : index
    %c83 = arith.constant 83 : index
    %402 = vector.load %arg9[%c0_92, %c83] : memref<2x358xf32, #tpu.memory_space<vmem>>, vector<2x256xf32>
    %c38 = arith.constant 38 : index
    %403 = memref.load %arg6[%c38] : memref<98xf32, #tpu.memory_space<smem>>
    %c87 = arith.constant 87 : index
    %404 = memref.load %arg6[%c87] : memref<98xf32, #tpu.memory_space<smem>>
    %405 = vector.extract_strided_slice %402 {offsets = [0, 0], sizes = [1, 256], strides = [1, 1]} : vector<2x256xf32> to vector<1x256xf32>
    %406 = vector.broadcast %403 : f32 to vector<1x256xf32>
    %407 = arith.mulf %406, %405 : vector<1x256xf32>
    %408 = arith.addf %401, %407 : vector<1x256xf32>
    %409 = vector.extract_strided_slice %402 {offsets = [1, 0], sizes = [1, 256], strides = [1, 1]} : vector<2x256xf32> to vector<1x256xf32>
    %410 = vector.broadcast %404 : f32 to vector<1x256xf32>
    %411 = arith.mulf %410, %409 : vector<1x256xf32>
    %412 = arith.addf %408, %411 : vector<1x256xf32>
    %c0_93 = arith.constant 0 : index
    %c99 = arith.constant 99 : index
    %413 = vector.load %arg9[%c0_93, %c99] : memref<2x358xf32, #tpu.memory_space<vmem>>, vector<2x256xf32>
    %c45 = arith.constant 45 : index
    %414 = memref.load %arg6[%c45] : memref<98xf32, #tpu.memory_space<smem>>
    %c94 = arith.constant 94 : index
    %415 = memref.load %arg6[%c94] : memref<98xf32, #tpu.memory_space<smem>>
    %416 = vector.extract_strided_slice %413 {offsets = [0, 0], sizes = [1, 256], strides = [1, 1]} : vector<2x256xf32> to vector<1x256xf32>
    %417 = vector.broadcast %414 : f32 to vector<1x256xf32>
    %418 = arith.mulf %417, %416 : vector<1x256xf32>
    %419 = arith.addf %412, %418 : vector<1x256xf32>
    %420 = vector.extract_strided_slice %413 {offsets = [1, 0], sizes = [1, 256], strides = [1, 1]} : vector<2x256xf32> to vector<1x256xf32>
    %421 = vector.broadcast %415 : f32 to vector<1x256xf32>
    %422 = arith.mulf %421, %420 : vector<1x256xf32>
    %423 = arith.addf %419, %422 : vector<1x256xf32>
    %424 = arith.addf %345, %423 : vector<1x256xf32>
    %cst_94 = arith.constant 0.000000e+00 : f32
    %425 = vector.broadcast %cst_94 : f32 to vector<1x256xf32>
    %c0_95 = arith.constant 0 : index
    %c4 = arith.constant 4 : index
    %426 = vector.load %arg9[%c0_95, %c4] : memref<2x358xf32, #tpu.memory_space<vmem>>, vector<2x256xf32>
    %c4_96 = arith.constant 4 : index
    %427 = memref.load %arg6[%c4_96] : memref<98xf32, #tpu.memory_space<smem>>
    %c53 = arith.constant 53 : index
    %428 = memref.load %arg6[%c53] : memref<98xf32, #tpu.memory_space<smem>>
    %429 = vector.extract_strided_slice %426 {offsets = [0, 0], sizes = [1, 256], strides = [1, 1]} : vector<2x256xf32> to vector<1x256xf32>
    %430 = vector.broadcast %427 : f32 to vector<1x256xf32>
    %431 = arith.mulf %430, %429 : vector<1x256xf32>
    %432 = arith.addf %425, %431 : vector<1x256xf32>
    %433 = vector.extract_strided_slice %426 {offsets = [1, 0], sizes = [1, 256], strides = [1, 1]} : vector<2x256xf32> to vector<1x256xf32>
    %434 = vector.broadcast %428 : f32 to vector<1x256xf32>
    %435 = arith.mulf %434, %433 : vector<1x256xf32>
    %436 = arith.addf %432, %435 : vector<1x256xf32>
    %c0_97 = arith.constant 0 : index
    %c20 = arith.constant 20 : index
    %437 = vector.load %arg9[%c0_97, %c20] : memref<2x358xf32, #tpu.memory_space<vmem>>, vector<2x256xf32>
    %c11 = arith.constant 11 : index
    %438 = memref.load %arg6[%c11] : memref<98xf32, #tpu.memory_space<smem>>
    %c60 = arith.constant 60 : index
    %439 = memref.load %arg6[%c60] : memref<98xf32, #tpu.memory_space<smem>>
    %440 = vector.extract_strided_slice %437 {offsets = [0, 0], sizes = [1, 256], strides = [1, 1]} : vector<2x256xf32> to vector<1x256xf32>
    %441 = vector.broadcast %438 : f32 to vector<1x256xf32>
    %442 = arith.mulf %441, %440 : vector<1x256xf32>
    %443 = arith.addf %436, %442 : vector<1x256xf32>
    %444 = vector.extract_strided_slice %437 {offsets = [1, 0], sizes = [1, 256], strides = [1, 1]} : vector<2x256xf32> to vector<1x256xf32>
    %445 = vector.broadcast %439 : f32 to vector<1x256xf32>
    %446 = arith.mulf %445, %444 : vector<1x256xf32>
    %447 = arith.addf %443, %446 : vector<1x256xf32>
    %c0_98 = arith.constant 0 : index
    %c36_99 = arith.constant 36 : index
    %448 = vector.load %arg9[%c0_98, %c36_99] : memref<2x358xf32, #tpu.memory_space<vmem>>, vector<2x256xf32>
    %c18_100 = arith.constant 18 : index
    %449 = memref.load %arg6[%c18_100] : memref<98xf32, #tpu.memory_space<smem>>
    %c67_101 = arith.constant 67 : index
    %450 = memref.load %arg6[%c67_101] : memref<98xf32, #tpu.memory_space<smem>>
    %451 = vector.extract_strided_slice %448 {offsets = [0, 0], sizes = [1, 256], strides = [1, 1]} : vector<2x256xf32> to vector<1x256xf32>
    %452 = vector.broadcast %449 : f32 to vector<1x256xf32>
    %453 = arith.mulf %452, %451 : vector<1x256xf32>
    %454 = arith.addf %447, %453 : vector<1x256xf32>
    %455 = vector.extract_strided_slice %448 {offsets = [1, 0], sizes = [1, 256], strides = [1, 1]} : vector<2x256xf32> to vector<1x256xf32>
    %456 = vector.broadcast %450 : f32 to vector<1x256xf32>
    %457 = arith.mulf %456, %455 : vector<1x256xf32>
    %458 = arith.addf %454, %457 : vector<1x256xf32>
    %c0_102 = arith.constant 0 : index
    %c52_103 = arith.constant 52 : index
    %459 = vector.load %arg9[%c0_102, %c52_103] : memref<2x358xf32, #tpu.memory_space<vmem>>, vector<2x256xf32>
    %c25 = arith.constant 25 : index
    %460 = memref.load %arg6[%c25] : memref<98xf32, #tpu.memory_space<smem>>
    %c74 = arith.constant 74 : index
    %461 = memref.load %arg6[%c74] : memref<98xf32, #tpu.memory_space<smem>>
    %462 = vector.extract_strided_slice %459 {offsets = [0, 0], sizes = [1, 256], strides = [1, 1]} : vector<2x256xf32> to vector<1x256xf32>
    %463 = vector.broadcast %460 : f32 to vector<1x256xf32>
    %464 = arith.mulf %463, %462 : vector<1x256xf32>
    %465 = arith.addf %458, %464 : vector<1x256xf32>
    %466 = vector.extract_strided_slice %459 {offsets = [1, 0], sizes = [1, 256], strides = [1, 1]} : vector<2x256xf32> to vector<1x256xf32>
    %467 = vector.broadcast %461 : f32 to vector<1x256xf32>
    %468 = arith.mulf %467, %466 : vector<1x256xf32>
    %469 = arith.addf %465, %468 : vector<1x256xf32>
    %c0_104 = arith.constant 0 : index
    %c68 = arith.constant 68 : index
    %470 = vector.load %arg9[%c0_104, %c68] : memref<2x358xf32, #tpu.memory_space<vmem>>, vector<2x256xf32>
    %c32_105 = arith.constant 32 : index
    %471 = memref.load %arg6[%c32_105] : memref<98xf32, #tpu.memory_space<smem>>
    %c81_106 = arith.constant 81 : index
    %472 = memref.load %arg6[%c81_106] : memref<98xf32, #tpu.memory_space<smem>>
    %473 = vector.extract_strided_slice %470 {offsets = [0, 0], sizes = [1, 256], strides = [1, 1]} : vector<2x256xf32> to vector<1x256xf32>
    %474 = vector.broadcast %471 : f32 to vector<1x256xf32>
    %475 = arith.mulf %474, %473 : vector<1x256xf32>
    %476 = arith.addf %469, %475 : vector<1x256xf32>
    %477 = vector.extract_strided_slice %470 {offsets = [1, 0], sizes = [1, 256], strides = [1, 1]} : vector<2x256xf32> to vector<1x256xf32>
    %478 = vector.broadcast %472 : f32 to vector<1x256xf32>
    %479 = arith.mulf %478, %477 : vector<1x256xf32>
    %480 = arith.addf %476, %479 : vector<1x256xf32>
    %c0_107 = arith.constant 0 : index
    %c84_108 = arith.constant 84 : index
    %481 = vector.load %arg9[%c0_107, %c84_108] : memref<2x358xf32, #tpu.memory_space<vmem>>, vector<2x256xf32>
    %c39 = arith.constant 39 : index
    %482 = memref.load %arg6[%c39] : memref<98xf32, #tpu.memory_space<smem>>
    %c88 = arith.constant 88 : index
    %483 = memref.load %arg6[%c88] : memref<98xf32, #tpu.memory_space<smem>>
    %484 = vector.extract_strided_slice %481 {offsets = [0, 0], sizes = [1, 256], strides = [1, 1]} : vector<2x256xf32> to vector<1x256xf32>
    %485 = vector.broadcast %482 : f32 to vector<1x256xf32>
    %486 = arith.mulf %485, %484 : vector<1x256xf32>
    %487 = arith.addf %480, %486 : vector<1x256xf32>
    %488 = vector.extract_strided_slice %481 {offsets = [1, 0], sizes = [1, 256], strides = [1, 1]} : vector<2x256xf32> to vector<1x256xf32>
    %489 = vector.broadcast %483 : f32 to vector<1x256xf32>
    %490 = arith.mulf %489, %488 : vector<1x256xf32>
    %491 = arith.addf %487, %490 : vector<1x256xf32>
    %c0_109 = arith.constant 0 : index
    %c100 = arith.constant 100 : index
    %492 = vector.load %arg9[%c0_109, %c100] : memref<2x358xf32, #tpu.memory_space<vmem>>, vector<2x256xf32>
    %c46 = arith.constant 46 : index
    %493 = memref.load %arg6[%c46] : memref<98xf32, #tpu.memory_space<smem>>
    %c95 = arith.constant 95 : index
    %494 = memref.load %arg6[%c95] : memref<98xf32, #tpu.memory_space<smem>>
    %495 = vector.extract_strided_slice %492 {offsets = [0, 0], sizes = [1, 256], strides = [1, 1]} : vector<2x256xf32> to vector<1x256xf32>
    %496 = vector.broadcast %493 : f32 to vector<1x256xf32>
    %497 = arith.mulf %496, %495 : vector<1x256xf32>
    %498 = arith.addf %491, %497 : vector<1x256xf32>
    %499 = vector.extract_strided_slice %492 {offsets = [1, 0], sizes = [1, 256], strides = [1, 1]} : vector<2x256xf32> to vector<1x256xf32>
    %500 = vector.broadcast %494 : f32 to vector<1x256xf32>
    %501 = arith.mulf %500, %499 : vector<1x256xf32>
    %502 = arith.addf %498, %501 : vector<1x256xf32>
    %c1_i32_110 = arith.constant 1 : i32
    %503 = vector.broadcast %c1_i32_110 : i32 to vector<1x256xi32>
    %504 = arith.addi %74, %503 : vector<1x256xi32>
    %c0_i32_111 = arith.constant 0 : i32
    %505 = vector.broadcast %c0_i32_111 : i32 to vector<1x256xi32>
    %506 = arith.cmpi sge, %504, %505 : vector<1x256xi32>
    %c1_i32_112 = arith.constant 1 : i32
    %507 = vector.broadcast %c1_i32_112 : i32 to vector<1x256xi32>
    %508 = arith.addi %74, %507 : vector<1x256xi32>
    %c16_i32_113 = arith.constant 16 : i32
    %509 = vector.broadcast %c16_i32_113 : i32 to vector<1x256xi32>
    %510 = arith.cmpi slt, %508, %509 : vector<1x256xi32>
    %511 = arith.andi %506, %510 : vector<1x256xi1>
    %cst_114 = arith.constant 0.000000e+00 : f32
    %512 = vector.broadcast %cst_114 : f32 to vector<1x256xf32>
    %513 = arith.select %511, %502, %512 : vector<1x256xi1>, vector<1x256xf32>
    %514 = arith.addf %424, %513 : vector<1x256xf32>
    %cst_115 = arith.constant 0.000000e+00 : f32
    %515 = vector.broadcast %cst_115 : f32 to vector<1x256xf32>
    %c0_116 = arith.constant 0 : index
    %c5 = arith.constant 5 : index
    %516 = vector.load %arg9[%c0_116, %c5] : memref<2x358xf32, #tpu.memory_space<vmem>>, vector<2x256xf32>
    %c5_117 = arith.constant 5 : index
    %517 = memref.load %arg6[%c5_117] : memref<98xf32, #tpu.memory_space<smem>>
    %c54 = arith.constant 54 : index
    %518 = memref.load %arg6[%c54] : memref<98xf32, #tpu.memory_space<smem>>
    %519 = vector.extract_strided_slice %516 {offsets = [0, 0], sizes = [1, 256], strides = [1, 1]} : vector<2x256xf32> to vector<1x256xf32>
    %520 = vector.broadcast %517 : f32 to vector<1x256xf32>
    %521 = arith.mulf %520, %519 : vector<1x256xf32>
    %522 = arith.addf %515, %521 : vector<1x256xf32>
    %523 = vector.extract_strided_slice %516 {offsets = [1, 0], sizes = [1, 256], strides = [1, 1]} : vector<2x256xf32> to vector<1x256xf32>
    %524 = vector.broadcast %518 : f32 to vector<1x256xf32>
    %525 = arith.mulf %524, %523 : vector<1x256xf32>
    %526 = arith.addf %522, %525 : vector<1x256xf32>
    %c0_118 = arith.constant 0 : index
    %c21_119 = arith.constant 21 : index
    %527 = vector.load %arg9[%c0_118, %c21_119] : memref<2x358xf32, #tpu.memory_space<vmem>>, vector<2x256xf32>
    %c12 = arith.constant 12 : index
    %528 = memref.load %arg6[%c12] : memref<98xf32, #tpu.memory_space<smem>>
    %c61 = arith.constant 61 : index
    %529 = memref.load %arg6[%c61] : memref<98xf32, #tpu.memory_space<smem>>
    %530 = vector.extract_strided_slice %527 {offsets = [0, 0], sizes = [1, 256], strides = [1, 1]} : vector<2x256xf32> to vector<1x256xf32>
    %531 = vector.broadcast %528 : f32 to vector<1x256xf32>
    %532 = arith.mulf %531, %530 : vector<1x256xf32>
    %533 = arith.addf %526, %532 : vector<1x256xf32>
    %534 = vector.extract_strided_slice %527 {offsets = [1, 0], sizes = [1, 256], strides = [1, 1]} : vector<2x256xf32> to vector<1x256xf32>
    %535 = vector.broadcast %529 : f32 to vector<1x256xf32>
    %536 = arith.mulf %535, %534 : vector<1x256xf32>
    %537 = arith.addf %533, %536 : vector<1x256xf32>
    %c0_120 = arith.constant 0 : index
    %c37_121 = arith.constant 37 : index
    %538 = vector.load %arg9[%c0_120, %c37_121] : memref<2x358xf32, #tpu.memory_space<vmem>>, vector<2x256xf32>
    %c19_122 = arith.constant 19 : index
    %539 = memref.load %arg6[%c19_122] : memref<98xf32, #tpu.memory_space<smem>>
    %c68_123 = arith.constant 68 : index
    %540 = memref.load %arg6[%c68_123] : memref<98xf32, #tpu.memory_space<smem>>
    %541 = vector.extract_strided_slice %538 {offsets = [0, 0], sizes = [1, 256], strides = [1, 1]} : vector<2x256xf32> to vector<1x256xf32>
    %542 = vector.broadcast %539 : f32 to vector<1x256xf32>
    %543 = arith.mulf %542, %541 : vector<1x256xf32>
    %544 = arith.addf %537, %543 : vector<1x256xf32>
    %545 = vector.extract_strided_slice %538 {offsets = [1, 0], sizes = [1, 256], strides = [1, 1]} : vector<2x256xf32> to vector<1x256xf32>
    %546 = vector.broadcast %540 : f32 to vector<1x256xf32>
    %547 = arith.mulf %546, %545 : vector<1x256xf32>
    %548 = arith.addf %544, %547 : vector<1x256xf32>
    %c0_124 = arith.constant 0 : index
    %c53_125 = arith.constant 53 : index
    %549 = vector.load %arg9[%c0_124, %c53_125] : memref<2x358xf32, #tpu.memory_space<vmem>>, vector<2x256xf32>
    %c26 = arith.constant 26 : index
    %550 = memref.load %arg6[%c26] : memref<98xf32, #tpu.memory_space<smem>>
    %c75 = arith.constant 75 : index
    %551 = memref.load %arg6[%c75] : memref<98xf32, #tpu.memory_space<smem>>
    %552 = vector.extract_strided_slice %549 {offsets = [0, 0], sizes = [1, 256], strides = [1, 1]} : vector<2x256xf32> to vector<1x256xf32>
    %553 = vector.broadcast %550 : f32 to vector<1x256xf32>
    %554 = arith.mulf %553, %552 : vector<1x256xf32>
    %555 = arith.addf %548, %554 : vector<1x256xf32>
    %556 = vector.extract_strided_slice %549 {offsets = [1, 0], sizes = [1, 256], strides = [1, 1]} : vector<2x256xf32> to vector<1x256xf32>
    %557 = vector.broadcast %551 : f32 to vector<1x256xf32>
    %558 = arith.mulf %557, %556 : vector<1x256xf32>
    %559 = arith.addf %555, %558 : vector<1x256xf32>
    %c0_126 = arith.constant 0 : index
    %c69 = arith.constant 69 : index
    %560 = vector.load %arg9[%c0_126, %c69] : memref<2x358xf32, #tpu.memory_space<vmem>>, vector<2x256xf32>
    %c33_127 = arith.constant 33 : index
    %561 = memref.load %arg6[%c33_127] : memref<98xf32, #tpu.memory_space<smem>>
    %c82_128 = arith.constant 82 : index
    %562 = memref.load %arg6[%c82_128] : memref<98xf32, #tpu.memory_space<smem>>
    %563 = vector.extract_strided_slice %560 {offsets = [0, 0], sizes = [1, 256], strides = [1, 1]} : vector<2x256xf32> to vector<1x256xf32>
    %564 = vector.broadcast %561 : f32 to vector<1x256xf32>
    %565 = arith.mulf %564, %563 : vector<1x256xf32>
    %566 = arith.addf %559, %565 : vector<1x256xf32>
    %567 = vector.extract_strided_slice %560 {offsets = [1, 0], sizes = [1, 256], strides = [1, 1]} : vector<2x256xf32> to vector<1x256xf32>
    %568 = vector.broadcast %562 : f32 to vector<1x256xf32>
    %569 = arith.mulf %568, %567 : vector<1x256xf32>
    %570 = arith.addf %566, %569 : vector<1x256xf32>
    %c0_129 = arith.constant 0 : index
    %c85_130 = arith.constant 85 : index
    %571 = vector.load %arg9[%c0_129, %c85_130] : memref<2x358xf32, #tpu.memory_space<vmem>>, vector<2x256xf32>
    %c40 = arith.constant 40 : index
    %572 = memref.load %arg6[%c40] : memref<98xf32, #tpu.memory_space<smem>>
    %c89 = arith.constant 89 : index
    %573 = memref.load %arg6[%c89] : memref<98xf32, #tpu.memory_space<smem>>
    %574 = vector.extract_strided_slice %571 {offsets = [0, 0], sizes = [1, 256], strides = [1, 1]} : vector<2x256xf32> to vector<1x256xf32>
    %575 = vector.broadcast %572 : f32 to vector<1x256xf32>
    %576 = arith.mulf %575, %574 : vector<1x256xf32>
    %577 = arith.addf %570, %576 : vector<1x256xf32>
    %578 = vector.extract_strided_slice %571 {offsets = [1, 0], sizes = [1, 256], strides = [1, 1]} : vector<2x256xf32> to vector<1x256xf32>
    %579 = vector.broadcast %573 : f32 to vector<1x256xf32>
    %580 = arith.mulf %579, %578 : vector<1x256xf32>
    %581 = arith.addf %577, %580 : vector<1x256xf32>
    %c0_131 = arith.constant 0 : index
    %c101 = arith.constant 101 : index
    %582 = vector.load %arg9[%c0_131, %c101] : memref<2x358xf32, #tpu.memory_space<vmem>>, vector<2x256xf32>
    %c47 = arith.constant 47 : index
    %583 = memref.load %arg6[%c47] : memref<98xf32, #tpu.memory_space<smem>>
    %c96_132 = arith.constant 96 : index
    %584 = memref.load %arg6[%c96_132] : memref<98xf32, #tpu.memory_space<smem>>
    %585 = vector.extract_strided_slice %582 {offsets = [0, 0], sizes = [1, 256], strides = [1, 1]} : vector<2x256xf32> to vector<1x256xf32>
    %586 = vector.broadcast %583 : f32 to vector<1x256xf32>
    %587 = arith.mulf %586, %585 : vector<1x256xf32>
    %588 = arith.addf %581, %587 : vector<1x256xf32>
    %589 = vector.extract_strided_slice %582 {offsets = [1, 0], sizes = [1, 256], strides = [1, 1]} : vector<2x256xf32> to vector<1x256xf32>
    %590 = vector.broadcast %584 : f32 to vector<1x256xf32>
    %591 = arith.mulf %590, %589 : vector<1x256xf32>
    %592 = arith.addf %588, %591 : vector<1x256xf32>
    %c2_i32 = arith.constant 2 : i32
    %593 = vector.broadcast %c2_i32 : i32 to vector<1x256xi32>
    %594 = arith.addi %74, %593 : vector<1x256xi32>
    %c0_i32_133 = arith.constant 0 : i32
    %595 = vector.broadcast %c0_i32_133 : i32 to vector<1x256xi32>
    %596 = arith.cmpi sge, %594, %595 : vector<1x256xi32>
    %c2_i32_134 = arith.constant 2 : i32
    %597 = vector.broadcast %c2_i32_134 : i32 to vector<1x256xi32>
    %598 = arith.addi %74, %597 : vector<1x256xi32>
    %c16_i32_135 = arith.constant 16 : i32
    %599 = vector.broadcast %c16_i32_135 : i32 to vector<1x256xi32>
    %600 = arith.cmpi slt, %598, %599 : vector<1x256xi32>
    %601 = arith.andi %596, %600 : vector<1x256xi1>
    %cst_136 = arith.constant 0.000000e+00 : f32
    %602 = vector.broadcast %cst_136 : f32 to vector<1x256xf32>
    %603 = arith.select %601, %592, %602 : vector<1x256xi1>, vector<1x256xf32>
    %604 = arith.addf %514, %603 : vector<1x256xf32>
    %cst_137 = arith.constant 0.000000e+00 : f32
    %605 = vector.broadcast %cst_137 : f32 to vector<1x256xf32>
    %c0_138 = arith.constant 0 : index
    %c6 = arith.constant 6 : index
    %606 = vector.load %arg9[%c0_138, %c6] : memref<2x358xf32, #tpu.memory_space<vmem>>, vector<2x256xf32>
    %c6_139 = arith.constant 6 : index
    %607 = memref.load %arg6[%c6_139] : memref<98xf32, #tpu.memory_space<smem>>
    %c55 = arith.constant 55 : index
    %608 = memref.load %arg6[%c55] : memref<98xf32, #tpu.memory_space<smem>>
    %609 = vector.extract_strided_slice %606 {offsets = [0, 0], sizes = [1, 256], strides = [1, 1]} : vector<2x256xf32> to vector<1x256xf32>
    %610 = vector.broadcast %607 : f32 to vector<1x256xf32>
    %611 = arith.mulf %610, %609 : vector<1x256xf32>
    %612 = arith.addf %605, %611 : vector<1x256xf32>
    %613 = vector.extract_strided_slice %606 {offsets = [1, 0], sizes = [1, 256], strides = [1, 1]} : vector<2x256xf32> to vector<1x256xf32>
    %614 = vector.broadcast %608 : f32 to vector<1x256xf32>
    %615 = arith.mulf %614, %613 : vector<1x256xf32>
    %616 = arith.addf %612, %615 : vector<1x256xf32>
    %c0_140 = arith.constant 0 : index
    %c22_141 = arith.constant 22 : index
    %617 = vector.load %arg9[%c0_140, %c22_141] : memref<2x358xf32, #tpu.memory_space<vmem>>, vector<2x256xf32>
    %c13 = arith.constant 13 : index
    %618 = memref.load %arg6[%c13] : memref<98xf32, #tpu.memory_space<smem>>
    %c62 = arith.constant 62 : index
    %619 = memref.load %arg6[%c62] : memref<98xf32, #tpu.memory_space<smem>>
    %620 = vector.extract_strided_slice %617 {offsets = [0, 0], sizes = [1, 256], strides = [1, 1]} : vector<2x256xf32> to vector<1x256xf32>
    %621 = vector.broadcast %618 : f32 to vector<1x256xf32>
    %622 = arith.mulf %621, %620 : vector<1x256xf32>
    %623 = arith.addf %616, %622 : vector<1x256xf32>
    %624 = vector.extract_strided_slice %617 {offsets = [1, 0], sizes = [1, 256], strides = [1, 1]} : vector<2x256xf32> to vector<1x256xf32>
    %625 = vector.broadcast %619 : f32 to vector<1x256xf32>
    %626 = arith.mulf %625, %624 : vector<1x256xf32>
    %627 = arith.addf %623, %626 : vector<1x256xf32>
    %c0_142 = arith.constant 0 : index
    %c38_143 = arith.constant 38 : index
    %628 = vector.load %arg9[%c0_142, %c38_143] : memref<2x358xf32, #tpu.memory_space<vmem>>, vector<2x256xf32>
    %c20_144 = arith.constant 20 : index
    %629 = memref.load %arg6[%c20_144] : memref<98xf32, #tpu.memory_space<smem>>
    %c69_145 = arith.constant 69 : index
    %630 = memref.load %arg6[%c69_145] : memref<98xf32, #tpu.memory_space<smem>>
    %631 = vector.extract_strided_slice %628 {offsets = [0, 0], sizes = [1, 256], strides = [1, 1]} : vector<2x256xf32> to vector<1x256xf32>
    %632 = vector.broadcast %629 : f32 to vector<1x256xf32>
    %633 = arith.mulf %632, %631 : vector<1x256xf32>
    %634 = arith.addf %627, %633 : vector<1x256xf32>
    %635 = vector.extract_strided_slice %628 {offsets = [1, 0], sizes = [1, 256], strides = [1, 1]} : vector<2x256xf32> to vector<1x256xf32>
    %636 = vector.broadcast %630 : f32 to vector<1x256xf32>
    %637 = arith.mulf %636, %635 : vector<1x256xf32>
    %638 = arith.addf %634, %637 : vector<1x256xf32>
    %c0_146 = arith.constant 0 : index
    %c54_147 = arith.constant 54 : index
    %639 = vector.load %arg9[%c0_146, %c54_147] : memref<2x358xf32, #tpu.memory_space<vmem>>, vector<2x256xf32>
    %c27 = arith.constant 27 : index
    %640 = memref.load %arg6[%c27] : memref<98xf32, #tpu.memory_space<smem>>
    %c76 = arith.constant 76 : index
    %641 = memref.load %arg6[%c76] : memref<98xf32, #tpu.memory_space<smem>>
    %642 = vector.extract_strided_slice %639 {offsets = [0, 0], sizes = [1, 256], strides = [1, 1]} : vector<2x256xf32> to vector<1x256xf32>
    %643 = vector.broadcast %640 : f32 to vector<1x256xf32>
    %644 = arith.mulf %643, %642 : vector<1x256xf32>
    %645 = arith.addf %638, %644 : vector<1x256xf32>
    %646 = vector.extract_strided_slice %639 {offsets = [1, 0], sizes = [1, 256], strides = [1, 1]} : vector<2x256xf32> to vector<1x256xf32>
    %647 = vector.broadcast %641 : f32 to vector<1x256xf32>
    %648 = arith.mulf %647, %646 : vector<1x256xf32>
    %649 = arith.addf %645, %648 : vector<1x256xf32>
    %c0_148 = arith.constant 0 : index
    %c70_149 = arith.constant 70 : index
    %650 = vector.load %arg9[%c0_148, %c70_149] : memref<2x358xf32, #tpu.memory_space<vmem>>, vector<2x256xf32>
    %c34_150 = arith.constant 34 : index
    %651 = memref.load %arg6[%c34_150] : memref<98xf32, #tpu.memory_space<smem>>
    %c83_151 = arith.constant 83 : index
    %652 = memref.load %arg6[%c83_151] : memref<98xf32, #tpu.memory_space<smem>>
    %653 = vector.extract_strided_slice %650 {offsets = [0, 0], sizes = [1, 256], strides = [1, 1]} : vector<2x256xf32> to vector<1x256xf32>
    %654 = vector.broadcast %651 : f32 to vector<1x256xf32>
    %655 = arith.mulf %654, %653 : vector<1x256xf32>
    %656 = arith.addf %649, %655 : vector<1x256xf32>
    %657 = vector.extract_strided_slice %650 {offsets = [1, 0], sizes = [1, 256], strides = [1, 1]} : vector<2x256xf32> to vector<1x256xf32>
    %658 = vector.broadcast %652 : f32 to vector<1x256xf32>
    %659 = arith.mulf %658, %657 : vector<1x256xf32>
    %660 = arith.addf %656, %659 : vector<1x256xf32>
    %c0_152 = arith.constant 0 : index
    %c86_153 = arith.constant 86 : index
    %661 = vector.load %arg9[%c0_152, %c86_153] : memref<2x358xf32, #tpu.memory_space<vmem>>, vector<2x256xf32>
    %c41 = arith.constant 41 : index
    %662 = memref.load %arg6[%c41] : memref<98xf32, #tpu.memory_space<smem>>
    %c90 = arith.constant 90 : index
    %663 = memref.load %arg6[%c90] : memref<98xf32, #tpu.memory_space<smem>>
    %664 = vector.extract_strided_slice %661 {offsets = [0, 0], sizes = [1, 256], strides = [1, 1]} : vector<2x256xf32> to vector<1x256xf32>
    %665 = vector.broadcast %662 : f32 to vector<1x256xf32>
    %666 = arith.mulf %665, %664 : vector<1x256xf32>
    %667 = arith.addf %660, %666 : vector<1x256xf32>
    %668 = vector.extract_strided_slice %661 {offsets = [1, 0], sizes = [1, 256], strides = [1, 1]} : vector<2x256xf32> to vector<1x256xf32>
    %669 = vector.broadcast %663 : f32 to vector<1x256xf32>
    %670 = arith.mulf %669, %668 : vector<1x256xf32>
    %671 = arith.addf %667, %670 : vector<1x256xf32>
    %c0_154 = arith.constant 0 : index
    %c102 = arith.constant 102 : index
    %672 = vector.load %arg9[%c0_154, %c102] : memref<2x358xf32, #tpu.memory_space<vmem>>, vector<2x256xf32>
    %c48_155 = arith.constant 48 : index
    %673 = memref.load %arg6[%c48_155] : memref<98xf32, #tpu.memory_space<smem>>
    %c97_156 = arith.constant 97 : index
    %674 = memref.load %arg6[%c97_156] : memref<98xf32, #tpu.memory_space<smem>>
    %675 = vector.extract_strided_slice %672 {offsets = [0, 0], sizes = [1, 256], strides = [1, 1]} : vector<2x256xf32> to vector<1x256xf32>
    %676 = vector.broadcast %673 : f32 to vector<1x256xf32>
    %677 = arith.mulf %676, %675 : vector<1x256xf32>
    %678 = arith.addf %671, %677 : vector<1x256xf32>
    %679 = vector.extract_strided_slice %672 {offsets = [1, 0], sizes = [1, 256], strides = [1, 1]} : vector<2x256xf32> to vector<1x256xf32>
    %680 = vector.broadcast %674 : f32 to vector<1x256xf32>
    %681 = arith.mulf %680, %679 : vector<1x256xf32>
    %682 = arith.addf %678, %681 : vector<1x256xf32>
    %c3_i32 = arith.constant 3 : i32
    %683 = vector.broadcast %c3_i32 : i32 to vector<1x256xi32>
    %684 = arith.addi %74, %683 : vector<1x256xi32>
    %c0_i32_157 = arith.constant 0 : i32
    %685 = vector.broadcast %c0_i32_157 : i32 to vector<1x256xi32>
    %686 = arith.cmpi sge, %684, %685 : vector<1x256xi32>
    %c3_i32_158 = arith.constant 3 : i32
    %687 = vector.broadcast %c3_i32_158 : i32 to vector<1x256xi32>
    %688 = arith.addi %74, %687 : vector<1x256xi32>
    %c16_i32_159 = arith.constant 16 : i32
    %689 = vector.broadcast %c16_i32_159 : i32 to vector<1x256xi32>
    %690 = arith.cmpi slt, %688, %689 : vector<1x256xi32>
    %691 = arith.andi %686, %690 : vector<1x256xi1>
    %cst_160 = arith.constant 0.000000e+00 : f32
    %692 = vector.broadcast %cst_160 : f32 to vector<1x256xf32>
    %693 = arith.select %691, %682, %692 : vector<1x256xi1>, vector<1x256xf32>
    %694 = arith.addf %604, %693 : vector<1x256xf32>
    %c0_161 = arith.constant 0 : index
    %695 = memref.load %arg7[%c0_161] : memref<2xf32, #tpu.memory_space<smem>>
    %696 = vector.broadcast %695 : f32 to vector<1x256xf32>
    %697 = arith.mulf %694, %696 : vector<1x256xf32>
    %c1_162 = arith.constant 1 : index
    %698 = memref.load %arg7[%c1_162] : memref<2xf32, #tpu.memory_space<smem>>
    %699 = vector.broadcast %698 : f32 to vector<1x256xf32>
    %700 = arith.addf %697, %699 : vector<1x256xf32>
    %cst_163 = arith.constant 0.000000e+00 : f32
    %701 = vector.broadcast %cst_163 : f32 to vector<1x256xf32>
    %702 = arith.subf %701, %700 : vector<1x256xf32>
    %703 = math.exp %702 : vector<1x256xf32>
    %cst_164 = arith.constant 1.000000e+00 : f32
    %704 = vector.broadcast %cst_164 : f32 to vector<1x256xf32>
    %705 = arith.addf %704, %703 : vector<1x256xf32>
    %cst_165 = arith.constant 1.000000e+00 : f32
    %706 = vector.broadcast %cst_165 : f32 to vector<1x256xf32>
    %707 = arith.divf %706, %705 : vector<1x256xf32>
    %708 = vector.broadcast %707 : vector<1x256xf32> to vector<32x256xf32>
    %709 = arith.mulf %38, %708 : vector<32x256xf32>
    %c0_166 = arith.constant 0 : index
    %c0_167 = arith.constant 0 : index
    %c0_168 = arith.constant 0 : index
    %710 = vector.load %arg8[%c0_166, %c0_167, %c0_168] : memref<1x32x256xf32, #tpu.memory_space<vmem>>, vector<1x32x256xf32>
    %711 = vector.shape_cast %710 : vector<1x32x256xf32> to vector<32x256xf32>
    %712 = vector.shape_cast %709 : vector<32x256xf32> to vector<1x32x256xf32>
    tpu.vector_store %arg8[%c0_166, %c0_167, %c0_168], %712 {strides = array<i32>} : memref<1x32x256xf32, #tpu.memory_space<vmem>>, vector<1x32x256xf32>,
    return
  }
  func.func @transform_0(%arg0: i32) -> (i32, i32, i32) {
    %c0_i32 = arith.constant 0 : i32
    %c0_i32_0 = arith.constant 0 : i32
    %c0_i32_1 = arith.constant 0 : i32
    return %arg0, %c0_i32, %c0_i32_0 : i32, i32, i32
  }
  func.func @transform_1(%arg0: i32) -> (i32, i32) {
    %c0_i32 = arith.constant 0 : i32
    %c0_i32_0 = arith.constant 0 : i32
    %c0_i32_1 = arith.constant 0 : i32
    return %c0_i32, %c0_i32_0 : i32, i32
  }
  func.func @transform_2(%arg0: i32) -> (i32, i32) {
    %c0_i32 = arith.constant 0 : i32
    %c0_i32_0 = arith.constant 0 : i32
    %c0_i32_1 = arith.constant 0 : i32
    return %c0_i32, %c0_i32_0 : i32, i32
  }
  func.func @transform_3(%arg0: i32) -> (i32, i32) {
    %c0_i32 = arith.constant 0 : i32
    %c0_i32_0 = arith.constant 0 : i32
    %c0_i32_1 = arith.constant 0 : i32
    return %c0_i32, %c0_i32_0 : i32, i32
  }
  func.func @transform_4(%arg0: i32) -> (i32, i32) {
    %c0_i32 = arith.constant 0 : i32
    %c0_i32_0 = arith.constant 0 : i32
    %c0_i32_1 = arith.constant 0 : i32
    return %c0_i32, %c0_i32_0 : i32, i32
  }
  func.func @transform_5(%arg0: i32) -> i32 {
    %c0_i32 = arith.constant 0 : i32
    %c0_i32_0 = arith.constant 0 : i32
    return %c0_i32 : i32
  }
  func.func @transform_6(%arg0: i32) -> i32 {
    %c0_i32 = arith.constant 0 : i32
    %c0_i32_0 = arith.constant 0 : i32
    return %c0_i32 : i32
  }
  func.func @transform_7(%arg0: i32) -> (i32, i32, i32) {
    %c0_i32 = arith.constant 0 : i32
    %c0_i32_0 = arith.constant 0 : i32
    %c0_i32_1 = arith.constant 0 : i32
    return %arg0, %c0_i32, %c0_i32_0 : i32, i32, i32
  }
}

</mosaic_0001>

<bundles_post_ra>
// kernel: tpu_custom_call.1
= control target key start
LH: loop header
LB: loop body
LE: loop exit
PB: predicated region body
PF: predicated region fallthrough
CT: control target
= control target key end

     0   :  { %s3423_s0 = inlined_call_operand.hbm [shape: f32[2,32,256], index: 0, kind: input, shape index: {}]   ;;  %s3424_s1 = inlined_call_operand.vmem [shape: f32[2,32], index: 1, kind: input, shape index: {}]   ;;  %s3425_s2 = inlined_call_operand.vmem [shape: f32[2,1], index: 2, kind: input, shape index: {}]   ;;  %s3426_s3 = inlined_call_operand.vmem [shape: f32[32,2], index: 3, kind: input, shape index: {}]   ;;  %s3427_s4 = inlined_call_operand.vmem [shape: f32[32,1], index: 4, kind: input, shape index: {}]   ;;  %s3428_s5 = inlined_call_operand.vmem [shape: f32[98], index: 5, kind: input, shape index: {}]   ;;  %s3429_s6 = inlined_call_operand.vmem [shape: f32[2], index: 6, kind: input, shape index: {}]   ;;  %s3430_s7 = inlined_call_operand.hbm [shape: f32[2,32,256], index: 7, kind: output, shape index: {}]  }
   0x1   :  { %3439 = sst [smem:[#allocation23_spill]] %s3428_s5 }
   0x2   :  { %3440 = sst [smem:[#allocation24_spill]] %s3429_s6 }
   0x3   :  { %12 = vsyncpa [#allocation4], 0 }
   0x4   :  { %14 = vsyncpa [#allocation4 + $0x1], 0 }
   0x5   :  { %15 = vsyncpa [#allocation6], 0 }
   0x6   :  { %16 = vsyncpa [#allocation9], 0 }
   0x7   :  { %17 = vsyncpa [#allocation5], 0 }
   0x8   :  { %19 = vsyncpa [#allocation5 + $0x1], 0  ;;  %s2525_s24 = smov 0   ;;  %s2527_s25 = smov 0  }
   0x9   :  { %s2529_s26 = smov 0   ;;  %s2531_s27 = smov 0  }
   0xa LB: > { %s2546_s28 = sadd.s32 4294967295, %s2460_s27   ;;  %s2032_s29 = sadd.s32 4294967294, %s2460_s27   ;;  %s2460_s27 = sphi %s2531_s27, %s3472_s27   ;;  %s2456_s26 = sphi %s2529_s26, %s3476_s26   ;;  %s2452_s25 = sphi %s2527_s25, %s3475_s25   ;;  %s2448_s24 = sphi %s2525_s24, %s3474_s24  }
   0xb   : > { %s2550_s30 = sadd.s32 1, %s2460_s27   ;;  %s32_s8 = sadd.s32 1, %s2456_s26 }
   0xc   : > { %3441 = sst [smem:[#allocation15_spill]] %s2550_s30  ;;  %s29_s9 = ssub.s32 %s2460_s27, %s2550_s30 }
   0xd   : > { %p39_p0 = scmp.ne.s32.totalorder %s2456_s26, %s2452_s25  ;;  %p30_p1 = scmp.eq.s32.totalorder %s29_s9, 0 }
   0xe   : > { %p40_p2 = scmp.eq.s32.totalorder %s2460_s27, 0  ;;  %p45_p3 = scmp.ne.s32.totalorder %s2452_s25, %s2448_s24 }
   0xf   : > { %p46_p4 = scmp.eq.s32.totalorder %s2546_s28, 0  ;;  %p195_p7 = scmp.eq.s32.totalorder %s2546_s28, 1 }
  0x10   : > { %s2562_s10 = scalar_select %p30_p1, %s2456_s26, %s32_s8  }
  0x11   : > { %p2564_p5 = por %p40_p2, %p39_p0  ;;  %p2570_p6 = por %p46_p4, %p45_p3 }
  0x12   : > { %3442 = sst [smem:[#allocation16_spill]] %s2562_s10  ;;  %p201_p8 = scmp.eq.s32.totalorder %s2032_s29, 1 }
  0x13   : > { %p2033_p9 = scmp.ge.s32.totalorder %s2460_s27, 1  ;;  %p208_p10 = scmp.lt.s32.totalorder %s2460_s27, 3 }
  0x14   : > { %p2577_p11 = por %p195_p7, %p39_p0  ;;  %p2581_p12 = por %p201_p8, %p45_p3 }
  0x15   : > { %p2585_p13 = pnand %p2033_p9, %p208_p10  ;;  %s3449_s5 = sld [smem:[#allocation23_spill]] }
  0x16   : > { %s3446_s14 = scalar_select %p2581_p12, 1, 0 }
  0x17   : > { %p2219_p1 = pneg %p2585_p13  ;;  %p2236_p2 = scmp.lt.s32.totalorder %s2460_s27, 2 }
  0x18   : > { %3447 = sst [smem:[#allocation17_spill]] %s3446_s14  ;;  %s2462_s23 = smov [#allocation7]  }
  0x19   : > { %p2220_p3 = pnand %p2219_p1, %p46_p4  ;;  %s3450_s6 = sld [smem:[#allocation24_spill]] }
  0x1a   : > { %p2603_p7 = pnand %p2236_p2, %p2564_p5  ;;  %s253_s29 = sand.u32 1, %s2456_s26  }
  0x1b   : > { %s232_s18 = sshll.u32 %s3449_s5, 4  ;;  %s2463_s8 = smov [#allocation8]   ;;  %s233_s18 = int_to_ptr.vmem [resolvable:$true] %s232_s18 }
  0x1c   : > { %2222 = dma.vmem_to_smem (!%p2220_p3), %s233_s18, 16, %s2462_s23, [#allocation6]  }
  0x1d   : > { %s2037_s9 = sshll.u32 %s253_s29, 6  ;;  %s2203_s16 = sshll.u32 %s2460_s27, 6 }
  0x1e   : > { %s262_s10 = scalar_lea.hbm %s3423_s0, %s2203_s16  ;;  %s257_s19 = scalar_lea.vmem [#allocation3], %s2037_s9 }
  0x1f   : > { %s242_s21 = sshll.u32 %s3450_s6, 4  ;;  %s265_s20 = sshll.u32 %s257_s19, 4  ;;  %s243_s21 = int_to_ptr.vmem [resolvable:$true] %s242_s21  ;;  %s266_s20 = int_to_ptr.vmem [resolvable:$true] %s265_s20 }
  0x20   : > { %2225 = dma.vmem_to_smem (!%p2220_p3), %s243_s21, 16, %s2463_s8, [#allocation9]  }
  0x21   : > { %s263_s11 = sshll.u32 %s262_s10, 4  ;;  %s254_s6 = scalar_lea.sflag [#allocation4], %s253_s29  ;;  %s264_s11 = int_to_ptr.hbm [resolvable:$true] %s263_s11 }
  0x22   : > { %s2356_s30 = sshra.s32 %s264_s11, 4  ;;  %p2360_p8 = pneg %p2603_p7  ;;  %s2357_s30 = int_to_ptr.hbm [resolvable:$true] %s2356_s30 }
  0x23   : > { %s2358_s14 = scalar_lea.hbm %s2357_s30, 64  ;;  %s2363_s23 = scalar_lea.hbm %s3423_s0, 128 }
  0x24   : > { %p2359_p5 = scmp.ne.s32.totalorder %s2357_s30, %s2358_s14  ;;  %p2364_p1 = scmp.lt.s32.totalorder %s2357_s30, %s3423_s0 }
  0x25   : > { %p2365_p2 = scmp.lt.s32.totalorder %s2363_s23, %s2358_s14 }
  0x26   : > { %p2361_p9 = pnand %p2360_p8, %p2359_p5 }
  0x27   : > { %p2366_p3 = por %p2365_p2, %p2364_p1 }
  0x28   : > { %p2362_p10 = pneg %p2361_p9 }
  0x2a   : > { %p2367_p0 = pnand %p2366_p3, %p2362_p10 }
  0x2c   : > { %2370 = shalt.err (!%p2367_p0)
}
  0x2d   : > { %s2464_s10 = smov 256   ;;  %s2465_s29 = smov 16  }
  0x2e   : > { %2229 = dma.hbm_to_vmem [thread:$0]  (!%p2603_p7), %s264_s11, 1024, %s266_s20, %s254_s6, %s2464_s10, %s2464_s10, %s2465_s29  }
  0x2f   : > { %277 = sbr.rel (%p2585_p13) target bundleno = 1268 (0x4f4), region = 48 }
  0x34   : > { %s2625_s9 = sand.u32 1, %s2452_s25  }
  0x35   : > { %s2041_s30 = sshll.u32 %s2625_s9, 6  ;;  %s280_s14 = scalar_lea.sflag [#allocation4], %s2625_s9 }
  0x36   : > { %s283_s16 = scalar_lea.vmem [#allocation3], %s2041_s30 }
  0x37   : > { %2431 = dma.done.wait (%p2570_p6), %s280_s14, 1024  }
  0x38   : > { %2433 = vsyncadd (%p2570_p6), %s280_s14, 4294966272 }
  0x39   : > { %2435 = dma.done.wait (%p46_p4), [#allocation6], 16  }
  0x3a   : > { %2437 = vsyncadd (%p46_p4), [#allocation6], 4294967280 }
  0x3b   : > { %2439 = dma.done.wait (%p46_p4), [#allocation9], 16  }
  0x3c   : > { %2441 = vsyncadd (%p46_p4), [#allocation9], 4294967280 }
  0x3d   : > { %299 = sfence }
  0x3e   : > { %v2643_v0 = vld [vmem:[%s283_s16 + $0x30] sm:$0xff]  ;;  %v2645_v1 = vld [vmem:[%s283_s16 + $0x38] sm:$0xff]  ;;  %v2647_v2 = vld [vmem:[%s283_s16 + $0x20] sm:$0xff]  ;;  %v2466_v16 = vmov 256.0   ;;  %v2467_v22 = vmov 0   ;;  %v369_v23 = vlaneseq  ;;  %vm383_vm2 = vcmask 261120  }
  0x3f   : > { %v343_v3 = vadd.f32 %v2645_v1, %v2643_v0  ;;  %v366_v4 = vmax.f32 %v2643_v0, %v2645_v1  ;;  %v2653_v5 = vld [vmem:[%s283_s16 + $0x28] sm:$0xff]  ;;  %v2657_v7 = vld [vmem:[%s283_s16 + $0x10] sm:$0xff]  ;;  %v2659_v8 = vld [vmem:[%s283_s16 + $0x18] sm:$0xff]  ;;  %2298 = vrcp.f32 %v2466_v16  ;;  %2295 = vset.pattern.permute.xlu2 %v2467_v22  ;;  %2296 = vset.pattern.permute.xlu0 %v2467_v22  ;;  %vm449_vm3 = vcmask 1041408   ;;  %s2470_s22 = smov 51   ;;  %s2059_s17 = sld [smem:[#allocation7 + $0x15]] }
  0x40   : > { %v363_v6 = vmax.f32 %v2647_v2, %v2653_v5  ;;  %v2661_v9 = vld [vmem:[%s283_s16] sm:$0xff]  ;;  %v2663_v10 = vld [vmem:[%s283_s16 + $0x8] sm:$0xff]  ;;  %v340_v11 = vadd.f32 %v2653_v5, %v2647_v2  ;;  %v337_v12 = vadd.f32 %v2659_v8, %v2657_v7  ;;  %v360_v14 = vmax.f32 %v2657_v7, %v2659_v8  ;;  %v377_v20 = vld [vmem:[%s3425_s2] sm:$0x3]  ;;  %2297 = vset.pattern.permute.xlu1 %v2467_v22  ;;  %s2056_s19 = sld [smem:[#allocation7 + $0xe]]  ;;  %s2471_s23 = smov 80  }
  0x41   : > { %344 = vadd.xlane.f32.xlu0 %v343_v3  ;;  %367 = vmax.xlane.f32.xlu1 %v366_v4  ;;  %v334_v13 = vadd.f32 %v2663_v10, %v2661_v9  ;;  %v357_v15 = vmax.f32 %v2661_v9, %v2663_v10  ;;  %v2679_v25 = vand.u32 127, %v369_v23  ;;  %v414_v26 = vld [vmem:[%s3427_s4 + $0x10] sm:$0xff]  ;;  %v415_v33 = vld [vmem:[%s3427_s4 + $0x18] sm:$0xff]  ;;  %v376_v45 = vld [vmem:[%s3424_s1] sm:$0x3]  ;;  %vm436_vm4 = vcmask 15360  }
  0x42   : > { %364 = vmax.xlane.f32.xlu2 %v363_v6  ;;  %v412_v46 = vld [vmem:[%s3427_s4] sm:$0xff]  ;;  %v413_v47 = vld [vmem:[%s3427_s4 + $0x8] sm:$0xff]  ;;  %v411_v54 = vld [vmem:[%s3426_s3 + $0x18] sm:$0xff]  ;;  %s2053_s20 = sld [smem:[#allocation7 + $0x7]]  ;;  %s2472_s5 = smov 96  }
  0x43   : > { %vm371_vm1 = vcmp.eq.s32.totalorder %v2679_v25, 0  ;;  %v408_v52 = vld [vmem:[%s3426_s3] sm:$0xff]  ;;  %v409_v53 = vld [vmem:[%s3426_s3 + $0x8] sm:$0xff]  ;;  %v410_v55 = vld [vmem:[%s3426_s3 + $0x10] sm:$0xff]  ;;  %s2068_s11 = sld [smem:[#allocation7 + $0x2a]]  ;;  %s2473_s8 = smov 112  }
  0x44   : > { %s2065_s18 = sld [smem:[#allocation7 + $0x23]]  ;;  %s2474_s16 = smov 32  }
  0x45   : > { %v2299_v17 = vpop.eup %2298  ;;  %s2062_s21 = sld [smem:[#allocation7 + $0x1c]]  ;;  %s2475_s6 = smov 48  }
  0x46   : > { %v347_v18 = vmul.f32 256.0, %v2299_v17  ;;  %vm351_vm0 = vweird.f32 %v2299_v17  ;;  %s2080_s10 = sld [smem:[#allocation7 + $0x16]]  ;;  %s2476_s12 = smov 64  }
  0x47   : > { %s2077_s29 = sld [smem:[#allocation7 + $0xf]] }
  0x48   : > { %v348_v19 = vsub.f32 1.0, %v347_v18  ;;  %s2074_s14 = sld [smem:[#allocation7 + $0x8]] }
  0x49   : > { %341 = vadd.xlane.f32.xlu0 %v340_v11  ;;  %338 = vadd.xlane.f32.xlu1 %v337_v12  ;;  %s2089_s15 = sld [smem:[#allocation7 + $0x2b]] }
  0x4a   : > { %335 = vadd.xlane.f32.xlu2 %v334_v13  ;;  %v349_v21 = vmul.f32 %v2299_v17, %v348_v19 }
  0x4c   : > { %v350_v24 = vadd.f32 %v2299_v17, %v349_v21 }
  0x4e   : > { %v352_v27 = vsel %vm351_vm0, %v2299_v17, %v350_v24 }
  0x51   : > { %361 = vmax.xlane.f32.xlu0 %v360_v14  ;;  %358 = vmax.xlane.f32.xlu1 %v357_v15 }
  0x62   : > { %380 = vperm.xlu2 %2295, %v377_v20  }
  0x65   : > { %418 = vperm.xlu0 %2296, %v412_v46  }
  0x6a   : > { %428 = vperm.xlu2 %2295, %v414_v26   ;;  %423 = vperm.xlu1 %2297, %v413_v47  }
  0x72   : > { %433 = vperm.xlu2 %2295, %v415_v33  }
  0xb4   : > { %v345_v28 = vpop.xlane.xlu0 %344  ;;  %v368_v29 = vpop.xlane.xlu1 %367 }
  0xb5   : > { %v356_v30 = vmul.f32 %v352_v27, %v345_v28  ;;  %v365_v31 = vpop.xlane.xlu2 %364 }
  0xb7   : > { %v375_v32 = vsel %vm371_vm1, %v356_v30, %v368_v29 }
  0xb8   : > { %399 = vmatpush.msra.mxu0 %v375_v32 }
  0xbc   : > { %v342_v34 = vpop.xlane.xlu0 %341  ;;  %v339_v35 = vpop.xlane.xlu1 %338 }
  0xbd   : > { %v355_v36 = vmul.f32 %v352_v27, %v342_v34  ;;  %v336_v37 = vpop.xlane.xlu2 %335  ;;  %v354_v40 = vmul.f32 %v352_v27, %v339_v35 }
  0xbe   : > { %v353_v39 = vmul.f32 %v352_v27, %v336_v37 }
  0xbf   : > { %v374_v38 = vsel %vm371_vm1, %v355_v36, %v365_v31 }
  0xc0   : > { %400 = vmatpush.msra.mxu0 %v374_v38 }
  0xc4   : > { %v362_v41 = vpop.xlane.xlu0 %361  ;;  %v359_v42 = vpop.xlane.xlu1 %358 }
  0xc5   : > { %v373_v43 = vsel %vm371_vm1, %v354_v40, %v362_v41  ;;  %v372_v44 = vsel %vm371_vm1, %v353_v39, %v359_v42  ;;  %v381_v48 = vpop.permute.xlu2 %380  ;;  %vm628_vm1 = vcmask 410624  }
  0xc6   : > { %401 = vmatpush.msra.mxu0 %v373_v43 }
  0xc8   : > { %402 = vmatpush.msra.mxu0 %v372_v44 }
  0xc9   : > { %2045 = vmatmul.msk.f32.vlgmr.msra.gmra.mxu0 %vm383_vm2, %v376_v45 }
  0xcd   : > { %v429_v56 = vpop.permute.xlu2 %428 }
  0xd5   : > { %v434_v62 = vpop.permute.xlu2 %433 }
  0xd7   : > { %v419_v57 = vpop.permute.xlu0 %418 }
  0xdc   : > { %v424_v61 = vpop.permute.xlu1 %423 }
 0x146   : > { %v404_v49 = vpop.f32.mrf.mxu0 }
 0x147   : > { %v405_v50 = vadd.f32 %v404_v49, %v381_v48 }
 0x149   : > { %v407_v51 = vmax.f32 %v405_v50, 0.0 }
 0x14b   : > { %2046 = vmatpush.msk.msra.mxu1 %vm449_vm3, %v407_v51  ;;  %2205 = vmatpush.msk.msra.mxu2 %vm449_vm3, %v407_v51 }
 0x14c   : > { %2206 = vmatpush.msk.msra.mxu3 %vm449_vm3, %v407_v51  ;;  %2047 = vmatmul.msk.f32.vlgmr.msra.gmra.mxu1 %vm436_vm4, %v408_v52 }
 0x14d   : > { %2048 = vmatmul.msk.f32.vlgmr.msra.gmra.mxu2 %vm436_vm4, %v409_v53  ;;  %2050 = vmatmul.msk.f32.vlgmr.msra.gmra.mxu3 %vm436_vm4, %v411_v54 }
 0x155   : > { %2049 = vmatmul.msk.f32.gmra.mxu2 %vm436_vm4, %v410_v55 }
 0x1c9   : > { %v470_v58 = vpop.f32.mrf.mxu1 }
 0x1ca   : > { %v471_v59 = vadd.f32 %v470_v58, %v419_v57 }
 0x1cc   : > { %v482_v60 = vsel %vm436_vm4, %v471_v59, 0.0 }
 0x1cd   : > { %483 = vadd.xlane.f32.xlu1 %v482_v60 }
 0x1d0   : > { %v473_v63 = vpop.f32.mrf.mxu2  ;;  %v479_v3 = vpop.f32.mrf.mxu3 }
 0x1d1   : > { %v474_v4 = vadd.f32 %v473_v63, %v424_v61  ;;  %v480_v6 = vadd.f32 %v479_v3, %v434_v62 }
 0x1d3   : > { %v485_v11 = vsel %vm436_vm4, %v474_v4, 0.0  ;;  %v491_v12 = vsel %vm436_vm4, %v480_v6, 0.0  ;;  %v2468_v6 = vmov 32.0  }
 0x1d4   : > { %486 = vadd.xlane.f32.xlu2 %v485_v11 }
 0x1d5   : > { %492 = vadd.xlane.f32.xlu1 %v491_v12 }
 0x1d8   : > { %v476_v13 = vpop.f32.mrf.mxu2 }
 0x1d9   : > { %v477_v14 = vadd.f32 %v476_v13, %v429_v56 }
 0x1db   : > { %v488_v15 = vsel %vm436_vm4, %v477_v14, 0.0 }
 0x1dc   : > { %489 = vadd.xlane.f32.xlu0 %v488_v15 }
 0x240   : > { %v484_v16 = vpop.xlane.xlu1 %483 }
 0x241   : > { %v494_v17 = vsub.f32 0.0, %v484_v16 }
 0x243   : > { %v498_v18 = vmul.f32 1.442695, %v494_v17 }
 0x245   : > { %2300 = vpow2.f32 %v498_v18 }
 0x247   : > { %v487_v19 = vpop.xlane.xlu2 %486 }
 0x248   : > { %v495_v20 = vsub.f32 0.0, %v487_v19  ;;  %v493_v21 = vpop.xlane.xlu1 %492 }
 0x249   : > { %v497_v22 = vsub.f32 0.0, %v493_v21 }
 0x24a   : > { %v500_v24 = vmul.f32 1.442695, %v495_v20 }
 0x24b   : > { %v2301_v26 = vpop.eup %2300  ;;  %v504_v27 = vmul.f32 1.442695, %v497_v22  ;;  %v2469_v22 = vmov 0.0  }
 0x24c   : > { %v506_v28 = vadd.f32 1.0, %v2301_v26  ;;  %2302 = vpow2.f32 %v500_v24  ;;  %629 = vst.msk [vmem:[#allocation2] sm:$0x3] %vm628_vm1, %v2469_v22  ;;  %vm718_vm1 = vcmask 785408  }
 0x24d   : > { %2304 = vpow2.f32 %v504_v27 }
 0x24e   : > { %2306 = vrcp.f32 %v506_v28  ;;  %vm515_vm5 = vweird.f32 %v506_v28  ;;  %v519_v47 = vand.u32 2147483647, %v506_v28  ;;  %v521_v48 = vand.u32 2147483648, %v506_v28 }
 0x24f   : > { %v490_v29 = vpop.xlane.xlu0 %489 }
 0x250   : > { %v496_v30 = vsub.f32 0.0, %v490_v29  ;;  %vm2738_vm10 = vcmp.eq.f32.partialorder %v519_v47, 8.507059e+37  ;;  %v522_v62 = vor.u32 1.1754944e-38, %v521_v48 }
 0x252   : > { %v2303_v31 = vpop.eup %2302  ;;  %v502_v32 = vmul.f32 1.442695, %v496_v30 }
 0x253   : > { %v2305_v33 = vpop.eup %2304  ;;  %v507_v34 = vadd.f32 1.0, %v2303_v31 }
 0x254   : > { %v2729_v35 = vpop.eup %2306  ;;  %v509_v36 = vadd.f32 1.0, %v2305_v33  ;;  %2308 = vpow2.f32 %v502_v32 }
 0x255   : > { %2310 = vrcp.f32 %v507_v34  ;;  %v511_v37 = vmul.f32 %v2729_v35, %v506_v28  ;;  %vm516_vm6 = vweird.f32 %v2729_v35  ;;  %v534_v51 = vand.u32 2147483647, %v507_v34 }
 0x256   : > { %2312 = vrcp.f32 %v509_v36  ;;  %v536_v52 = vand.u32 2147483648, %v507_v34  ;;  %v564_v54 = vand.u32 2147483647, %v509_v36  ;;  %vm530_vm9 = vweird.f32 %v507_v34  ;;  %vm2756_vm14 = vmor %vm515_vm5, %vm516_vm6 }
 0x257   : > { %v512_v39 = vsub.f32 1.0, %v511_v37  ;;  %v566_v57 = vand.u32 2147483648, %v509_v36  ;;  %vm560_vm12 = vweird.f32 %v509_v36  ;;  %vm535_vm15 = vcmp.eq.f32.partialorder %v534_v51, 8.507059e+37 }
 0x258   : > { %v537_v12 = vor.u32 1.1754944e-38, %v536_v52  ;;  %vm565_vm0 = vcmp.eq.f32.partialorder %v564_v54, 8.507059e+37  ;;  %vm630_vm5 = vcmask 828824  }
 0x259   : > { %v513_v45 = vmul.f32 %v2729_v35, %v512_v39  ;;  %v567_v15 = vor.u32 1.1754944e-38, %v566_v57  ;;  %631 = vst.msk [vmem:[#allocation2 + $0x4] sm:$0x3] %vm630_vm5, %v2469_v22  ;;  %vm764_vm5 = vcmask 523264  }
 0x25a   : > { %v2309_v38 = vpop.eup %2308 }
 0x25b   : > { %v2311_v40 = vpop.eup %2310  ;;  %v2732_v41 = vadd.f32 1.0, %v2309_v38  ;;  %v514_v55 = vadd.f32 %v2729_v35, %v513_v45 }
 0x25c   : > { %v2313_v42 = vpop.eup %2312  ;;  %v526_v43 = vmul.f32 %v2311_v40, %v507_v34  ;;  %vm531_vm7 = vweird.f32 %v2311_v40 }
 0x25d   : > { %v556_v44 = vmul.f32 %v2313_v42, %v509_v36  ;;  %2314 = vrcp.f32 %v2732_v41  ;;  %vm561_vm8 = vweird.f32 %v2313_v42  ;;  %vm2742_vm11 = vmor %vm530_vm9, %vm531_vm7  ;;  %v518_v14 = vsel %vm2756_vm14, %v2729_v35, %v514_v55 }
 0x25e   : > { %v527_v46 = vsub.f32 1.0, %v526_v43  ;;  %vm2748_vm13 = vmor %vm560_vm12, %vm561_vm8  ;;  %2316 = vrcp.f32 %v2468_v6  ;;  %v549_v17 = vand.u32 2147483647, %v2732_v41  ;;  %v551_v19 = vand.u32 2147483648, %v2732_v41 }
 0x25f   : > { %v557_v49 = vsub.f32 1.0, %v556_v44  ;;  %v523_v24 = vsel %vm2738_vm10, %v522_v62, %v518_v14  ;;  %vm545_vm6 = vweird.f32 %v2732_v41  ;;  %vm643_vm12 = vcmask 1043458  }
 0x260   : > { %v528_v50 = vmul.f32 %v2311_v40, %v527_v46  ;;  %v552_v32 = vor.u32 1.1754944e-38, %v551_v19  ;;  %v2783_v33 = vmul.f32 %v523_v24, %v2661_v9  ;;  %vm550_vm8 = vcmp.eq.f32.partialorder %v549_v17, 8.507059e+37 }
 0x261   : > { %v558_v53 = vmul.f32 %v2313_v42, %v557_v49  ;;  %vm645_vm14 = vcmask 414724  }
 0x262   : > { %v529_v56 = vadd.f32 %v2311_v40, %v528_v50  ;;  %3463 = vst [vmem:[#allocation21_spill] sm:$0xff] %v2783_v33 }
 0x263   : > { %v2315_v58 = vpop.eup %2314  ;;  %v559_v61 = vadd.f32 %v2313_v42, %v558_v53 }
 0x264   : > { %v533_v63 = vsel %vm2742_vm11, %v2311_v40, %v529_v56  ;;  %v541_v4 = vmul.f32 %v2315_v58, %v2732_v41  ;;  %vm546_vm4 = vweird.f32 %v2315_v58  ;;  %v2317_v26 = vpop.eup %2316  ;;  %vm642_vm11 = vcmask 1041816  }
 0x265   : > { %v563_v13 = vsel %vm2748_vm13, %v2313_v42, %v559_v61  ;;  %v538_v18 = vsel %vm535_vm15, %v537_v12, %v533_v63  ;;  %vm547_vm7 = vmor %vm545_vm6, %vm546_vm4  ;;  %v615_v35 = vmul.f32 32.0, %v2317_v26  ;;  %vm619_vm9 = vweird.f32 %v2317_v26 }
 0x266   : > { %v542_v16 = vsub.f32 1.0, %v541_v4  ;;  %v568_v20 = vsel %vm565_vm0, %v567_v15, %v563_v13  ;;  %v2770_v27 = vmul.f32 %v538_v18, %v2657_v7  ;;  %v2773_v28 = vmul.f32 %v538_v18, %v2659_v8  ;;  %vm644_vm13 = vmor %vm643_vm12, %vm642_vm11 }
 0x267   : > { %v2777_v30 = vmul.f32 %v568_v20, %v2643_v0  ;;  %v2780_v31 = vmul.f32 %v568_v20, %v2645_v1  ;;  %v2786_v7 = vmul.f32 %v523_v24, %v2663_v10  ;;  %v616_v40 = vsub.f32 1.0, %v615_v35  ;;  %vm646_vm0 = vmor %vm645_vm14, %vm644_vm13 }
 0x268   : > { %v543_v21 = vmul.f32 %v2315_v58, %v542_v16  ;;  %3460 = vst [vmem:[#allocation18_spill] sm:$0xff] %v2770_v27  ;;  %v596_v1 = vadd.f32 %v2770_v27, %v2783_v33  ;;  %v624_v63 = vshrl.u32 %v369_v23, 7  ;;  %vm639_vm15 = vcmask 416768  }
 0x269   : > { %3461 = vst [vmem:[#allocation19_spill] sm:$0xff] %v2777_v30  ;;  %v605_v9 = vadd.f32 %v2773_v28, %v2786_v7  ;;  %v579_v10 = vmax.f32 %v2770_v27, %v2777_v30  ;;  %v588_v37 = vmax.f32 %v2773_v28, %v2780_v31  ;;  %v617_v49 = vmul.f32 %v2317_v26, %v616_v40 }
 0x26a   : > { %v544_v29 = vadd.f32 %v2315_v58, %v543_v21  ;;  %3462 = vst [vmem:[#allocation20_spill] sm:$0xff] %v2780_v31  ;;  %vm625_vm10 = vcmp.eq.s32.totalorder %v624_v63, 0  ;;  %v899_v40 = vstv %s2080_s10  ;;  %s2104_s10 = sld [smem:[#allocation7 + $0x1e]]  ;;  %vm741_vm4 = vcmask 654336  }
 0x26b   : > { %vm787_vm6 = vcmask 392192   ;;  %vm1337_vm14 = vcmask 1022976  }
 0x26c   : > { %v548_v34 = vsel %vm547_vm7, %v2315_v58, %v544_v29  ;;  %v618_v58 = vadd.f32 %v2317_v26, %v617_v49  ;;  %v735_v29 = vstv %s2059_s17  ;;  %s2083_s17 = sld [smem:[#allocation7 + $0x1d]] }
 0x26d   : > { %v553_v8 = vsel %vm550_vm8, %v552_v32, %v548_v34  ;;  %v712_v32 = vstv %s2056_s19  ;;  %v689_v34 = vstv %s2053_s20  ;;  %s2101_s19 = sld [smem:[#allocation7 + $0x17]] }
 0x26e   : > { %v2789_v36 = vmul.f32 %v553_v8, %v2647_v2  ;;  %v2792_v0 = vmul.f32 %v553_v8, %v2653_v5  ;;  %v620_v11 = vsel %vm619_vm9, %v2317_v26, %v618_v58  ;;  %s2098_s20 = sld [smem:[#allocation7 + $0x10]]  ;;  %vm1003_vm9 = vcmask 1039360  }
 0x270   : > { %3464 = vst [vmem:[#allocation22_spill] sm:$0xff] %v2789_v36  ;;  %v578_v38 = vmax.f32 %v2783_v33, %v2789_v36  ;;  %v587_v2 = vmax.f32 %v2786_v7, %v2792_v0  ;;  %v597_v5 = vadd.f32 %v596_v1, %v2789_v36  ;;  %v606_v39 = vadd.f32 %v605_v9, %v2792_v0 }
 0x272   : > { %v580_v41 = vmax.f32 %v578_v38, %v579_v10  ;;  %v589_v42 = vmax.f32 %v587_v2, %v588_v37  ;;  %v598_v43 = vadd.f32 %v597_v5, %v2777_v30  ;;  %v607_v44 = vadd.f32 %v606_v39, %v2780_v31 }
 0x273   : > { %v804_v10 = vstv %s2068_s11  ;;  %v781_v37 = vstv %s2065_s18  ;;  %v758_v38 = vstv %s2062_s21  ;;  %s2095_s11 = sld [smem:[#allocation7 + $0x9]] }
 0x274   : > { %v581_v45 = vrot.slane %v580_v41, 4  ;;  %v590_v46 = vrot.slane %v589_v42, 4  ;;  %v599_v47 = vrot.slane %v598_v43, 4  ;;  %v608_v48 = vrot.slane %v607_v44, 4  ;;  %s2110_s18 = sld [smem:[#allocation7 + $0x2c]] }
 0x275   : > { %s2107_s21 = sld [smem:[#allocation7 + $0x25]] }
 0x276   : > { %v582_v50 = vmax.f32 %v580_v41, %v581_v45  ;;  %v591_v51 = vmax.f32 %v589_v42, %v590_v46  ;;  %v600_v52 = vadd.f32 %v599_v47, %v598_v43  ;;  %v609_v53 = vadd.f32 %v608_v48, %v607_v44 }
 0x277   : > { %v877_v41 = vstv %s2077_s29  ;;  %v855_v42 = vstv %s2074_s14  ;;  %v965_v46 = vstv %s2089_s15  ;;  %v921_v48 = vstv %s2083_s17  ;;  %s2122_s29 = sld [smem:[#allocation7 + $0x18]] }
 0x278   : > { %v583_v54 = vrot.slane %v582_v50, 2  ;;  %v592_v55 = vrot.slane %v591_v51, 2  ;;  %v601_v56 = vrot.slane %v600_v52, 2  ;;  %v610_v57 = vrot.slane %v609_v53, 2  ;;  %s2119_s14 = sld [smem:[#allocation7 + $0x11]] }
 0x279   : > { %s2116_s15 = sld [smem:[#allocation7 + $0xa]] }
 0x27a   : > { %v584_v59 = vmax.f32 %v582_v50, %v583_v54  ;;  %v593_v60 = vmax.f32 %v591_v51, %v592_v55  ;;  %v602_v61 = vadd.f32 %v601_v56, %v600_v52  ;;  %v611_v62 = vadd.f32 %v610_v57, %v609_v53  ;;  %s2128_s17 = sld [smem:[#allocation7 + $0x26]] }
 0x27b   : > { %v1070_v52 = vstv %s2101_s19  ;;  %v1048_v53 = vstv %s2098_s20  ;;  %v1026_v54 = vstv %s2095_s11  ;;  %v1136_v58 = vstv %s2110_s18  ;;  %s2125_s19 = sld [smem:[#allocation7 + $0x1f]] }
 0x27c   : > { %v594_v3 = vrot.slane %v593_v60, 1  ;;  %v603_v4 = vrot.slane %v602_v61, 1  ;;  %v612_v6 = vrot.slane %v611_v62, 1  ;;  %v585_v12 = vrot.slane %v584_v59, 1  ;;  %s2164_s20 = sld [smem:[#allocation7 + $0x1a]] }
 0x27d   : > { %s2158_s11 = sld [smem:[#allocation7 + $0xc]] }
 0x27e   : > { %v604_v13 = vadd.f32 %v603_v4, %v602_v61  ;;  %v613_v14 = vadd.f32 %v612_v6, %v611_v62  ;;  %v595_v15 = vmax.f32 %v593_v60, %v594_v3  ;;  %v586_v18 = vmax.f32 %v584_v59, %v585_v12  ;;  %s2137_s18 = sld [smem:[#allocation7 + $0xb]] }
 0x27f   : > { %v1114_v59 = vstv %s2107_s21  ;;  %v1092_v60 = vstv %s2104_s10  ;;  %v1241_v3 = vstv %s2122_s29  ;;  %v1219_v4 = vstv %s2119_s14  ;;  %s2167_s21 = sld [smem:[#allocation7 + $0x21]] }
 0x280   : > { %v621_v16 = vmul.f32 %v620_v11, %v604_v13  ;;  %v622_v17 = vmul.f32 %v620_v11, %v613_v14  ;;  %v1197_v6 = vstv %s2116_s15  ;;  %s2179_s10 = sld [smem:[#allocation7 + $0xd]] }
 0x281   : > { %s2140_s29 = sld [smem:[#allocation7 + $0x12]] }
 0x282   : > { %v627_v19 = vsel %vm625_vm10, %v595_v15, %v622_v17  ;;  %v626_v21 = vsel %vm625_vm10, %v586_v18, %v621_v16  ;;  %v1285_v15 = vstv %s2128_s17  ;;  %v1263_v16 = vstv %s2125_s19  ;;  %s2131_s14 = sld [smem:[#allocation7 + $0x2d]] }
 0x283   : > { %v634_v20 = vrot.slane %v627_v19, 6  ;;  %s2182_s15 = sld [smem:[#allocation7 + $0x14]] }
 0x284   : > { %s2191_s17 = sld [smem:[#allocation7 + $0x29]] }
 0x285   : > { %v635_v22 = vsel %vm449_vm3, %v626_v21, %v634_v20  ;;  %v1573_v20 = vstv %s2164_s20  ;;  %v1529_v21 = vstv %s2158_s11  ;;  %s2185_s19 = sld [smem:[#allocation7 + $0x1b]]  ;;  %vm695_vm3 = vcmask 916480  }
 0x286   : > { %636 = vrot.lane.b32.xlu2 %v635_v22, %s2470_s22  ;;  %s2086_s22 = sld [smem:[#allocation7 + $0x24]]  ;;  %v1358_v22 = vstv %s2137_s18 }
 0x287   : > { %s2146_s20 = sld [smem:[#allocation7 + $0x20]] }
 0x288   : > { %s2173_s11 = sld [smem:[#allocation7 + $0x2f]] }
 0x289   : > { %s2188_s18 = sld [smem:[#allocation7 + $0x22]] }
 0x28c   : > { %v943_v47 = vstv %s2086_s22  ;;  %s2161_s22 = sld [smem:[#allocation7 + $0x13]] }
 0x292   : > { %v1551_v14 = vstv %s2161_s22  ;;  %s2143_s22 = sld [smem:[#allocation7 + $0x19]] }
 0x2e0   : > { %v637_v23 = vpop.permute.xlu2 %636 }
 0x2e1   : > { %v638_v24 = vrot.slane %v637_v23, 6 }
 0x2e3   : > { %v640_v26 = vsel %vm639_vm15, %v638_v24, %v637_v23  ;;  %vm1506_vm15 = vcmask 1014784  }
 0x2e4   : > { %647 = vst.msk [vmem:[#allocation2] sm:$0x3f] %vm646_vm0, %v640_v26 }
 0x2eb   : > { %v2812_v8 = vld [vmem:[#allocation2] sm:$0x3f] }
 0x2ec   : > { %v736_v35 = vmul.f32 %v735_v29, %v2812_v8  ;;  %v713_v1 = vmul.f32 %v712_v32, %v2812_v8  ;;  %v690_v9 = vmul.f32 %v689_v34, %v2812_v8  ;;  %v805_v2 = vmul.f32 %v804_v10, %v2812_v8 }
 0x2ed   : > { %v782_v5 = vmul.f32 %v781_v37, %v2812_v8  ;;  %v759_v39 = vmul.f32 %v758_v38, %v2812_v8  ;;  %v900_v43 = vmul.f32 %v899_v40, %v2812_v8  ;;  %v878_v44 = vmul.f32 %v877_v41, %v2812_v8 }
 0x2ee   : > { %738 = vrot.lane.b32.xlu0 %v736_v35, %s2471_s23  ;;  %715 = vrot.lane.b32.xlu2 %v713_v1, %s2472_s5  ;;  %v856_v45 = vmul.f32 %v855_v42, %v2812_v8  ;;  %v966_v49 = vmul.f32 %v965_v46, %v2812_v8  ;;  %v944_v50 = vmul.f32 %v943_v47, %v2812_v8  ;;  %v1595_v29 = vstv %s2167_s21  ;;  %s2149_s21 = sld [smem:[#allocation7 + $0x27]] }
 0x2ef   : > { %692 = vrot.lane.b32.xlu1 %v690_v9, %s2473_s8  ;;  %v922_v51 = vmul.f32 %v921_v48, %v2812_v8  ;;  %v1071_v55 = vmul.f32 %v1070_v52, %v2812_v8  ;;  %v1049_v56 = vmul.f32 %v1048_v53, %v2812_v8  ;;  %v1027_v57 = vmul.f32 %v1026_v54, %v2812_v8 }
 0x2f0   : > { %v1137_v61 = vmul.f32 %v1136_v58, %v2812_v8  ;;  %v1115_v62 = vmul.f32 %v1114_v59, %v2812_v8  ;;  %v1093_v63 = vmul.f32 %v1092_v60, %v2812_v8  ;;  %v1242_v11 = vmul.f32 %v1241_v3, %v2812_v8 }
 0x2f1   : > { %v1220_v12 = vmul.f32 %v1219_v4, %v2812_v8  ;;  %v1198_v13 = vmul.f32 %v1197_v6, %v2812_v8  ;;  %v1552_v17 = vmul.f32 %v1551_v14, %v2812_v8  ;;  %v1286_v18 = vmul.f32 %v1285_v15, %v2812_v8 }
 0x2f2   : > { %v1264_v19 = vmul.f32 %v1263_v16, %v2812_v8  ;;  %v1574_v23 = vmul.f32 %v1573_v20, %v2812_v8  ;;  %v1530_v24 = vmul.f32 %v1529_v21, %v2812_v8  ;;  %v1359_v26 = vmul.f32 %v1358_v22, %v2812_v8 }
 0x2f3   : > { %v1700_v32 = vstv %s2179_s10  ;;  %v1380_v34 = vstv %s2140_s29  ;;  %v1596_v35 = vmul.f32 %v1595_v29, %v2812_v8  ;;  %v1307_v10 = vstv %s2131_s14  ;;  %s2054_s10 = sld [smem:[#allocation7 + $0x38]] }
 0x2f4   : > { %v1701_v1 = vmul.f32 %v1700_v32, %v2812_v8  ;;  %v1381_v9 = vmul.f32 %v1380_v34, %v2812_v8  ;;  %v1722_v37 = vstv %s2182_s15  ;;  %v1402_v38 = vstv %s2143_s22  ;;  %s2057_s29 = sld [smem:[#allocation7 + $0x3f]] }
 0x2f5   : > { %v1788_v40 = vstv %s2191_s17  ;;  %v1744_v41 = vstv %s2185_s19  ;;  %v1424_v42 = vstv %s2146_s20  ;;  %v1639_v47 = vstv %s2173_s11  ;;  %s2170_s14 = sld [smem:[#allocation7 + $0x28]] }
 0x2f6   : > { %807 = vrot.lane.b32.xlu0 %v805_v2, %s2474_s16  ;;  %784 = vrot.lane.b32.xlu2 %v782_v5, %s2475_s6  ;;  %v1308_v2 = vmul.f32 %v1307_v10, %v2812_v8  ;;  %v1723_v5 = vmul.f32 %v1722_v37, %v2812_v8  ;;  %v1766_v48 = vstv %s2188_s18  ;;  %s2063_s15 = sld [smem:[#allocation7 + $0x4d]] }
 0x2f7   : > { %761 = vrot.lane.b32.xlu1 %v759_v39, %s2476_s12  ;;  %v1403_v39 = vmul.f32 %v1402_v38, %v2812_v8  ;;  %s2066_s22 = sld [smem:[#allocation7 + $0x54]] }
 0x2f8   : > { %s2152_s17 = sld [smem:[#allocation7 + $0x2e]] }
 0x2f9   : > { %v699_v53 = vstv %s2054_s10  ;;  %s2060_s19 = sld [smem:[#allocation7 + $0x46]] }
 0x2fa   : > { %v722_v54 = vstv %s2057_s29  ;;  %s2075_s20 = sld [smem:[#allocation7 + $0x39]] }
 0x2fb   : > { %v723_v58 = vmul.f32 %v722_v54, %v2812_v8  ;;  %s2078_s11 = sld [smem:[#allocation7 + $0x40]] }
 0x2fc   : > { %s2907_s18 = sld [smem:[#allocation7 + $0x5b]] }
 0x2fd   : > { %s2087_s10 = sld [smem:[#allocation7 + $0x55]] }
 0x2fe   : > { %902 = vrot.lane.b32.xlu0 %v900_v43, %s2471_s23  ;;  %880 = vrot.lane.b32.xlu2 %v878_v44, %s2472_s5  ;;  %v1789_v43 = vmul.f32 %v1788_v40, %v2812_v8  ;;  %v1745_v44 = vmul.f32 %v1744_v41, %v2812_v8  ;;  %v1468_v6 = vstv %s2152_s17  ;;  %s2072_s29 = sld [smem:[#allocation7 + $0x32]] }
 0x2ff   : > { %858 = vrot.lane.b32.xlu1 %v856_v45, %s2473_s8  ;;  %v1425_v45 = vmul.f32 %v1424_v42, %v2812_v8  ;;  %v745_v15 = vstv %s2060_s19  ;;  %s2930_s17 = sld [smem:[#allocation7 + $0x41]] }
 0x300   : > { %v864_v16 = vstv %s2075_s20  ;;  %v746_v20 = vmul.f32 %v745_v15, %v2812_v8  ;;  %s2943_s19 = sld [smem:[#allocation7 + $0x5c]] }
 0x301   : > { %v865_v21 = vmul.f32 %v864_v16, %v2812_v8  ;;  %s2947_s20 = sld [smem:[#allocation7 + $0x4f]] }
 0x302   : > { %v813_v32 = vstv %s2907_s18  ;;  %s2093_s18 = sld [smem:[#allocation7 + $0x33]] }
 0x303   : > { %v814_v10 = vmul.f32 %v813_v32, %v2812_v8 }
 0x304   : > { %v846_v38 = vstv %s2072_s29  ;;  %s2973_s29 = sld [smem:[#allocation7 + $0x3b]] }
 0x305   : > { %v2070_v40 = vrot.slane %v814_v10, 9 }
 0x306   : > { %968 = vrot.lane.b32.xlu0 %v966_v49, %s2474_s16  ;;  %946 = vrot.lane.b32.xlu2 %v944_v50, %s2475_s6  ;;  %v1446_v49 = vstv %s2149_s21  ;;  %v1640_v50 = vmul.f32 %v1639_v47, %v2812_v8  ;;  %s2084_s21 = sld [smem:[#allocation7 + $0x4e]]  ;;  %v1057_v47 = vstv %s2930_s17 }
 0x307   : > { %924 = vrot.lane.b32.xlu1 %v922_v51, %s2476_s12  ;;  %v1767_v51 = vmul.f32 %v1766_v48, %v2812_v8  ;;  %v1447_v52 = vmul.f32 %v1446_v49, %v2812_v8  ;;  %s2995_s17 = sld [smem:[#allocation7 + $0x5d]] }
 0x308   : > { %v1017_v16 = vstv %s2093_s18  ;;  %s3017_s18 = sld [smem:[#allocation7 + $0x34]] }
 0x30a   : > { %v1206_v32 = vstv %s2973_s29  ;;  %s3028_s29 = sld [smem:[#allocation7 + $0x49]] }
 0x30c   : > { %v930_v34 = vstv %s2084_s21  ;;  %s2964_s21 = sld [smem:[#allocation7 + $0x2]] }
 0x30d   : > { %v931_v37 = vmul.f32 %v930_v34, %v2812_v8 }
 0x30e   : > { %1073 = vrot.lane.b32.xlu0 %v1071_v55, %s2471_s23  ;;  %1051 = vrot.lane.b32.xlu2 %v1049_v56, %s2472_s5  ;;  %v700_v56 = vmul.f32 %v699_v53, %v2812_v8 }
 0x30f   : > { %1029 = vrot.lane.b32.xlu1 %v1027_v57, %s2473_s8  ;;  %v1617_v57 = vstv %s2170_s14  ;;  %s2921_s14 = sld [smem:[#allocation7 + $0x1]]  ;;  %v2085_v41 = vrot.slane %v931_v37, 9 }
 0x310   : > { %v1618_v59 = vmul.f32 %v1617_v57, %v2812_v8  ;;  %v2055_v60 = vrot.slane %v700_v56, 9  ;;  %v1058_v56 = vmul.f32 %v1057_v47, %v2812_v8 }
 0x312   : > { %v1014_v34 = vstv %s2964_s21  ;;  %s3022_s21 = sld [smem:[#allocation7 + $0x6]] }
 0x316   : > { %1139 = vrot.lane.b32.xlu0 %v1137_v61, %s2474_s16  ;;  %1117 = vrot.lane.b32.xlu2 %v1115_v62, %s2475_s6  ;;  %v2058_v61 = vrot.slane %v723_v58, 9  ;;  %v768_v62 = vstv %s2063_s15  ;;  %s2923_s15 = sld [smem:[#allocation7 + $0x47]] }
 0x317   : > { %1095 = vrot.lane.b32.xlu1 %v1093_v63, %s2476_s12  ;;  %v791_v63 = vstv %s2066_s22  ;;  %v769_v4 = vmul.f32 %v768_v62, %v2812_v8  ;;  %s2926_s22 = sld [smem:[#allocation7 + $0x3a]] }
 0x31e   : > { %1244 = vrot.lane.b32.xlu0 %v1242_v11, %s2471_s23  ;;  %1222 = vrot.lane.b32.xlu2 %v1220_v12, %s2472_s5  ;;  %v792_v11 = vmul.f32 %v791_v63, %v2812_v8  ;;  %v1469_v12 = vmul.f32 %v1468_v6, %v2812_v8  ;;  %v2100_v63 = vrot.slane %v1058_v56, 9  ;;  %v1101_v6 = vstv %s2947_s20  ;;  %s3005_s20 = sld [smem:[#allocation7 + $0x43]] }
 0x31f   : > { %1200 = vrot.lane.b32.xlu1 %v1198_v13, %s2473_s8  ;;  %v2064_v13 = vrot.slane %v769_v4, 9  ;;  %v974_v4 = vstv %s2943_s19  ;;  %v1102_v15 = vmul.f32 %v1101_v6, %v2812_v8  ;;  %s2999_s19 = sld [smem:[#allocation7 + $0x50]] }
 0x320   : > { %v2067_v14 = vrot.slane %v792_v11, 9 }
 0x326   : > { %1554 = vrot.lane.b32.xlu0 %v1552_v17, %s2472_s5  ;;  %1288 = vrot.lane.b32.xlu2 %v1286_v18, %s2475_s6  ;;  %v886_v17 = vstv %s2078_s11  ;;  %s2953_s11 = sld [smem:[#allocation7 + $0x56]] }
 0x327   : > { %1266 = vrot.lane.b32.xlu1 %v1264_v19, %s2476_s12 }
 0x32c   : > { %v1123_v11 = vstv %s2953_s11  ;;  %s3009_s11 = sld [smem:[#allocation7 + $0x37]] }
 0x32e   : > { %1576 = vrot.lane.b32.xlu0 %v1574_v23, %s2471_s23  ;;  %1532 = vrot.lane.b32.xlu2 %v1530_v24, %s2473_s8  ;;  %v887_v23 = vmul.f32 %v886_v17, %v2812_v8  ;;  %v2061_v24 = vrot.slane %v746_v20, 9  ;;  %v1124_v20 = vmul.f32 %v1123_v11, %v2812_v8 }
 0x32f   : > { %1361 = vrot.lane.b32.xlu1 %v1359_v26, %s2473_s8  ;;  %v2076_v26 = vrot.slane %v865_v21, 9  ;;  %v1018_v21 = vmul.f32 %v1017_v16, %v2812_v8 }
 0x330   : > { %v2079_v29 = vrot.slane %v887_v23, 9 }
 0x331   : > { %v2094_v10 = vrot.slane %v1018_v21, 9 }
 0x336   : > { %1598 = vrot.lane.b32.xlu0 %v1596_v35, %s2476_s12  ;;  %1703 = vrot.lane.b32.xlu2 %v1701_v1, %s2473_s8  ;;  %v952_v35 = vstv %s2087_s10  ;;  %s2967_s10 = sld [smem:[#allocation7 + $0x48]] }
 0x337   : > { %1383 = vrot.lane.b32.xlu1 %v1381_v9, %s2472_s5 }
 0x33e   : > { %1310 = vrot.lane.b32.xlu0 %v1308_v2, %s2474_s16  ;;  %1725 = vrot.lane.b32.xlu2 %v1723_v5, %s2472_s5  ;;  %v953_v5 = vmul.f32 %v952_v35, %v2812_v8 }
 0x33f   : > { %1405 = vrot.lane.b32.xlu1 %v1403_v39, %s2471_s23  ;;  %v847_v39 = vmul.f32 %v846_v38, %v2812_v8 }
 0x340   : > { %v2088_v42 = vrot.slane %v953_v5, 9 }
 0x341   : > { %v2073_v48 = vrot.slane %v847_v39, 9 }
 0x346   : > { %1791 = vrot.lane.b32.xlu0 %v1789_v43, %s2475_s6  ;;  %1747 = vrot.lane.b32.xlu2 %v1745_v44, %s2471_s23  ;;  %v908_v43 = vstv %s2923_s15  ;;  %v1035_v44 = vstv %s2926_s22  ;;  %s2981_s15 = sld [smem:[#allocation7 + $0x36]] }
 0x347   : > { %1427 = vrot.lane.b32.xlu1 %v1425_v45, %s2476_s12  ;;  %v843_v45 = vstv %s2921_s14  ;;  %s2978_s14 = sld [smem:[#allocation7 + $0x42]] }
 0x348   : > { %v2886_v46 = vpop.permute.xlu2 %715  ;;  %v844_v53 = vmul.f32 %v843_v45, %v2812_v8  ;;  %s2993_s22 = sld [smem:[#allocation7 + $0x5]] }
 0x349   : > { %v717_v31 = vrot.slane %v2886_v46, 2 }
 0x34a   : > { %v852_v58 = vadd.f32 %v2073_v48, %v844_v53 }
 0x34c   : > { %v1520_v37 = vstv %s2981_s15  ;;  %s3039_s15 = sld [smem:[#allocation7 + $0x4a]] }
 0x34d   : > { %v1228_v35 = vstv %s2978_s14  ;;  %v1521_v45 = vmul.f32 %v1520_v37, %v2812_v8  ;;  %s3034_s14 = sld [smem:[#allocation7 + $0x3c]]  ;;  %v1688_v37 = vstv %s3022_s21 }
 0x34e   : > { %1642 = vrot.lane.b32.xlu0 %v1640_v50, %s2474_s16  ;;  %1769 = vrot.lane.b32.xlu2 %v1767_v51, %s2476_s12  ;;  %v909_v51 = vmul.f32 %v908_v43, %v2812_v8  ;;  %v1229_v43 = vmul.f32 %v1228_v35, %v2812_v8  ;;  %v1517_v53 = vstv %s2993_s22  ;;  %s3057_s22 = sld [smem:[#allocation7 + $0x3e]] }
 0x34f   : > { %1449 = vrot.lane.b32.xlu1 %v1447_v52, %s2475_s6  ;;  %v1036_v52 = vmul.f32 %v1035_v44, %v2812_v8  ;;  %s3092_s21 = sld [smem:[#allocation7 + $0x44]] }
 0x350   : > { %v2894_v55 = vpop.permute.xlu2 %784  ;;  %v2121_v56 = vrot.slane %v1229_v43, 9 }
 0x352   : > { %v1411_v43 = vstv %s3039_s15  ;;  %s3118_s15 = sld [smem:[#allocation7 + $0x53]] }
 0x356   : > { %1620 = vrot.lane.b32.xlu2 %v1618_v59, %s2475_s6  ;;  %704 = vrot.lane.b32.xlu0 %v2055_v60, %s2473_s8  ;;  %v2082_v60 = vrot.slane %v909_v51, 9 }
 0x357   : > { %727 = vrot.lane.b32.xlu1 %v2058_v61, %s2472_s5  ;;  %v2097_v61 = vrot.slane %v1036_v52, 9 }
 0x358   : > { %v2902_v3 = vpop.permute.xlu2 %880 }
 0x35e   : > { %1471 = vrot.lane.b32.xlu2 %v1469_v12, %s2474_s16  ;;  %773 = vrot.lane.b32.xlu0 %v2064_v13, %s2476_s12 }
 0x35f   : > { %796 = vrot.lane.b32.xlu1 %v2067_v14, %s2475_s6  ;;  %v975_v14 = vmul.f32 %v974_v4, %v2812_v8  ;;  %v1518_v4 = vmul.f32 %v1517_v53, %v2812_v8 }
 0x360   : > { %v2912_v18 = vpop.permute.xlu0 %738  ;;  %v2914_v19 = vpop.permute.xlu2 %946 }
 0x361   : > { %v2918_v22 = vpop.permute.xlu1 %692  ;;  %v2091_v23 = vrot.slane %v975_v14, 9 }
 0x362   : > { %v694_v30 = vrot.slane %v2918_v22, 2 }
 0x366   : > { %750 = vrot.lane.b32.xlu2 %v2061_v24, %s2471_s23  ;;  %869 = vrot.lane.b32.xlu0 %v2076_v26, %s2473_s8  ;;  %v2106_v24 = vrot.slane %v1102_v15, 9  ;;  %v2109_v26 = vrot.slane %v1124_v20, 9  ;;  %v1188_v15 = vstv %s3017_s18  ;;  %s3086_s18 = sld [smem:[#allocation7 + $0x45]] }
 0x367   : > { %891 = vrot.lane.b32.xlu1 %v2079_v29, %s2472_s5  ;;  %v1079_v29 = vstv %s2967_s10  ;;  %s3024_s10 = sld [smem:[#allocation7 + $0x3]] }
 0x368   : > { %v2933_v1 = vpop.permute.xlu0 %807  ;;  %v2935_v9 = vpop.permute.xlu2 %1051  ;;  %v1080_v39 = vmul.f32 %v1079_v29, %v2812_v8  ;;  %v1189_v29 = vmul.f32 %v1188_v15, %v2812_v8 }
 0x369   : > { %v2939_v2 = vpop.permute.xlu1 %761 }
 0x36a   : > { %v2103_v51 = vrot.slane %v1080_v39, 9  ;;  %v1250_v39 = vstv %s3028_s29  ;;  %s3109_s29 = sld [smem:[#allocation7 + $0x4c]] }
 0x36e   : > { %818 = vrot.lane.b32.xlu2 %v2070_v40, %s2474_s16  ;;  %935 = vrot.lane.b32.xlu0 %v2085_v41, %s2476_s12  ;;  %v1207_v40 = vmul.f32 %v1206_v32, %v2812_v8  ;;  %v1015_v41 = vmul.f32 %v1014_v34, %v2812_v8 }
 0x36f   : > { %957 = vrot.lane.b32.xlu1 %v2088_v42, %s2475_s6 }
 0x370   : > { %v2956_v49 = vpop.permute.xlu0 %902  ;;  %v2958_v50 = vpop.permute.xlu2 %1117  ;;  %v1023_v47 = vadd.f32 %v2094_v10, %v1015_v41  ;;  %v2118_v52 = vrot.slane %v1207_v40, 9  ;;  %v1367_v40 = vstv %s3034_s14  ;;  %s3113_s14 = sld [smem:[#allocation7 + $0x4b]] }
 0x371   : > { %v859_v54 = vpop.permute.xlu1 %858 }
 0x372   : > { %v860_v57 = vrot.slane %v859_v54, 2 }
 0x374   : > { %v861_v59 = vsel %vm695_vm3, %v859_v54, %v860_v57  ;;  %v1145_v57 = vstv %s2995_s17  ;;  %s3062_s17 = sld [smem:[#allocation7 + $0x3d]] }
 0x375   : > { %v2969_v62 = vadd.f32 %v861_v59, %v852_v58  ;;  %v1272_v58 = vstv %s2999_s19  ;;  %v2157_v59 = vrot.slane %v1521_v45, 9  ;;  %v1146_v11 = vmul.f32 %v1145_v57, %v2812_v8  ;;  %s3068_s19 = sld [smem:[#allocation7 + $0x51]] }
 0x376   : > { %913 = vrot.lane.b32.xlu2 %v2082_v60, %s2471_s23  ;;  %1040 = vrot.lane.b32.xlu0 %v2097_v61, %s2473_s8  ;;  %v1389_v60 = vstv %s3005_s20  ;;  %v1691_v61 = vstv %s3009_s11  ;;  %v1273_v14 = vmul.f32 %v1272_v58, %v2812_v8  ;;  %s3076_s20 = sld [smem:[#allocation7 + $0x35]]  ;;  %v1412_v58 = vmul.f32 %v1411_v43, %v2812_v8 }
 0x377   : > { %1062 = vrot.lane.b32.xlu1 %v2100_v63, %s2472_s5  ;;  %v1390_v21 = vmul.f32 %v1389_v60, %v2812_v8  ;;  %v2112_v34 = vrot.slane %v1146_v11, 9  ;;  %s3081_s11 = sld [smem:[#allocation7 + $0x4]] }
 0x378   : > { %v2983_v12 = vpop.permute.xlu0 %968  ;;  %v2985_v13 = vpop.permute.xlu2 %1222  ;;  %v2127_v35 = vrot.slane %v1273_v14, 9 }
 0x379   : > { %v2989_v17 = vpop.permute.xlu1 %924  ;;  %v2142_v10 = vrot.slane %v1390_v21, 9  ;;  %v2145_v21 = vrot.slane %v1412_v58, 9 }
 0x37e   : > { %979 = vrot.lane.b32.xlu2 %v2091_v23, %s2474_s16  ;;  %1106 = vrot.lane.b32.xlu0 %v2106_v24, %s2476_s12  ;;  %v1526_v23 = vadd.f32 %v2157_v59, %v1518_v4  ;;  %v1692_v24 = vmul.f32 %v1691_v61, %v2812_v8 }
 0x37f   : > { %1128 = vrot.lane.b32.xlu1 %v2109_v26, %s2475_s6 }
 0x380   : > { %v3011_v38 = vpop.permute.xlu0 %1073  ;;  %v3013_v5 = vpop.permute.xlu2 %1288  ;;  %v2178_v41 = vrot.slane %v1692_v24, 9  ;;  %v1538_v24 = vstv %s3062_s17  ;;  %s2171_s17 = sld [smem:[#allocation7 + $0x59]] }
 0x381   : > { %v1030_v42 = vpop.permute.xlu1 %1029 }
 0x382   : > { %v1031_v44 = vrot.slane %v1030_v42, 2 }
 0x384   : > { %v1032_v48 = vsel %vm695_vm3, %v1030_v42, %v1031_v44  ;;  %v1185_v42 = vstv %s3024_s10  ;;  %v2115_v44 = vrot.slane %v1189_v29, 9  ;;  %s2129_s10 = sld [smem:[#allocation7 + $0x57]] }
 0x385   : > { %v3030_v54 = vadd.f32 %v1032_v48, %v1023_v47  ;;  %v1689_v47 = vmul.f32 %v1688_v37, %v2812_v8  ;;  %v1349_v37 = vstv %s3076_s20  ;;  %s2153_s20 = sld [smem:[#allocation7 + $0x5f]] }
 0x386   : > { %1084 = vrot.lane.b32.xlu2 %v2103_v51, %s2471_s23  ;;  %1211 = vrot.lane.b32.xlu0 %v2118_v52, %s2473_s8  ;;  %v1251_v51 = vmul.f32 %v1250_v39, %v2812_v8  ;;  %v1368_v52 = vmul.f32 %v1367_v40, %v2812_v8 }
 0x387   : > { %1233 = vrot.lane.b32.xlu1 %v2121_v56, %s2472_s5  ;;  %v1186_v56 = vmul.f32 %v1185_v42, %v2812_v8  ;;  %v1697_v59 = vadd.f32 %v2178_v41, %v1689_v47  ;;  %v1350_v41 = vmul.f32 %v1349_v37, %v2812_v8  ;;  %v1731_v47 = vstv %s3086_s18  ;;  %s2174_s18 = sld [smem:[#allocation7 + $0x60]] }
 0x388   : > { %v3043_v63 = vpop.permute.xlu0 %1139  ;;  %v1533_v6 = vpop.permute.xlu2 %1532  ;;  %v2124_v14 = vrot.slane %v1251_v51, 9  ;;  %v2139_v15 = vrot.slane %v1368_v52, 9  ;;  %v1346_v51 = vstv %s3081_s11  ;;  %v1732_v58 = vmul.f32 %v1731_v47, %v2812_v8  ;;  %s3162_s11 = sld [smem:[#allocation7 + $0x31]] }
 0x389   : > { %v1534_v16 = vrot.slane %v1533_v6, 2  ;;  %v3049_v20 = vpop.permute.xlu1 %1095  ;;  %v1194_v4 = vadd.f32 %v2115_v44, %v1186_v56  ;;  %v1775_v37 = vstv %s3118_s15  ;;  %s2482_s15 = smov 122  }
 0x38a   : > { %v1294_v52 = vstv %s2129_s10  ;;  %v1776_v47 = vmul.f32 %v1775_v37, %v2812_v8  ;;  %s674_s10 = sld [smem:[#allocation7]] }
 0x38b   : > { %v1535_v26 = vsel %vm695_vm3, %v1533_v6, %v1534_v16  ;;  %v1477_v37 = vstv %s2153_s20 }
 0x38c   : > { %v3055_v32 = vadd.f32 %v1535_v26, %v1526_v23  ;;  %v1709_v23 = vstv %s3057_s22  ;;  %v1433_v26 = vstv %s3068_s19  ;;  %s2168_s22 = sld [smem:[#allocation7 + $0x52]] }
 0x38d   : > { %v1434_v40 = vmul.f32 %v1433_v26, %v2812_v8  ;;  %s2192_s19 = sld [smem:[#allocation7 + $0x5a]] }
 0x38e   : > { %1150 = vrot.lane.b32.xlu2 %v2112_v34, %s2474_s16  ;;  %1277 = vrot.lane.b32.xlu0 %v2127_v35, %s2476_s12  ;;  %v1710_v35 = vmul.f32 %v1709_v23, %v2812_v8 }
 0x38f   : > { %1394 = vrot.lane.b32.xlu1 %v2142_v10, %s2472_s5  ;;  %v1539_v10 = vmul.f32 %v1538_v24, %v2812_v8  ;;  %v2148_v44 = vrot.slane %v1434_v40, 9 }
 0x390   : > { %v3071_v45 = vpop.permute.xlu0 %1244  ;;  %v1704_v48 = vpop.permute.xlu2 %1703  ;;  %v2181_v42 = vrot.slane %v1710_v35, 9  ;;  %v1753_v35 = vstv %s3109_s29  ;;  %s2480_s29 = smov 124  }
 0x391   : > { %v1705_v53 = vrot.slane %v1704_v48, 2  ;;  %v1201_v57 = vpop.permute.xlu1 %1200  ;;  %v2160_v43 = vrot.slane %v1539_v10, 9  ;;  %v1582_v10 = vstv %s3113_s14  ;;  %s2481_s14 = smov 123  }
 0x392   : > { %v1202_v60 = vrot.slane %v1201_v57, 2 }
 0x393   : > { %v1706_v61 = vsel %vm695_vm3, %v1704_v48, %v1705_v53  ;;  %v1560_v48 = vstv %s3092_s21  ;;  %v2136_v53 = vrot.slane %v1350_v41, 9  ;;  %s2194_s21 = sld [smem:[#allocation7 + $0x30]] }
 0x394   : > { %v3083_v6 = vadd.f32 %v1706_v61, %v1697_v59  ;;  %v1203_v11 = vsel %vm695_vm3, %v1201_v57, %v1202_v60  ;;  %v1561_v59 = vmul.f32 %v1560_v48, %v2812_v8  ;;  %v1347_v60 = vmul.f32 %v1346_v51, %v2812_v8 }
 0x395   : > { %v3088_v16 = vadd.f32 %v1203_v11, %v1194_v4  ;;  %v1295_v4 = vmul.f32 %v1294_v52, %v2812_v8  ;;  %v2190_v52 = vrot.slane %v1776_v47, 9 }
 0x396   : > { %1255 = vrot.lane.b32.xlu2 %v2124_v14, %s2471_s23  ;;  %1372 = vrot.lane.b32.xlu0 %v2139_v15, %s2473_s8  ;;  %v1355_v14 = vadd.f32 %v2136_v53, %v1347_v60  ;;  %v2163_v23 = vrot.slane %v1561_v59, 9  ;;  %v1626_v59 = vstv %s2171_s17  ;;  %s2204_s17 = sshll.u32 %s2546_s28, 6 }
 0x397   : > { %1416 = vrot.lane.b32.xlu1 %v2145_v21, %s2471_s23  ;;  %v2184_v21 = vrot.slane %v1732_v58, 9  ;;  %v2130_v26 = vrot.slane %v1295_v4, 9  ;;  %v1604_v58 = vstv %s2168_s22  ;;  %s2197_s22 = sld [smem:[#allocation8 + $0x1]] }
 0x398   : > { %v3098_v29 = vpop.permute.xlu0 %1554  ;;  %v3100_v34 = vpop.permute.xlu2 %1725 }
 0x399   : > { %v3105_v39 = vpop.permute.xlu1 %1266 }
 0x39e   : > { %1714 = vrot.lane.b32.xlu2 %v2181_v42, %s2473_s8  ;;  %1543 = vrot.lane.b32.xlu0 %v2160_v43, %s2473_s8  ;;  %s3130_s8 = sld [smem:[#allocation7 + $0x5e]]  ;;  %v1754_v42 = vmul.f32 %v1753_v35, %v2812_v8  ;;  %v1583_v43 = vmul.f32 %v1582_v10, %v2812_v8  ;;  %v1797_v35 = vstv %s2192_s19  ;;  %s325_s19 = scalar_lea.vmem [#allocation10], %s2041_s30 }
 0x39f   : > { %1438 = vrot.lane.b32.xlu1 %v2148_v44, %s2476_s12  ;;  %v1798_v47 = vmul.f32 %v1797_v35, %v2812_v8  ;;  %s1934_s28 = sshll.u32 %s325_s19, 4  ;;  %s1922_s30 = scalar_lea.sflag [#allocation5], %s2625_s9  ;;  %s1935_s28 = int_to_ptr.vmem [resolvable:$true] %s1934_s28 }
 0x3a0   : > { %v3121_v56 = vpop.permute.xlu0 %1576  ;;  %v3123_v57 = vpop.permute.xlu2 %1747  ;;  %v2187_v48 = vrot.slane %v1754_v42, 9  ;;  %v2166_v51 = vrot.slane %v1583_v43, 9 }
 0x3a1   : > { %v1362_v61 = vpop.permute.xlu1 %1361 }
 0x3a2   : > { %v1363_v11 = vrot.slane %v1362_v61, 2 }
 0x3a4   : > { %v1364_v15 = vsel %vm695_vm3, %v1362_v61, %v1363_v11  ;;  %v1316_v53 = vstv %s3130_s8  ;;  %v1605_v11 = vmul.f32 %v1604_v58, %v2812_v8  ;;  %s1857_s8 = sld [smem:[#allocation8]] }
 0x3a5   : > { %v3132_v24 = vadd.f32 %v1364_v15, %v1355_v14  ;;  %v1317_v4 = vmul.f32 %v1316_v53, %v2812_v8  ;;  %v1627_v15 = vmul.f32 %v1626_v59, %v2812_v8  ;;  %v2193_v53 = vrot.slane %v1798_v47, 9 }
 0x3a6   : > { %1736 = vrot.lane.b32.xlu2 %v2184_v21, %s2472_s5  ;;  %1565 = vrot.lane.b32.xlu0 %v2163_v23, %s2472_s5  ;;  %s2150_s5 = sld [smem:[#allocation7 + $0x58]]  ;;  %v2169_v23 = vrot.slane %v1605_v11, 9  ;;  %v679_v59 = vstv %s3162_s11  ;;  %v1810_v47 = vstv %s2194_s21  ;;  %s1933_s11 = scalar_lea.hbm %s3430_s7, %s2204_s17 }
 0x3a7   : > { %1299 = vrot.lane.b32.xlu1 %v2130_v26, %s2475_s6  ;;  %v2133_v21 = vrot.slane %v1317_v4, 9  ;;  %v2172_v26 = vrot.slane %v1627_v15, 9  ;;  %v673_v4 = vld [vmem:[#allocation2] sm:$0xf] }
 0x3a8   : > { %v3140_v40 = vpop.permute.xlu0 %1598  ;;  %v3142_v41 = vpop.permute.xlu2 %1769 }
 0x3a9   : > { %v3146_v44 = vpop.permute.xlu1 %1383 }
 0x3ac   : > { %v1455_v10 = vstv %s2150_s5 }
 0x3ae   : > { %1758 = vrot.lane.b32.xlu2 %v2187_v48, %s2471_s23  ;;  %1587 = vrot.lane.b32.xlu0 %v2166_v51, %s2471_s23  ;;  %s2195_s23 = sld [smem:[#allocation7 + $0x61]]  ;;  %v1456_v48 = vmul.f32 %v1455_v10, %v2812_v8 }
 0x3af   : > { %1780 = vrot.lane.b32.xlu1 %v2190_v52, %s2476_s12  ;;  %v1478_v52 = vmul.f32 %v1477_v37, %v2812_v8 }
 0x3b0   : > { %v3153_v60 = vpop.permute.xlu0 %1310  ;;  %v3155_v61 = vpop.permute.xlu2 %1620  ;;  %v2151_v58 = vrot.slane %v1456_v48, 9 }
 0x3b1   : > { %v3159_v14 = vpop.permute.xlu1 %1405  ;;  %v2154_v11 = vrot.slane %v1478_v52, 9  ;;  %v676_v52 = vstv %s674_s10 }
 0x3b4   : > { %v1819_v15 = vstv %s2195_s23  ;;  %s1936_s23 = sshll.u32 %s1933_s11, 4  ;;  %s1937_s23 = int_to_ptr.hbm [resolvable:$true] %s1936_s23 }
 0x3b5   : > { %v1820_v10 = vmul.f32 %v1819_v15, %v2812_v8 }
 0x3b6   : > { %1321 = vrot.lane.b32.xlu2 %v2133_v21, %s2474_s16  ;;  %1609 = vrot.lane.b32.xlu0 %v2169_v23, %s2476_s12  ;;  %v1648_v21 = vstv %s2174_s18  ;;  %v680_v23 = vmul.f32 %v679_v59, %v673_v4  ;;  %v696_v59 = vsel %vm695_vm3, %v2918_v22, %v694_v30  ;;  %v740_v30 = vrot.slane %v2912_v18, 2  ;;  %s2479_s12 = smov 125   ;;  %s2400_s18 = sshra.s32 %s1937_s23, 4  ;;  %s2401_s18 = int_to_ptr.hbm [resolvable:$true] %s2400_s18 }
 0x3b7   : > { %1631 = vrot.lane.b32.xlu1 %v2172_v26, %s2475_s6  ;;  %v1649_v48 = vmul.f32 %v1648_v21, %v2812_v8  ;;  %v2196_v36 = vrot.slane %v1820_v10, 9  ;;  %s2402_s21 = scalar_lea.hbm %s2401_s18, 64  ;;  %p2407_p0 = scmp.lt.s32.totalorder %s2401_s18, %s3430_s7 }
 0x3b8   : > { %v3167_v42 = vpop.permute.xlu0 %1791  ;;  %v3169_v43 = vpop.permute.xlu2 %1471  ;;  %p2403_p4 = scmp.ne.s32.totalorder %s2401_s18, %s2402_s21 }
 0x3b9   : > { %v3173_v51 = vpop.permute.xlu1 %1427  ;;  %v2175_v27 = vrot.slane %v1649_v48, 9  ;;  %v719_v48 = vsel %vm718_vm1, %v2886_v46, %v717_v31 }
 0x3ba   : > { %p2404_p6 = pnand %p2403_p4, %p2577_p11 }
 0x3bc   : > { %p2405_p13 = pneg %p2404_p6 }
 0x3be   : > { %1802 = vrot.lane.b32.xlu2 %v2193_v53, %s2475_s6  ;;  %1460 = vrot.lane.b32.xlu0 %v2151_v58, %s2475_s6  ;;  %v2052_v53 = vrot.slane %v680_v23, 9  ;;  %v1811_v58 = vmul.f32 %v1810_v47, %v2812_v8  ;;  %s2478_s6 = smov 126  }
 0x3bf   : > { %1482 = vrot.lane.b32.xlu1 %v2154_v11, %s2474_s16  ;;  %v677_v11 = vmul.f32 %v676_v52, %v673_v4 }
 0x3c0   : > { %v3180_v26 = vpop.permute.xlu0 %1642  ;;  %v751_v35 = vpop.permute.xlu2 %750 }
 0x3c1   : > { %v3183_v37 = vpop.permute.xlu1 %1449  ;;  %v685_v15 = vadd.f32 %v2052_v53, %v677_v11  ;;  %v752_v22 = vrot.slane %v751_v35, 2 }
 0x3c3   : > { %v698_v8 = vadd.f32 %v696_v59, %v685_v15  ;;  %v742_v59 = vsel %vm741_vm4, %v2912_v18, %v740_v30  ;;  %v753_v31 = vsel %vm741_vm4, %v751_v35, %v752_v22  ;;  %v882_v35 = vrot.slane %v2902_v3, 2 }
 0x3c4   : > { %v809_v22 = vrot.slane %v2933_v1, 2 }
 0x3c6   : > { %1824 = vrot.lane.b32.xlu2 %v2196_v36, %s2474_s16  ;;  %1813 = vrot.lane.b32.xlu0 %v1811_v58, %s2474_s16 }
 0x3c7   : > { %1653 = vrot.lane.b32.xlu1 %v2175_v27, %s2474_s16  ;;  %s2477_s16 = smov 127  }
 0x3c8   : > { %v819_v21 = vpop.permute.xlu2 %818  ;;  %v705_v33 = vpop.permute.xlu0 %704 }
 0x3c9   : > { %v706_v23 = vrot.slane %v705_v33, 2  ;;  %v728_v10 = vpop.permute.xlu1 %727 }
 0x3ca   : > { %v729_v47 = vrot.slane %v728_v10, 2 }
 0x3cb   : > { %v707_v4 = vsel %vm695_vm3, %v705_v33, %v706_v23  ;;  %v763_v33 = vrot.slane %v2939_v2, 2 }
 0x3cc   : > { %v709_v36 = vadd.f32 %v707_v4, %v698_v8  ;;  %v730_v52 = vsel %vm718_vm1, %v728_v10, %v729_v47  ;;  %v786_v4 = vrot.slane %v2894_v55, 2 }
 0x3cd   : > { %v765_v10 = vsel %vm764_vm5, %v2939_v2, %v763_v33  ;;  %v820_v2 = vrot.slane %v819_v21, 2 }
 0x3ce   : > { %v721_v27 = vadd.f32 %v719_v48, %v709_v36 }
 0x3d0   : > { %v732_v53 = vadd.f32 %v730_v52, %v721_v27  ;;  %v914_v58 = vpop.permute.xlu2 %913  ;;  %v774_v11 = vpop.permute.xlu0 %773  ;;  %v788_v52 = vsel %vm787_vm6, %v2894_v55, %v786_v4  ;;  %v810_v55 = vsel %vm383_vm2, %v2933_v1, %v809_v22  ;;  %v904_v4 = vrot.slane %v2956_v49, 2 }
 0x3d1   : > { %v797_v15 = vpop.permute.xlu1 %796  ;;  %v775_v46 = vrot.slane %v774_v11, 2  ;;  %v926_v1 = vrot.slane %v2989_v17, 2 }
 0x3d2   : > { %v744_v23 = vadd.f32 %v742_v59, %v732_v53  ;;  %v798_v48 = vrot.slane %v797_v15, 2 }
 0x3d3   : > { %v776_v36 = vsel %vm764_vm5, %v774_v11, %v775_v46 }
 0x3d4   : > { %v755_v8 = vadd.f32 %v753_v31, %v744_v23  ;;  %v799_v33 = vsel %vm787_vm6, %v797_v15, %v798_v48  ;;  %v648_v48 = vadd.s32 128, %v2679_v25 }
 0x3d6   : > { %v767_v47 = vadd.f32 %v765_v10, %v755_v8  ;;  %v883_v10 = vsel %vm718_vm1, %v2902_v3, %v882_v35  ;;  %v905_v3 = vsel %vm741_vm4, %v2956_v49, %v904_v4 }
 0x3d8   : > { %v778_v18 = vadd.f32 %v776_v36, %v767_v47  ;;  %v3207_v30 = vpop.permute.xlu2 %979  ;;  %v870_v27 = vpop.permute.xlu0 %869 }
 0x3d9   : > { %v871_v53 = vrot.slane %v870_v27, 2  ;;  %v892_v59 = vpop.permute.xlu1 %891 }
 0x3da   : > { %v790_v23 = vadd.f32 %v788_v52, %v778_v18  ;;  %v893_v31 = vrot.slane %v892_v59, 2  ;;  %v821_v18 = vsel %vm383_vm2, %v819_v21, %v820_v2  ;;  %v915_v52 = vrot.slane %v914_v58, 2 }
 0x3db   : > { %v872_v11 = vsel %vm695_vm3, %v870_v27, %v871_v53 }
 0x3dc   : > { %v801_v46 = vadd.f32 %v799_v33, %v790_v23  ;;  %v874_v8 = vadd.f32 %v872_v11, %v2969_v62  ;;  %v894_v15 = vsel %vm718_vm1, %v892_v59, %v893_v31  ;;  %v948_v33 = vrot.slane %v2914_v19, 2 }
 0x3dd   : > { %v916_v21 = vsel %vm741_vm4, %v914_v58, %v915_v52  ;;  %v3230_v59 = vand.u32 15, %v2679_v25  ;;  %v3232_v11 = vand.u32 15, %v648_v48  ;;  %v970_v58 = vrot.slane %v2983_v12, 2 }
 0x3de   : > { %v812_v47 = vadd.f32 %v810_v55, %v801_v46  ;;  %v885_v36 = vadd.f32 %v883_v10, %v874_v8  ;;  %v927_v46 = vsel %vm764_vm5, %v2989_v17, %v926_v1  ;;  %v949_v10 = vsel %vm787_vm6, %v2914_v19, %v948_v33 }
 0x3df   : > { %v1053_v55 = vrot.slane %v2935_v9, 2  ;;  %v824_v52 = vadd.s32 4294967293, %v3230_v59  ;;  %v981_v17 = vrot.slane %v3207_v30, 2 }
 0x3e0   : > { %v823_v27 = vadd.f32 %v821_v18, %v812_v47  ;;  %v896_v53 = vadd.f32 %v894_v15, %v885_v36  ;;  %v1085_v62 = vpop.permute.xlu2 %1084  ;;  %v936_v23 = vpop.permute.xlu0 %935  ;;  %v825_v18 = vadd.s32 4294967293, %v3232_v11 }
 0x3e1   : > { %v958_v35 = vpop.permute.xlu1 %957  ;;  %v937_v2 = vrot.slane %v936_v23, 2  ;;  %vm826_vm8 = vcmp.ge.s32.totalorder %v824_v52, 0 }
 0x3e2   : > { %v907_v22 = vadd.f32 %v905_v3, %v896_v53  ;;  %v959_v49 = vrot.slane %v958_v35, 2  ;;  %v834_v53 = vperm.slane %v823_v27, 2  ;;  %v833_v19 = vperm.slane %v823_v27, 0 }
 0x3e3   : > { %v938_v4 = vsel %vm764_vm5, %v936_v23, %v937_v2  ;;  %vm827_vm7 = vcmp.ge.s32.totalorder %v825_v18, 0  ;;  %v971_v27 = vsel %vm383_vm2, %v2983_v12, %v970_v58  ;;  %v1097_v12 = vrot.slane %v3049_v20, 2 }
 0x3e4   : > { %v918_v31 = vadd.f32 %v916_v21, %v907_v22  ;;  %v960_v1 = vsel %vm787_vm6, %v958_v35, %v959_v49  ;;  %v3248_v33 = vsel %vm827_vm7, %v834_v53, 0.0  ;;  %v3250_v21 = vsel %vm826_vm8, %v833_v19, 0.0 }
 0x3e5   : > { %v1075_v35 = vrot.slane %v3011_v38, 2 }
 0x3e6   : > { %v929_v8 = vadd.f32 %v927_v46, %v918_v31  ;;  %v1054_v46 = vsel %vm718_vm1, %v2935_v9, %v1053_v55 }
 0x3e7   : > { %v1076_v9 = vsel %vm741_vm4, %v3011_v38, %v1075_v35  ;;  %v1141_v35 = vrot.slane %v3043_v63, 2 }
 0x3e8   : > { %v940_v47 = vadd.f32 %v938_v4, %v929_v8  ;;  %v3241_v25 = vpop.permute.xlu2 %1150  ;;  %v1041_v36 = vpop.permute.xlu0 %1040  ;;  %v1086_v4 = vrot.slane %v1085_v62, 2 }
 0x3e9   : > { %v1042_v15 = vrot.slane %v1041_v36, 2  ;;  %v1063_v48 = vpop.permute.xlu1 %1062 }
 0x3ea   : > { %v951_v3 = vadd.f32 %v949_v10, %v940_v47  ;;  %v1064_v22 = vrot.slane %v1063_v48, 2  ;;  %v982_v10 = vsel %vm383_vm2, %v3207_v30, %v981_v17  ;;  %v1087_v19 = vsel %vm741_vm4, %v1085_v62, %v1086_v4 }
 0x3eb   : > { %v1043_v23 = vsel %vm695_vm3, %v1041_v36, %v1042_v15  ;;  %v1224_v62 = vrot.slane %v2985_v13, 2  ;;  %v1152_v4 = vrot.slane %v3241_v25, 2 }
 0x3ec   : > { %v962_v2 = vadd.f32 %v960_v1, %v951_v3  ;;  %v1045_v31 = vadd.f32 %v1043_v23, %v3030_v54  ;;  %v1065_v47 = vsel %vm718_vm1, %v1063_v48, %v1064_v22  ;;  %v1119_v48 = vrot.slane %v2958_v50, 2 }
 0x3ed   : > { %v1098_v1 = vsel %vm764_vm5, %v3049_v20, %v1097_v12 }
 0x3ee   : > { %v973_v8 = vadd.f32 %v971_v27, %v962_v2  ;;  %v1056_v49 = vadd.f32 %v1054_v46, %v1045_v31  ;;  %v1120_v2 = vsel %vm787_vm6, %v2958_v50, %v1119_v48 }
 0x3f0   : > { %v984_v36 = vadd.f32 %v982_v10, %v973_v8  ;;  %v1067_v18 = vadd.f32 %v1065_v47, %v1056_v49  ;;  %v3261_v52 = vpop.permute.xlu2 %1255  ;;  %v1107_v54 = vpop.permute.xlu0 %1106  ;;  %v1727_v8 = vrot.slane %v3100_v34, 2 }
 0x3f1   : > { %v1129_v55 = vpop.permute.xlu1 %1128  ;;  %v1108_v30 = vrot.slane %v1107_v54, 2 }
 0x3f2   : > { %v1078_v58 = vadd.f32 %v1076_v9, %v1067_v18  ;;  %v996_v15 = vperm.slane %v984_v36, 4  ;;  %v995_v53 = vperm.slane %v984_v36, 2  ;;  %v994_v17 = vperm.slane %v984_v36, 0 }
 0x3f3   : > { %v1109_v23 = vsel %vm764_vm5, %v1107_v54, %v1108_v30  ;;  %v1130_v22 = vrot.slane %v1129_v55, 2 }
 0x3f4   : > { %v1089_v3 = vadd.f32 %v1087_v19, %v1078_v58  ;;  %1001 = vrot.lane.b32.xlu2 %v996_v15, %s2477_s16  ;;  %999 = vrot.lane.b32.xlu0 %v995_v53, %s2477_s16  ;;  %v1225_v15 = vsel %vm718_vm1, %v2985_v13, %v1224_v62  ;;  %v1142_v53 = vsel %vm383_vm2, %v3043_v63, %v1141_v35  ;;  %v1246_v19 = vrot.slane %v3071_v45, 2 }
 0x3f5   : > { %997 = vrot.lane.b32.xlu1 %v994_v17, %s2477_s16  ;;  %v1131_v36 = vsel %vm787_vm6, %v1129_v55, %v1130_v22  ;;  %v1728_v55 = vsel %vm718_vm1, %v3100_v34, %v1727_v8  ;;  %v1268_v22 = vrot.slane %v3105_v39, 2  ;;  %v1749_v34 = vrot.slane %v3123_v57, 2 }
 0x3f6   : > { %v1100_v38 = vadd.f32 %v1098_v1, %v1089_v3  ;;  %v1153_v3 = vsel %vm383_vm2, %v3241_v25, %v1152_v4  ;;  %v1247_v63 = vsel %vm741_vm4, %v3071_v45, %v1246_v19 }
 0x3f7   : > { %v1269_v4 = vsel %vm764_vm5, %v3105_v39, %v1268_v22 }
 0x3f8   : > { %v1111_v31 = vadd.f32 %v1109_v23, %v1100_v38  ;;  %v1715_v46 = vpop.permute.xlu2 %1714  ;;  %v1212_v27 = vpop.permute.xlu0 %1211 }
 0x3f9   : > { %v1716_v49 = vrot.slane %v1715_v46, 2  ;;  %v1213_v10 = vrot.slane %v1212_v27, 2  ;;  %v1234_v20 = vpop.permute.xlu1 %1233 }
 0x3fa   : > { %v1122_v47 = vadd.f32 %v1120_v2, %v1111_v31  ;;  %v1235_v54 = vrot.slane %v1234_v20, 2 }
 0x3fb   : > { %v1717_v18 = vsel %vm695_vm3, %v1715_v46, %v1716_v49  ;;  %v1214_v50 = vsel %vm695_vm3, %v1212_v27, %v1213_v10  ;;  %v1290_v10 = vrot.slane %v3013_v5, 2 }
 0x3fc   : > { %v1133_v9 = vadd.f32 %v1131_v36, %v1122_v47  ;;  %v1719_v12 = vadd.f32 %v1717_v18, %v3083_v6  ;;  %v1216_v58 = vadd.f32 %v1214_v50, %v3088_v16  ;;  %v1257_v6 = vrot.slane %v3261_v52, 2 }
 0x3fd   : > { %v1236_v16 = vsel %vm718_vm1, %v1234_v20, %v1235_v54  ;;  %v1750_v47 = vsel %vm741_vm4, %v3123_v57, %v1749_v34  ;;  %v1291_v50 = vsel %vm787_vm6, %v3013_v5, %v1290_v10  ;;  %v1556_v34 = vrot.slane %v3098_v29, 2 }
 0x3fe   : > { %v1144_v30 = vadd.f32 %v1142_v53, %v1133_v9  ;;  %v1227_v17 = vadd.f32 %v1225_v15, %v1216_v58  ;;  %v1730_v48 = vadd.f32 %v1728_v55, %v1719_v12  ;;  %v1258_v27 = vsel %vm741_vm4, %v3261_v52, %v1257_v6 }
 0x3ff   : > { %v1771_v58 = vrot.slane %v3142_v41, 2  ;;  %v1385_v15 = vrot.slane %v3146_v44, 2 }
 0x400   : > { %v1155_v1 = vadd.f32 %v1153_v3, %v1144_v30  ;;  %v1238_v13 = vadd.f32 %v1236_v16, %v1227_v17  ;;  %v1737_v38 = vpop.permute.xlu2 %1736  ;;  %v1278_v23 = vpop.permute.xlu0 %1277  ;;  %v1407_v16 = vrot.slane %v3159_v14, 2 }
 0x401   : > { %v1738_v2 = vrot.slane %v1737_v38, 2  ;;  %v1395_v62 = vpop.permute.xlu1 %1394  ;;  %v1279_v8 = vrot.slane %v1278_v23, 2  ;;  %v1772_v5 = vsel %vm764_vm5, %v3142_v41, %v1771_v58  ;;  %v1386_v6 = vsel %vm718_vm1, %v3146_v44, %v1385_v15 }
 0x402   : > { %v1249_v31 = vadd.f32 %v1247_v63, %v1238_v13  ;;  %v1167_v46 = vperm.slane %v1155_v1, 4  ;;  %v1166_v25 = vperm.slane %v1155_v1, 2  ;;  %v1165_v49 = vperm.slane %v1155_v1, 0 }
 0x403   : > { %v1739_v35 = vsel %vm718_vm1, %v1737_v38, %v1738_v2  ;;  %v1280_v18 = vsel %vm764_vm5, %v1278_v23, %v1279_v8  ;;  %v1396_v57 = vrot.slane %v1395_v62, 2  ;;  %v1429_v2 = vrot.slane %v3173_v51, 2 }
 0x404   : > { %v1741_v20 = vadd.f32 %v1739_v35, %v1730_v48  ;;  %v1260_v45 = vadd.f32 %v1258_v27, %v1249_v31  ;;  %1172 = vrot.lane.b32.xlu2 %v1167_v46, %s2478_s6  ;;  %1170 = vrot.lane.b32.xlu0 %v1166_v25, %s2478_s6  ;;  %v1557_v8 = vsel %vm718_vm1, %v3098_v29, %v1556_v34  ;;  %v1312_v29 = vrot.slane %v3153_v60, 2 }
 0x405   : > { %1168 = vrot.lane.b32.xlu1 %v1165_v49, %s2478_s6  ;;  %v1397_v38 = vsel %vm718_vm1, %v1395_v62, %v1396_v57  ;;  %v1430_v49 = vsel %vm764_vm5, %v3173_v51, %v1429_v2  ;;  %s2406_s6 = scalar_lea.hbm %s3430_s7, 128 }
 0x406   : > { %v1271_v36 = vadd.f32 %v1269_v4, %v1260_v45  ;;  %v1752_v52 = vadd.f32 %v1750_v47, %v1741_v20  ;;  %p2408_p7 = scmp.lt.s32.totalorder %s2406_s6, %s2402_s21 }
 0x408   : > { %v1282_v54 = vadd.f32 %v1280_v18, %v1271_v36  ;;  %v1759_v9 = vpop.permute.xlu2 %1758  ;;  %v1373_v12 = vpop.permute.xlu0 %1372  ;;  %v1578_v36 = vrot.slane %v3121_v56, 2  ;;  %p2409_p5 = por %p2408_p7, %p2407_p0 }
 0x409   : > { %v1760_v53 = vrot.slane %v1759_v9, 2  ;;  %v1374_v39 = vrot.slane %v1373_v12, 2  ;;  %v1417_v19 = vpop.permute.xlu1 %1416 }
 0x40a   : > { %v1293_v55 = vadd.f32 %v1291_v50, %v1282_v54  ;;  %v1418_v23 = vrot.slane %v1417_v19, 2  ;;  %p2410_p8 = pnand %p2409_p5, %p2405_p13 }
 0x40b   : > { %v1761_v30 = vsel %vm741_vm4, %v1759_v9, %v1760_v53  ;;  %v1375_v17 = vsel %vm695_vm3, %v1373_v12, %v1374_v39  ;;  %v1579_v53 = vsel %vm741_vm4, %v3121_v56, %v1578_v36 }
 0x40c   : > { %v1763_v48 = vadd.f32 %v1761_v30, %v1752_v52  ;;  %v1377_v3 = vadd.f32 %v1375_v17, %v3132_v24  ;;  %v1408_v24 = vsel %vm741_vm4, %v3159_v14, %v1407_v16  ;;  %v1419_v44 = vsel %vm741_vm4, %v1417_v19, %v1418_v23 }
 0x40d   : > { %v1451_v14 = vrot.slane %v3183_v37, 2  ;;  %v1793_v16 = vrot.slane %v3167_v42, 2 }
 0x40e   : > { %v1388_v1 = vadd.f32 %v1386_v6, %v1377_v3  ;;  %v1774_v13 = vadd.f32 %v1772_v5, %v1763_v48  ;;  %v1600_v48 = vrot.slane %v3140_v40, 2 }
 0x40f   : > { %v1452_v52 = vsel %vm787_vm6, %v3183_v37, %v1451_v14  ;;  %v1313_v37 = vsel %vm383_vm2, %v3153_v60, %v1312_v29 }
 0x410   : > { %v1399_v63 = vadd.f32 %v1397_v38, %v1388_v1  ;;  %v1544_v22 = vpop.permute.xlu0 %1543 }
 0x411   : > { %v1545_v41 = vrot.slane %v1544_v22, 2  ;;  %v1439_v31 = vpop.permute.xlu1 %1438 }
 0x412   : > { %v1410_v46 = vadd.f32 %v1408_v24, %v1399_v63  ;;  %v1440_v27 = vrot.slane %v1439_v31, 2  ;;  %v1794_v24 = vsel %vm787_vm6, %v3167_v42, %v1793_v16 }
 0x413   : > { %v1546_v25 = vsel %vm695_vm3, %v1544_v22, %v1545_v41  ;;  %v1601_v22 = vsel %vm764_vm5, %v3140_v40, %v1600_v48 }
 0x414   : > { %v1421_v35 = vadd.f32 %v1419_v44, %v1410_v46  ;;  %v1548_v62 = vadd.f32 %v1546_v25, %v3055_v32  ;;  %v1441_v45 = vsel %vm764_vm5, %v1439_v31, %v1440_v27  ;;  %v1322_v32 = vpop.permute.xlu2 %1321  ;;  %v1622_v46 = vrot.slane %v3155_v61, 2 }
 0x415   : > { %v1323_v12 = vrot.slane %v1322_v32, 2 }
 0x416   : > { %v1432_v10 = vadd.f32 %v1430_v49, %v1421_v35  ;;  %v1559_v20 = vadd.f32 %v1557_v8, %v1548_v62  ;;  %v1623_v40 = vsel %vm787_vm6, %v3155_v61, %v1622_v46 }
 0x417   : > { %v1324_v30 = vsel %vm383_vm2, %v1322_v32, %v1323_v12 }
 0x418   : > { %v1443_v4 = vadd.f32 %v1441_v45, %v1432_v10  ;;  %v1566_v47 = vpop.permute.xlu0 %1565  ;;  %v1473_v10 = vrot.slane %v3169_v43, 2 }
 0x419   : > { %v1567_v18 = vrot.slane %v1566_v47, 2  ;;  %v1300_v50 = vpop.permute.xlu1 %1299 }
 0x41a   : > { %v1301_v54 = vrot.slane %v1300_v50, 2  ;;  %v1454_v51 = vadd.f32 %v1452_v52, %v1443_v4 }
 0x41b   : > { %v1568_v9 = vsel %vm718_vm1, %v1566_v47, %v1567_v18  ;;  %v1474_v18 = vsel %vm383_vm2, %v3169_v43, %v1473_v10  ;;  %vm1677_vm1 = vcmask 1006592  }
 0x41c   : > { %v1570_v58 = vadd.f32 %v1568_v9, %v1559_v20  ;;  %v1302_v15 = vsel %vm787_vm6, %v1300_v50, %v1301_v54  ;;  %v1803_v32 = vpop.permute.xlu2 %1802 }
 0x41d   : > { %v1304_v39 = vadd.f32 %v1302_v15, %v1293_v55 }
 0x41e   : > { %v1581_v19 = vadd.f32 %v1579_v53, %v1570_v58 }
 0x41f   : > { %v1315_v57 = vadd.f32 %v1313_v37, %v1304_v39  ;;  %v1804_v39 = vrot.slane %v1803_v32, 2 }
 0x420   : > { %v1588_v17 = vpop.permute.xlu0 %1587 }
 0x421   : > { %v1326_v3 = vadd.f32 %v1324_v30, %v1315_v57  ;;  %v1589_v5 = vrot.slane %v1588_v17, 2  ;;  %v1781_v6 = vpop.permute.xlu1 %1780  ;;  %v1805_v57 = vsel %vm787_vm6, %v1803_v32, %v1804_v39  ;;  %v1659_v39 = vadd.s32 2, %v3230_v59 }
 0x422   : > { %v1782_v1 = vrot.slane %v1781_v6, 2 }
 0x423   : > { %v1590_v38 = vsel %vm741_vm4, %v1588_v17, %v1589_v5  ;;  %v1330_v56 = vperm.slane %v1326_v3, 4  ;;  %v1329_v55 = vperm.slane %v1326_v3, 2  ;;  %v1328_v63 = vperm.slane %v1326_v3, 0 }
 0x424   : > { %v1592_v23 = vadd.f32 %v1590_v38, %v1581_v19  ;;  %v1783_v60 = vsel %vm764_vm5, %v1781_v6, %v1782_v1 }
 0x425   : > { %v1785_v34 = vadd.f32 %v1783_v60, %v1774_v13  ;;  %1335 = vrot.lane.b32.xlu2 %v1330_v56, %s2479_s12  ;;  %1333 = vrot.lane.b32.xlu0 %v1329_v55, %s2479_s12  ;;  %v1644_v13 = vrot.slane %v3180_v26, 2  ;;  %v986_v60 = vadd.s32 4294967294, %v3232_v11 }
 0x426   : > { %1331 = vrot.lane.b32.xlu1 %v1328_v63, %s2479_s12  ;;  %v1603_v2 = vadd.f32 %v1601_v22, %v1592_v23  ;;  %v985_v63 = vadd.s32 4294967294, %v3230_v59 }
 0x427   : > { %v1796_v41 = vadd.f32 %v1794_v24, %v1785_v34  ;;  %v1645_v20 = vsel %vm383_vm2, %v3180_v26, %v1644_v13  ;;  %vm988_vm10 = vcmp.ge.s32.totalorder %v986_v60, 0 }
 0x428   : > { %v1610_v31 = vpop.permute.xlu0 %1609  ;;  %vm987_vm11 = vcmp.ge.s32.totalorder %v985_v63, 0  ;;  %v1830_v63 = vadd.s32 3, %v3230_v59 }
 0x429   : > { %v1611_v44 = vrot.slane %v1610_v31, 2  ;;  %v1632_v25 = vpop.permute.xlu1 %1631  ;;  %v1807_v17 = vadd.f32 %v1805_v57, %v1796_v41 }
 0x42a   : > { %v1633_v35 = vrot.slane %v1632_v25, 2  ;;  %vm1834_vm8 = vcmp.lt.s32.totalorder %v1830_v63, 16 }
 0x42b   : > { %v1612_v27 = vsel %vm764_vm5, %v1610_v31, %v1611_v44  ;;  %vm1663_vm5 = vcmp.lt.s32.totalorder %v1659_v39, 16  ;;  %v3467_v39 = vld [vmem:[#allocation18_spill] sm:$0xff] }
 0x42c   : > { %v1614_v62 = vadd.f32 %v1612_v27, %v1603_v2  ;;  %v1634_v42 = vsel %vm787_vm6, %v1632_v25, %v1633_v35  ;;  %v1157_v27 = vadd.s32 4294967295, %v3232_v11  ;;  %v1156_v35 = vadd.s32 4294967295, %v3230_v59 }
 0x42e   : > { %v1625_v8 = vadd.f32 %v1623_v40, %v1614_v62  ;;  %vm1159_vm12 = vcmp.ge.s32.totalorder %v1157_v27, 0  ;;  %vm1158_vm13 = vcmp.ge.s32.totalorder %v1156_v35, 0 }
 0x430   : > { %v1636_v49 = vadd.f32 %v1634_v42, %v1625_v8  ;;  %v1461_v14 = vpop.permute.xlu0 %1460 }
 0x431   : > { %v1462_v45 = vrot.slane %v1461_v14, 2  ;;  %v1483_v4 = vpop.permute.xlu1 %1482 }
 0x432   : > { %v1647_v47 = vadd.f32 %v1645_v20, %v1636_v49  ;;  %v1484_v52 = vrot.slane %v1483_v4, 2 }
 0x433   : > { %v1463_v36 = vsel %vm787_vm6, %v1461_v14, %v1462_v45  ;;  %vm1848_vm6 = vcmask 998400  }
 0x434   : > { %v1465_v61 = vadd.f32 %v1463_v36, %v1454_v51  ;;  %v1485_v29 = vsel %vm383_vm2, %v1483_v4, %v1484_v52  ;;  %v1825_v51 = vpop.permute.xlu2 %1824  ;;  %v1488_v36 = vadd.s32 1, %v3230_v59 }
 0x435   : > { %v1826_v48 = vrot.slane %v1825_v51, 2 }
 0x436   : > { %v1476_v50 = vadd.f32 %v1474_v18, %v1465_v61  ;;  %vm1492_vm3 = vcmp.lt.s32.totalorder %v1488_v36, 16 }
 0x437   : > { %v1827_v1 = vsel %vm383_vm2, %v1825_v51, %v1826_v48 }
 0x438   : > { %v1487_v54 = vadd.f32 %v1485_v29, %v1476_v50  ;;  %v1814_v9 = vpop.permute.xlu0 %1813 }
 0x439   : > { %v1654_v12 = vpop.permute.xlu1 %1653  ;;  %v1815_v37 = vrot.slane %v1814_v9, 2 }
 0x43a   : > { %v1655_v58 = vrot.slane %v1654_v12, 2  ;;  %v1499_v15 = vperm.slane %v1487_v54, 4  ;;  %v1498_v26 = vperm.slane %v1487_v54, 2  ;;  %v1497_v53 = vperm.slane %v1487_v54, 0 }
 0x43b   : > { %v1816_v30 = vsel %vm383_vm2, %v1814_v9, %v1815_v37 }
 0x43c   : > { %v1656_v19 = vsel %vm383_vm2, %v1654_v12, %v1655_v58  ;;  %1504 = vrot.lane.b32.xlu2 %v1499_v15, %s2480_s29  ;;  %1502 = vrot.lane.b32.xlu0 %v1498_v26, %s2480_s29  ;;  %v1818_v3 = vadd.f32 %v1816_v30, %v1807_v17  ;;  %vm1174_vm2 = vcmask 1031168   ;;  %v1660_v26 = vadd.s32 2, %v3232_v11 }
 0x43d   : > { %1500 = vrot.lane.b32.xlu1 %v1497_v53, %s2480_s29  ;;  %v1658_v43 = vadd.f32 %v1656_v19, %v1647_v47 }
 0x43e   : > { %v1829_v38 = vadd.f32 %v1827_v1, %v1818_v3  ;;  %vm1664_vm4 = vcmp.lt.s32.totalorder %v1660_v26, 16  ;;  %v1831_v3 = vadd.s32 3, %v3232_v11 }
 0x43f   : > { %v1670_v5 = vperm.slane %v1658_v43, 4  ;;  %v1669_v6 = vperm.slane %v1658_v43, 2  ;;  %v1668_v16 = vperm.slane %v1658_v43, 0 }
 0x440   : > { %v1841_v56 = vperm.slane %v1829_v38, 4  ;;  %v1840_v55 = vperm.slane %v1829_v38, 2  ;;  %v1839_v23 = vperm.slane %v1829_v38, 0  ;;  %vm1835_vm7 = vcmp.lt.s32.totalorder %v1831_v3, 16 }
 0x441   : > { %v1858_v38 = vstv %s1857_s8 }
 0x444   : > { %1675 = vrot.lane.b32.xlu2 %v1670_v5, %s2481_s14  ;;  %1673 = vrot.lane.b32.xlu0 %v1669_v6, %s2481_s14 }
 0x445   : > { %1671 = vrot.lane.b32.xlu1 %v1668_v16, %s2481_s14 }
 0x44c   : > { %1846 = vrot.lane.b32.xlu2 %v1841_v56, %s2482_s15  ;;  %1844 = vrot.lane.b32.xlu0 %v1840_v55, %s2482_s15 }
 0x44d   : > { %1842 = vrot.lane.b32.xlu1 %v1839_v23, %s2482_s15  ;;  %v1862_v23 = vstv %s2197_s22 }
 0x44e   : > { %v1002_v22 = vpop.permute.xlu2 %1001 }
 0x45e   : > { %v1173_v62 = vpop.permute.xlu2 %1172 }
 0x466   : > { %v1000_v34 = vpop.permute.xlu0 %999 }
 0x467   : > { %v1005_v24 = vsel %vm1003_vm9, %v1000_v34, %v1002_v22  ;;  %v998_v2 = vpop.permute.xlu1 %997 }
 0x468   : > { %v1009_v41 = vsel %vm988_vm10, %v1005_v24, 0.0  ;;  %v1004_v31 = vsel %vm1003_vm9, %v998_v2, %v1000_v34 }
 0x469   : > { %v1011_v46 = vadd.f32 %v1009_v41, %v3248_v33  ;;  %v1008_v44 = vsel %vm987_vm11, %v1004_v31, 0.0 }
 0x46a   : > { %v1010_v25 = vadd.f32 %v1008_v44, %v3250_v21  ;;  %v1489_v21 = vadd.s32 1, %v3232_v11 }
 0x46c   : > { %vm1493_vm0 = vcmp.lt.s32.totalorder %v1489_v21, 16 }
 0x476   : > { %v1171_v40 = vpop.permute.xlu0 %1170 }
 0x477   : > { %v1176_v13 = vsel %vm1174_vm2, %v1171_v40, %v1173_v62  ;;  %v1169_v8 = vpop.permute.xlu1 %1168 }
 0x478   : > { %v1180_v42 = vsel %vm1159_vm12, %v1176_v13, 0.0  ;;  %v1175_v49 = vsel %vm1174_vm2, %v1169_v8, %v1171_v40 }
 0x479   : > { %v1182_v14 = vadd.f32 %v1180_v42, %v1011_v46  ;;  %v1179_v10 = vsel %vm1158_vm13, %v1175_v49, 0.0 }
 0x47a   : > { %v1181_v20 = vadd.f32 %v1179_v10, %v1010_v25 }
 0x47f   : > { %v1336_v33 = vpop.permute.xlu2 %1335 }
 0x496   : > { %v1505_v47 = vpop.permute.xlu2 %1504 }
 0x497   : > { %v1334_v45 = vpop.permute.xlu0 %1333 }
 0x498   : > { %v1332_v4 = vpop.permute.xlu1 %1331  ;;  %v1339_v52 = vsel %vm1337_vm14, %v1334_v45, %v1336_v33 }
 0x499   : > { %v1338_v32 = vsel %vm1337_vm14, %v1332_v4, %v1334_v45  ;;  %v1343_v18 = vadd.f32 %v1339_v52, %v1182_v14 }
 0x49a   : > { %v1342_v54 = vadd.f32 %v1338_v32, %v1181_v20 }
 0x49e   : > { %v1676_v37 = vpop.permute.xlu2 %1675 }
 0x4a6   : > { %v1847_v6 = vpop.permute.xlu2 %1846 }
 0x4ae   : > { %v1503_v61 = vpop.permute.xlu0 %1502 }
 0x4af   : > { %v1508_v50 = vsel %vm1506_vm15, %v1503_v61, %v1505_v47  ;;  %v1501_v29 = vpop.permute.xlu1 %1500 }
 0x4b0   : > { %v1512_v9 = vsel %vm1493_vm0, %v1508_v50, 0.0  ;;  %v1507_v12 = vsel %vm1506_vm15, %v1501_v29, %v1503_v61 }
 0x4b1   : > { %v1514_v58 = vadd.f32 %v1512_v9, %v1343_v18  ;;  %v1511_v15 = vsel %vm1492_vm3, %v1507_v12, 0.0  ;;  %v3465_v9 = vld [vmem:[#allocation20_spill] sm:$0xff] }
 0x4b2   : > { %v1513_v53 = vadd.f32 %v1511_v15, %v1342_v54 }
 0x4b6   : > { %v1674_v19 = vpop.permute.xlu0 %1673 }
 0x4b7   : > { %v1679_v51 = vsel %vm1677_vm1, %v1674_v19, %v1676_v37  ;;  %v1672_v43 = vpop.permute.xlu1 %1671 }
 0x4b8   : > { %v1683_v57 = vsel %vm1664_vm4, %v1679_v51, 0.0  ;;  %v1678_v30 = vsel %vm1677_vm1, %v1672_v43, %v1674_v19  ;;  %v3468_v19 = vld [vmem:[#allocation22_spill] sm:$0xff]  ;;  %v3469_v43 = vld [vmem:[#allocation19_spill] sm:$0xff] }
 0x4b9   : > { %v1685_v17 = vadd.f32 %v1683_v57, %v1514_v58  ;;  %v1682_v48 = vsel %vm1663_vm5, %v1678_v30, 0.0 }
 0x4ba   : > { %v1684_v5 = vadd.f32 %v1682_v48, %v1513_v53 }
 0x4be   : > { %v1845_v16 = vpop.permute.xlu0 %1844 }
 0x4bf   : > { %v1850_v1 = vsel %vm1848_vm6, %v1845_v16, %v1847_v6  ;;  %v1843_v34 = vpop.permute.xlu1 %1842 }
 0x4c0   : > { %v1854_v56 = vsel %vm1835_vm7, %v1850_v1, 0.0  ;;  %v1849_v24 = vsel %vm1848_vm6, %v1843_v34, %v1845_v16 }
 0x4c1   : > { %v1856_v55 = vadd.f32 %v1854_v56, %v1685_v17  ;;  %v1853_v11 = vsel %vm1834_vm8, %v1849_v24, 0.0 }
 0x4c2   : > { %v1855_v41 = vadd.f32 %v1853_v11, %v1684_v5 }
 0x4c3   : > { %v1860_v60 = vmul.f32 %v1858_v38, %v1856_v55 }
 0x4c4   : > { %v1859_v46 = vmul.f32 %v1858_v38, %v1855_v41 }
 0x4c5   : > { %v1864_v22 = vadd.f32 %v1862_v23, %v1860_v60 }
 0x4c6   : > { %v1863_v44 = vadd.f32 %v1862_v23, %v1859_v46 }
 0x4c7   : > { %v1866_v2 = vsub.f32 0.0, %v1864_v22 }
 0x4c8   : > { %v1865_v25 = vsub.f32 0.0, %v1863_v44 }
 0x4c9   : > { %v1869_v31 = vmul.f32 1.442695, %v1866_v2 }
 0x4ca   : > { %v1867_v27 = vmul.f32 1.442695, %v1865_v25 }
 0x4cb   : > { %2318 = vpow2.f32 %v1869_v31 }
 0x4cc   : > { %2320 = vpow2.f32 %v1867_v27 }
 0x4d1   : > { %v2319_v35 = vpop.eup %2318 }
 0x4d2   : > { %v1872_v62 = vadd.f32 1.0, %v2319_v35  ;;  %v2321_v40 = vpop.eup %2320 }
 0x4d3   : > { %v1871_v13 = vadd.f32 1.0, %v2321_v40 }
 0x4d4   : > { %2322 = vrcp.f32 %v1872_v62  ;;  %v1899_v49 = vand.u32 2147483648, %v1872_v62  ;;  %v1897_v10 = vand.u32 2147483647, %v1872_v62  ;;  %vm1893_vm10 = vweird.f32 %v1872_v62 }
 0x4d5   : > { %2324 = vrcp.f32 %v1871_v13  ;;  %v1884_v32 = vand.u32 2147483648, %v1871_v13  ;;  %v1882_v18 = vand.u32 2147483647, %v1871_v13  ;;  %vm1878_vm13 = vweird.f32 %v1871_v13 }
 0x4d6   : > { %v1900_v45 = vor.u32 1.1754944e-38, %v1899_v49  ;;  %vm1898_vm2 = vcmp.eq.f32.partialorder %v1897_v10, 8.507059e+37 }
 0x4d7   : > { %v1885_v15 = vor.u32 1.1754944e-38, %v1884_v32  ;;  %vm1883_vm15 = vcmp.eq.f32.partialorder %v1882_v18, 8.507059e+37 }
 0x4da   : > { %v2323_v59 = vpop.eup %2322 }
 0x4db   : > { %v1889_v8 = vmul.f32 %v2323_v59, %v1872_v62  ;;  %vm1894_vm9 = vweird.f32 %v2323_v59  ;;  %v2325_v20 = vpop.eup %2324 }
 0x4dc   : > { %vm1895_vm11 = vmor %vm1893_vm10, %vm1894_vm9  ;;  %v1874_v4 = vmul.f32 %v2325_v20, %v1871_v13  ;;  %vm1879_vm12 = vweird.f32 %v2325_v20 }
 0x4dd   : > { %v1890_v42 = vsub.f32 1.0, %v1889_v8  ;;  %vm1880_vm14 = vmor %vm1878_vm13, %vm1879_vm12 }
 0x4de   : > { %v1875_v36 = vsub.f32 1.0, %v1874_v4 }
 0x4df   : > { %v1891_v14 = vmul.f32 %v2323_v59, %v1890_v42 }
 0x4e0   : > { %v1876_v61 = vmul.f32 %v2325_v20, %v1875_v36 }
 0x4e1   : > { %v1892_v33 = vadd.f32 %v2323_v59, %v1891_v14 }
 0x4e2   : > { %v1877_v58 = vadd.f32 %v2325_v20, %v1876_v61 }
 0x4e3   : > { %v1896_v21 = vsel %vm1895_vm11, %v2323_v59, %v1892_v33 }
 0x4e4   : > { %v1901_v47 = vsel %vm1898_vm2, %v1900_v45, %v1896_v21  ;;  %v1881_v26 = vsel %vm1880_vm14, %v2325_v20, %v1877_v58 }
 0x4e5   : > { %v1904_v52 = vperm.slane %v1901_v47, 0 }
 0x4e7   : > { %v1906_v50 = vmul.f32 %v1904_v52, %v2786_v7  ;;  %v1908_v29 = vmul.f32 %v1904_v52, %v2773_v28  ;;  %v1910_v54 = vmul.f32 %v1904_v52, %v2792_v0  ;;  %v1912_v12 = vmul.f32 %v1904_v52, %v3465_v9  ;;  %v3466_v0 = vld [vmem:[#allocation21_spill] sm:$0xff] }
 0x4e8   : > { %v1886_v28 = vsel %vm1883_vm15, %v1885_v15, %v1881_v26 }
 0x4e9   : > { %1914 = vst [vmem:[%s325_s19 + $0x8] sm:$0xff] %v1906_v50  ;;  %v1903_v7 = vperm.slane %v1886_v28, 0 }
 0x4ea   : > { %1916 = vst [vmem:[%s325_s19 + $0x18] sm:$0xff] %v1908_v29 }
 0x4eb   : > { %1918 = vst [vmem:[%s325_s19 + $0x28] sm:$0xff] %v1910_v54  ;;  %v1905_v53 = vmul.f32 %v1903_v7, %v3466_v0  ;;  %v1907_v37 = vmul.f32 %v1903_v7, %v3467_v39  ;;  %v1909_v51 = vmul.f32 %v1903_v7, %v3468_v19  ;;  %v1911_v57 = vmul.f32 %v1903_v7, %v3469_v43 }
 0x4ec   : > { %1920 = vst [vmem:[%s325_s19 + $0x38] sm:$0xff] %v1912_v12 }
 0x4ed   : > { %1913 = vst [vmem:[%s325_s19] sm:$0xff] %v1905_v53 }
 0x4ee   : > { %1915 = vst [vmem:[%s325_s19 + $0x10] sm:$0xff] %v1907_v37 }
 0x4ef   : > { %1917 = vst [vmem:[%s325_s19 + $0x20] sm:$0xff] %v1909_v51 }
 0x4f0   : > { %1919 = vst [vmem:[%s325_s19 + $0x30] sm:$0xff] %v1911_v57 }
 0x4f1   : > { %2413 = shalt.err (!%p2410_p8)
}
 0x4f2   : > { %s2483_s9 = smov 256   ;;  %s2484_s14 = smov 16  }
 0x4f3   : > { %2217 = dma.vmem_to_hbm [thread:$0]  (%p2577_p11), %s1935_s28, 1024, %s1937_s23, %s1922_s30, %s2483_s9, %s2483_s9, %s2484_s14  }
 0x4f4 PF: > { %s1951_s8 = sand.u32 1, %s2448_s24   ;;  %p3471_p9 = scmp.ge.s32.totalorder %s2460_s27, 2 }
 0x4f5   : > { %s1952_s22 = scalar_lea.sflag [#allocation5], %s1951_s8 }
 0x4f6   : > { %p2231_p10 = pnand %p3471_p9, %p2581_p12 }
 0x4f8   : > { %p2232_p1 = pneg %p2231_p10 }
 0x4fa   : > { %2443 = dma.done.wait (%p2232_p1), %s1952_s22, 1024  }
 0x4fb   : > { %2445 = vsyncadd (%p2232_p1), %s1952_s22, 4294966272  ;;  %s3472_s27 = sld [smem:[#allocation15_spill]]  ;;  %s3474_s24 = smov %s2452_s25 }
 0x4fc   : > { %s3473_s17 = sld [smem:[#allocation16_spill]]  ;;  %s3475_s25 = smov %s2456_s26 }
 0x501   : > { %p22_p2 = scmp.ge.s32.totalorder %s3472_s27, 4  }
 0x502   : > { %s3476_s26 = smov %s3473_s17 }
 0x503   :  { %24 = sbr.rel (!%p22_p2) target bundleno = 10 (0xa), region = 102 }
 0x508   :  { %1958 = vsyncpa [#allocation4], 1 }
 0x509   :  { %1960 = vsyncpa [#allocation4 + $0x1], 1 }
 0x50a   :  { %1961 = vsyncpa [#allocation5], 1 }
 0x50b   :  { %1963 = vsyncpa [#allocation5 + $0x1], 1 }
 0x50c   :  { %1964 = vsyncpa [#allocation6], 1 }
 0x50d   :  { %1966 = vsyncpa [#allocation6 + $0x1], 1 }
 0x50e   :  { %1967 = vsyncpa [#allocation9], 1 }

</bundles_post_ra>
